<compile_context>
chip_gen: v6e
topology: v6e:2x2x1
jax: 0.10.0
libtpu: 0.0.40
codegen_flags: <defaults>
</compile_context>

<pallas_src>
import jax
import jax.numpy as jnp
from jax import lax
from jax.experimental import pallas as pl
from jax.experimental.pallas import tpu as pltpu

CARDINALITY = 32
BN_EPS = 1e-5


# ----------------------------- Pallas kernel ------------------------------ #
def _bottleneckx_kernel(x_ref, xt_ref, xb_ref, res_ref,
                        w1_ref, b1_ref,
                        w2_ref, b2_ref,
                        w3_ref, b3_ref,
                        o_ref, pad_ref):
    _, TH, W, Cin = x_ref.shape          # this tile's output rows
    d = xt_ref.shape[1]                  # dilation == conv2 padding == halo rows
    Cb = w1_ref.shape[1]
    Cout = w3_ref.shape[1]
    Hp, Wp, _ = pad_ref.shape            # Hp = TH + 2d
    A = Wp - W - d                       # aligned column where the interior starts

    t = pl.program_id(1)                 # row-tile index
    T = pl.num_programs(1)

    # ---- conv1 (1x1) + folded BN1 + ReLU : one channel matmul per block ----
    def conv1(x3d):
        rows = x3d.shape[0] * x3d.shape[1]
        h = jnp.dot(x3d.reshape(rows, Cin), w1_ref[...],
                    preferred_element_type=jnp.float32)
        return jnp.maximum(h + b1_ref[...], 0.0)

    h1 = conv1(x_ref[0]).astype(jnp.bfloat16)                  # (TH*W, Cb)

    # Row halos: h1 of the d rows above / below this tile.  At the image
    # border the clamped halo load is discarded and replaced by zeros, which
    # reproduces conv2's zero padding (padding = dilation in the torch module).
    h1_top = jnp.where(t > 0, conv1(xt_ref[0]), 0.0).astype(jnp.bfloat16)
    h1_bot = jnp.where(t < T - 1, conv1(xb_ref[0]), 0.0).astype(jnp.bfloat16)

    # ---- assemble the zero-haloed conv2 input in the persistent scratch ----
    # Only the left/right column halo needs explicit zeroing; every row of the
    # read window [A-d, A+W+d) is overwritten each step, so no stale VMEM data
    # can leak between grid steps (safe under megacore "parallel").
    pad_ref[:, A - d:A, :] = jnp.zeros((Hp, d, Cb), jnp.bfloat16)
    pad_ref[:, A + W:A + W + d, :] = jnp.zeros((Hp, d, Cb), jnp.bfloat16)
    pad_ref[0:d, A:A + W, :] = h1_top.reshape(d, W, Cb)
    pad_ref[d:d + TH, A:A + W, :] = h1.reshape(TH, W, Cb)
    pad_ref[d + TH:Hp, A:A + W, :] = h1_bot.reshape(d, W, Cb)

    # ---- conv2 (3x3, grouped -> dense block-diagonal, dilated) + BN2 + ReLU ----
    # 9 accumulating K=Cb matmuls into a single f32 accumulator: identical MXU
    # work to the stacked-K form but no (TH*W, 9*Cb) bf16 slab / concat stores.
    # TODO(synk): the dense block-diagonal weight inflates conv2 MXU FLOPs by
    # `cardinality`x; a per-group-cluster or shift-and-MAC path would reclaim
    # it on v5e where conv2 can become compute-bound.
    acc = None
    for kx in range(3):
        c0 = A - d + kx * d
        col = pad_ref[:, c0:c0 + W, :]                          # (Hp, W, Cb)
        for ky in range(3):
            tap = col[ky * d:ky * d + TH].reshape(TH * W, Cb)
            p = jnp.dot(tap, w2_ref[ky * 3 + kx],
                        preferred_element_type=jnp.float32)
            acc = p if acc is None else acc + p
    h2 = jnp.maximum(acc + b2_ref[...], 0.0).astype(jnp.bfloat16)

    # ---- conv3 (1x1) + folded BN3 + residual add (f32) + ReLU ----
    h3 = jnp.dot(h2, w3_ref[...], preferred_element_type=jnp.float32)
    h3 = h3 + b3_ref[...]
    out = jnp.maximum(h3.reshape(TH, W, Cout) + res_ref[0].astype(jnp.float32),
                      0.0)
    # TODO(synk): for Cout < 128 (toy config) the output store is lane-masked;
    # real DLA configs have Cout >= 128 which keeps the store lane-dense.
    o_ref[0] = out.astype(o_ref.dtype)


# ------------------------------- weight prep ------------------------------- #
def _fold_bn(gamma, beta, mean, var):
    scale = gamma / jnp.sqrt(var + BN_EPS)
    shift = beta - mean * scale
    return scale[None, :], shift[None, :]


def _expand_grouped_weight(w2g, groups):
    """torch grouped weight (Cout, Cin/g, 3, 3) -> dense (9, Cin, Cout)."""
    bottle, cpg, _, _ = w2g.shape
    whwio = jnp.transpose(w2g, (2, 3, 1, 0))            # (3, 3, cpg, bottle)
    dense = jnp.zeros((3, 3, bottle, bottle), jnp.float32)
    cpg_out = bottle // groups
    for g in range(groups):
        dense = dense.at[:, :,
                         g * cpg:(g + 1) * cpg,
                         g * cpg_out:(g + 1) * cpg_out].set(
            whwio[:, :, :, g * cpg_out:(g + 1) * cpg_out])
    return dense.reshape(9, bottle, bottle)


def prepare_params(params, dilation=1):
    """One-time weight prep (hoisted out of the per-call path).

    Folds the BN scales into the conv weights, expands the grouped conv2
    weight to its dense block-diagonal form and casts all MXU operands to
    bf16.  Call once at model-load time for inference.
    """
    s1, b1 = _fold_bn(*params["bn1"])
    s2, b2 = _fold_bn(*params["bn2"])
    s3, b3 = _fold_bn(*params["bn3"])
    w1_io = (jnp.transpose(params["w1"][:, :, 0, 0], (1, 0)) * s1).astype(jnp.bfloat16)
    w3_io = (jnp.transpose(params["w3"][:, :, 0, 0], (1, 0)) * s3).astype(jnp.bfloat16)
    w2_dense = _expand_grouped_weight(params["w2"], CARDINALITY)      # (9, Cb, Cb)
    w2_9 = (w2_dense * s2[None, :, :]).astype(jnp.bfloat16)
    return {"w1": w1_io, "b1": b1, "w2": w2_9, "b2": b2,
            "w3": w3_io, "b3": b3, "dilation": int(dilation)}


# ------------------------------- Glue / API -------------------------------- #
def _choose_row_tile(H, d, target=32):
    """Largest divisor of H that is a multiple of d and <= target."""
    for th in range(min(H, target), d - 1, -1):
        if H % th == 0 and th % d == 0:
            return th
    return H


def _vmem_limit_bytes():
    # ~20% headroom under the physical VMEM (64 MiB on v7x, 128 MiB v5e/v6e).
    try:
        return int(pltpu.get_tpu_info().vmem_capacity_bytes * 0.8)
    except Exception:
        return None   # fall back to the compiler default


def bottleneckx_forward_nhwc(x, prepped, residual=None, stride=1, row_tile=None):
    """Fused BottleneckX forward.  x / residual are NHWC; returns NHWC bf16.

    Keep the surrounding model in NHWC: this entry point does no layout
    transposes and streams everything (x, residual, output) in bf16.
    """
    # TODO(synk): stride > 1 (spatial downsampling in conv2) is not implemented
    # in-kernel; guard so callers cannot silently get wrong results.
    assert stride == 1, "Pallas BottleneckX kernel only supports stride=1"
    if residual is None:
        residual = x
    x = x.astype(jnp.bfloat16)
    residual = residual.astype(jnp.bfloat16)

    N, H, W, Cin = x.shape
    d = int(prepped["dilation"])
    w1, b1 = prepped["w1"], prepped["b1"]
    w2, b2 = prepped["w2"], prepped["b2"]
    w3, b3 = prepped["w3"], prepped["b3"]
    Cb = w1.shape[1]
    Cout = w3.shape[1]
    assert residual.shape == (N, H, W, Cout), "residual/output shape mismatch"
    assert H % d == 0, "H must be a multiple of the dilation"

    TH = row_tile if row_tile is not None else _choose_row_tile(H, d)
    assert H % TH == 0 and TH % d == 0, "row tile must divide H and be a multiple of d"
    T = H // TH                      # row tiles per image
    r = TH // d                      # row tile size in units of d-row blocks
    nH = H // d                      # number of d-row blocks in the image

    A = ((d + 15) // 16) * 16        # bf16 sublane-pair aligned interior column
    Hp = TH + 2 * d
    Wp = A + W + d

    def wspec(shape):
        # Invariant weight/bias blocks (constant index map -> no re-DMA per step).
        # TODO(synk): mark these pipeline_mode=pl.Buffered(1) to drop the unused
        # second buffer once single-buffered specs are verified on the target
        # jax version.
        return pl.BlockSpec(shape, lambda n, t: (0,) * len(shape))

    out = pl.pallas_call(
        _bottleneckx_kernel,
        out_shape=jax.ShapeDtypeStruct((N, H, W, Cout), jnp.bfloat16),
        grid_spec=pltpu.PrefetchScalarGridSpec(
            num_scalar_prefetch=0,
            grid=(N, T),
            in_specs=[
                # this row tile of x
                pl.BlockSpec((1, TH, W, Cin), lambda n, t: (n, t, 0, 0)),
                # d-row halo above / below (block indices in units of d rows,
                # clamped at the image border; the kernel zeroes them there)
                pl.BlockSpec((1, d, W, Cin),
                             lambda n, t: (n, jnp.maximum(t * r - 1, 0), 0, 0)),
                pl.BlockSpec((1, d, W, Cin),
                             lambda n, t: (n, jnp.minimum((t + 1) * r, nH - 1), 0, 0)),
                # residual tile (bf16)
                pl.BlockSpec((1, TH, W, Cout), lambda n, t: (n, t, 0, 0)),
                wspec((Cin, Cb)), wspec((1, Cb)),
                wspec((9, Cb, Cb)), wspec((1, Cb)),
                wspec((Cb, Cout)), wspec((1, Cout)),
            ],
            out_specs=pl.BlockSpec((1, TH, W, Cout), lambda n, t: (n, t, 0, 0)),
            scratch_shapes=[pltpu.VMEM((Hp, Wp, Cb), jnp.bfloat16)],
        ),
        compiler_params=pltpu.CompilerParams(
            dimension_semantics=("parallel", "parallel"),
            vmem_limit_bytes=_vmem_limit_bytes()),
    )(x, x, x, residual, w1, b1, w2, b2, w3, b3)
    return out


# ------------------------ init + pure-JAX reference ------------------------ #
def init_params(key, inplanes, planes):
    bottle = planes * CARDINALITY // 32
    cpg = bottle // CARDINALITY
    ks = jax.random.split(key, 15)
    w1 = 0.05 * jax.random.normal(ks[0], (bottle, inplanes, 1, 1), jnp.float32)
    w2 = 0.05 * jax.random.normal(ks[1], (bottle, cpg, 3, 3), jnp.float32)
    w3 = 0.05 * jax.random.normal(ks[2], (planes, bottle, 1, 1), jnp.float32)

    def bn(kg, kb, km, kv, c):
        gamma = 1.0 + 0.1 * jax.random.normal(kg, (c,), jnp.float32)
        beta = 0.1 * jax.random.normal(kb, (c,), jnp.float32)
        mean = 0.1 * jax.random.normal(km, (c,), jnp.float32)
        var = jnp.abs(jax.random.normal(kv, (c,), jnp.float32)) + 0.5
        return gamma, beta, mean, var

    return {
        "w1": w1, "w2": w2, "w3": w3,
        "bn1": bn(ks[3], ks[4], ks[5], ks[6], bottle),
        "bn2": bn(ks[7], ks[8], ks[9], ks[10], bottle),
        "bn3": bn(ks[11], ks[12], ks[13], ks[14], planes),
    }


def reference_forward(feat, params, residual=None, dilation=1):
    if residual is None:
        residual = feat

    def bn(x, gamma, beta, mean, var):
        inv = gamma / jnp.sqrt(var + BN_EPS)
        return (x - mean[None, :, None, None]) * inv[None, :, None, None] \
            + beta[None, :, None, None]

    w1, w2, w3 = params["w1"], params["w2"], params["w3"]
    dn1 = lax.conv_dimension_numbers(feat.shape, w1.shape, ("NCHW", "OIHW", "NCHW"))
    out = lax.conv_general_dilated(feat, w1, (1, 1), "VALID", dimension_numbers=dn1)
    out = jax.nn.relu(bn(out, *params["bn1"]))
    dn2 = lax.conv_dimension_numbers(out.shape, w2.shape, ("NCHW", "OIHW", "NCHW"))
    out = lax.conv_general_dilated(
        out, w2, (1, 1), [(dilation, dilation), (dilation, dilation)],
        rhs_dilation=(dilation, dilation), dimension_numbers=dn2,
        feature_group_count=CARDINALITY)
    out = jax.nn.relu(bn(out, *params["bn2"]))
    dn3 = lax.conv_dimension_numbers(out.shape, w3.shape, ("NCHW", "OIHW", "NCHW"))
    out = lax.conv_general_dilated(out, w3, (1, 1), "VALID", dimension_numbers=dn3)
    out = bn(out, *params["bn3"])
    return jax.nn.relu(out + residual)


if __name__ == "__main__":
    key = jax.random.PRNGKey(0)
    # planes must be a multiple of cardinality(=32) for the grouped conv;
    # inplanes == planes so residual=None is shape-consistent (as in DLA).
    inplanes, planes = 64, 64
    N, H, W = 2, 16, 16
    k_x, k_p = jax.random.split(key)
    feat_nchw = jax.random.normal(k_x, (N, inplanes, H, W), jnp.float32)
    params = init_params(k_p, inplanes, planes)

    # One-time weight prep (BN folding etc.), hoisted out of the per-call path.
    prepped = prepare_params(params, dilation=1)

    # The kernel is NHWC-native; this single transpose is test-harness-only
    # (a real NHWC model feeds the kernel directly -- no layout round trips).
    x_nhwc = jnp.transpose(feat_nchw, (0, 2, 3, 1)).astype(jnp.bfloat16)

    # row_tile=8 exercises the row-tiled grid (2 tiles/image) with the halo
    # exchange between neighbouring tiles and the zero-padded image borders.
    out = bottleneckx_forward_nhwc(x_nhwc, prepped, row_tile=8)
    out = jax.block_until_ready(out)
    assert out.shape == (N, H, W, planes)
    assert out.dtype == jnp.bfloat16

    ref = reference_forward(feat_nchw, params, dilation=1)
    ref_nhwc = jnp.transpose(ref, (0, 2, 3, 1))
    out_f32 = out.astype(jnp.float32)
    if not bool(jnp.allclose(out_f32, ref_nhwc, atol=6e-2, rtol=6e-2)):
        raise AssertionError(
            f"mismatch: max abs err = {float(jnp.max(jnp.abs(out_f32 - ref_nhwc)))}")
    print("KERNEL_OK")
</pallas_src>

<mosaic_0001>
module attributes {stable_mosaic.version = 11 : i64} {
  func.func @_bottleneckx_kernel(%arg0: i32, %arg1: i32, %arg2: memref<1x8x16x64xbf16, #tpu.memory_space<vmem>>, %arg3: memref<1x1x16x64xbf16, #tpu.memory_space<vmem>>, %arg4: memref<1x1x16x64xbf16, #tpu.memory_space<vmem>>, %arg5: memref<1x8x16x64xbf16, #tpu.memory_space<vmem>>, %arg6: memref<64x64xbf16, #tpu.memory_space<vmem>>, %arg7: memref<1x64xf32, #tpu.memory_space<vmem>>, %arg8: memref<9x64x64xbf16, #tpu.memory_space<vmem>>, %arg9: memref<1x64xf32, #tpu.memory_space<vmem>>, %arg10: memref<64x64xbf16, #tpu.memory_space<vmem>>, %arg11: memref<1x64xf32, #tpu.memory_space<vmem>>, %arg12: memref<1x8x16x64xbf16, #tpu.memory_space<vmem>>, %arg13: memref<10x33x64xbf16, #tpu.memory_space<vmem>>) attributes {dimension_semantics = [#tpu.dimension_semantics<parallel>, #tpu.dimension_semantics<parallel>], iteration_bounds = array<i64: 2, 2>, scalar_prefetch = 0 : i64, scratch_operands = 1 : i64, tpu.core_type = #tpu.core_type<tc>, window_params = [{transform_indices = @transform_0, window_bounds = array<i64: 1, 8, 16, 64>}, {transform_indices = @transform_1, window_bounds = array<i64: 1, 1, 16, 64>}, {transform_indices = @transform_2, window_bounds = array<i64: 1, 1, 16, 64>}, {transform_indices = @transform_3, window_bounds = array<i64: 1, 8, 16, 64>}, {pipeline_mode = #tpu.pipeline_mode<synchronous>, transform_indices = @transform_4, window_bounds = array<i64: 64, 64>}, {pipeline_mode = #tpu.pipeline_mode<synchronous>, transform_indices = @transform_5, window_bounds = array<i64: 1, 64>}, {pipeline_mode = #tpu.pipeline_mode<synchronous>, transform_indices = @transform_6, window_bounds = array<i64: 9, 64, 64>}, {pipeline_mode = #tpu.pipeline_mode<synchronous>, transform_indices = @transform_7, window_bounds = array<i64: 1, 64>}, {pipeline_mode = #tpu.pipeline_mode<synchronous>, transform_indices = @transform_8, window_bounds = array<i64: 64, 64>}, {pipeline_mode = #tpu.pipeline_mode<synchronous>, transform_indices = @transform_9, window_bounds = array<i64: 1, 64>}, {transform_indices = @transform_10, window_bounds = array<i64: 1, 8, 16, 64>}]} {
    %c0 = arith.constant 0 : index
    %c0_0 = arith.constant 0 : index
    %c0_1 = arith.constant 0 : index
    %c0_2 = arith.constant 0 : index
    %0 = vector.load %arg2[%c0, %c0_0, %c0_1, %c0_2] : memref<1x8x16x64xbf16, #tpu.memory_space<vmem>>, vector<1x8x16x64xbf16>
    %1 = vector.shape_cast %0 : vector<1x8x16x64xbf16> to vector<8x16x64xbf16>
    %2 = vector.shape_cast %1 : vector<8x16x64xbf16> to vector<128x64xbf16>
    %c0_3 = arith.constant 0 : index
    %c0_4 = arith.constant 0 : index
    %3 = vector.load %arg6[%c0_3, %c0_4] : memref<64x64xbf16, #tpu.memory_space<vmem>>, vector<64x64xbf16>
    %cst = arith.constant dense<0.000000e+00> : vector<128x64xf32>
    %4 = tpu.matmul %2, %3, %cst {dimension_numbers = #tpu.dot_dimension_numbers<[1], [0], [0], [1], [0, 0, 1, 1], [], []>} : vector<128x64xbf16>, vector<64x64xbf16>, vector<128x64xf32> -> vector<128x64xf32>
    %c0_5 = arith.constant 0 : index
    %c0_6 = arith.constant 0 : index
    %5 = vector.load %arg7[%c0_5, %c0_6] : memref<1x64xf32, #tpu.memory_space<vmem>>, vector<1x64xf32>
    %6 = vector.broadcast %5 : vector<1x64xf32> to vector<128x64xf32>
    %7 = arith.addf %4, %6 : vector<128x64xf32>
    %cst_7 = arith.constant 0.000000e+00 : f32
    %8 = vector.broadcast %cst_7 : f32 to vector<128x64xf32>
    %9 = arith.maximumf %7, %8 : vector<128x64xf32>
    %10 = arith.truncf %9 : vector<128x64xf32> to vector<128x64xbf16>
    %c0_i32 = arith.constant 0 : i32
    %11 = arith.cmpi sgt, %arg1, %c0_i32 : i32
    %c0_8 = arith.constant 0 : index
    %c0_9 = arith.constant 0 : index
    %c0_10 = arith.constant 0 : index
    %c0_11 = arith.constant 0 : index
    %12 = vector.load %arg3[%c0_8, %c0_9, %c0_10, %c0_11] : memref<1x1x16x64xbf16, #tpu.memory_space<vmem>>, vector<1x1x16x64xbf16>
    %13 = vector.shape_cast %12 : vector<1x1x16x64xbf16> to vector<1x16x64xbf16>
    %14 = vector.shape_cast %13 : vector<1x16x64xbf16> to vector<16x64xbf16>
    %c0_12 = arith.constant 0 : index
    %c0_13 = arith.constant 0 : index
    %15 = vector.load %arg6[%c0_12, %c0_13] : memref<64x64xbf16, #tpu.memory_space<vmem>>, vector<64x64xbf16>
    %cst_14 = arith.constant dense<0.000000e+00> : vector<16x64xf32>
    %16 = tpu.matmul %14, %15, %cst_14 {dimension_numbers = #tpu.dot_dimension_numbers<[1], [0], [0], [1], [0, 0, 1, 1], [], []>} : vector<16x64xbf16>, vector<64x64xbf16>, vector<16x64xf32> -> vector<16x64xf32>
    %c0_15 = arith.constant 0 : index
    %c0_16 = arith.constant 0 : index
    %17 = vector.load %arg7[%c0_15, %c0_16] : memref<1x64xf32, #tpu.memory_space<vmem>>, vector<1x64xf32>
    %18 = vector.broadcast %17 : vector<1x64xf32> to vector<16x64xf32>
    %19 = arith.addf %16, %18 : vector<16x64xf32>
    %cst_17 = arith.constant 0.000000e+00 : f32
    %20 = vector.broadcast %cst_17 : f32 to vector<16x64xf32>
    %21 = arith.maximumf %19, %20 : vector<16x64xf32>
    %cst_18 = arith.constant 0.000000e+00 : f32
    %22 = vector.broadcast %cst_18 : f32 to vector<16x64xf32>
    %23 = arith.select %11, %21, %22 : vector<16x64xf32>
    %24 = arith.truncf %23 : vector<16x64xf32> to vector<16x64xbf16>
    %c1_i32 = arith.constant 1 : i32
    %25 = arith.cmpi slt, %arg1, %c1_i32 : i32
    %c0_19 = arith.constant 0 : index
    %c0_20 = arith.constant 0 : index
    %c0_21 = arith.constant 0 : index
    %c0_22 = arith.constant 0 : index
    %26 = vector.load %arg4[%c0_19, %c0_20, %c0_21, %c0_22] : memref<1x1x16x64xbf16, #tpu.memory_space<vmem>>, vector<1x1x16x64xbf16>
    %27 = vector.shape_cast %26 : vector<1x1x16x64xbf16> to vector<1x16x64xbf16>
    %28 = vector.shape_cast %27 : vector<1x16x64xbf16> to vector<16x64xbf16>
    %c0_23 = arith.constant 0 : index
    %c0_24 = arith.constant 0 : index
    %29 = vector.load %arg6[%c0_23, %c0_24] : memref<64x64xbf16, #tpu.memory_space<vmem>>, vector<64x64xbf16>
    %cst_25 = arith.constant dense<0.000000e+00> : vector<16x64xf32>
    %30 = tpu.matmul %28, %29, %cst_25 {dimension_numbers = #tpu.dot_dimension_numbers<[1], [0], [0], [1], [0, 0, 1, 1], [], []>} : vector<16x64xbf16>, vector<64x64xbf16>, vector<16x64xf32> -> vector<16x64xf32>
    %c0_26 = arith.constant 0 : index
    %c0_27 = arith.constant 0 : index
    %31 = vector.load %arg7[%c0_26, %c0_27] : memref<1x64xf32, #tpu.memory_space<vmem>>, vector<1x64xf32>
    %32 = vector.broadcast %31 : vector<1x64xf32> to vector<16x64xf32>
    %33 = arith.addf %30, %32 : vector<16x64xf32>
    %cst_28 = arith.constant 0.000000e+00 : f32
    %34 = vector.broadcast %cst_28 : f32 to vector<16x64xf32>
    %35 = arith.maximumf %33, %34 : vector<16x64xf32>
    %cst_29 = arith.constant 0.000000e+00 : f32
    %36 = vector.broadcast %cst_29 : f32 to vector<16x64xf32>
    %37 = arith.select %25, %35, %36 : vector<16x64xf32>
    %38 = arith.truncf %37 : vector<16x64xf32> to vector<16x64xbf16>
    %cst_30 = arith.constant 0.000000e+00 : bf16
    %39 = vector.broadcast %cst_30 : bf16 to vector<10x1x64xbf16>
    %c0_31 = arith.constant 0 : index
    %c15 = arith.constant 15 : index
    %c0_32 = arith.constant 0 : index
    %40 = vector.load %arg13[%c0_31, %c15, %c0_32] : memref<10x33x64xbf16, #tpu.memory_space<vmem>>, vector<10x1x64xbf16>
    tpu.vector_store %arg13[%c0_31, %c15, %c0_32], %39 {strides = array<i32>} : memref<10x33x64xbf16, #tpu.memory_space<vmem>>, vector<10x1x64xbf16>,
    %cst_33 = arith.constant 0.000000e+00 : bf16
    %41 = vector.broadcast %cst_33 : bf16 to vector<10x1x64xbf16>
    %c0_34 = arith.constant 0 : index
    %c32 = arith.constant 32 : index
    %c0_35 = arith.constant 0 : index
    %42 = vector.load %arg13[%c0_34, %c32, %c0_35] : memref<10x33x64xbf16, #tpu.memory_space<vmem>>, vector<10x1x64xbf16>
    tpu.vector_store %arg13[%c0_34, %c32, %c0_35], %41 {strides = array<i32>} : memref<10x33x64xbf16, #tpu.memory_space<vmem>>, vector<10x1x64xbf16>,
    %43 = vector.shape_cast %24 : vector<16x64xbf16> to vector<1x16x64xbf16>
    %c0_36 = arith.constant 0 : index
    %c16 = arith.constant 16 : index
    %c0_37 = arith.constant 0 : index
    %44 = vector.load %arg13[%c0_36, %c16, %c0_37] : memref<10x33x64xbf16, #tpu.memory_space<vmem>>, vector<1x16x64xbf16>
    tpu.vector_store %arg13[%c0_36, %c16, %c0_37], %43 {strides = array<i32>} : memref<10x33x64xbf16, #tpu.memory_space<vmem>>, vector<1x16x64xbf16>,
    %45 = vector.shape_cast %10 : vector<128x64xbf16> to vector<8x16x64xbf16>
    %c1 = arith.constant 1 : index
    %c16_38 = arith.constant 16 : index
    %c0_39 = arith.constant 0 : index
    %46 = vector.load %arg13[%c1, %c16_38, %c0_39] : memref<10x33x64xbf16, #tpu.memory_space<vmem>>, vector<8x16x64xbf16>
    tpu.vector_store %arg13[%c1, %c16_38, %c0_39], %45 {strides = array<i32>} : memref<10x33x64xbf16, #tpu.memory_space<vmem>>, vector<8x16x64xbf16>,
    %47 = vector.shape_cast %38 : vector<16x64xbf16> to vector<1x16x64xbf16>
    %c9 = arith.constant 9 : index
    %c16_40 = arith.constant 16 : index
    %c0_41 = arith.constant 0 : index
    %48 = vector.load %arg13[%c9, %c16_40, %c0_41] : memref<10x33x64xbf16, #tpu.memory_space<vmem>>, vector<1x16x64xbf16>
    tpu.vector_store %arg13[%c9, %c16_40, %c0_41], %47 {strides = array<i32>} : memref<10x33x64xbf16, #tpu.memory_space<vmem>>, vector<1x16x64xbf16>,
    %c0_42 = arith.constant 0 : index
    %c15_43 = arith.constant 15 : index
    %c0_44 = arith.constant 0 : index
    %49 = vector.load %arg13[%c0_42, %c15_43, %c0_44] : memref<10x33x64xbf16, #tpu.memory_space<vmem>>, vector<10x16x64xbf16>
    %50 = vector.extract_strided_slice %49 {offsets = [0, 0, 0], sizes = [8, 16, 64], strides = [1, 1, 1]} : vector<10x16x64xbf16> to vector<8x16x64xbf16>
    %51 = vector.shape_cast %50 : vector<8x16x64xbf16> to vector<128x64xbf16>
    %c0_45 = arith.constant 0 : index
    %c0_46 = arith.constant 0 : index
    %c0_47 = arith.constant 0 : index
    %52 = vector.load %arg8[%c0_45, %c0_46, %c0_47] : memref<9x64x64xbf16, #tpu.memory_space<vmem>>, vector<1x64x64xbf16>
    %53 = vector.shape_cast %52 : vector<1x64x64xbf16> to vector<64x64xbf16>
    %cst_48 = arith.constant dense<0.000000e+00> : vector<128x64xf32>
    %54 = tpu.matmul %51, %53, %cst_48 {dimension_numbers = #tpu.dot_dimension_numbers<[1], [0], [0], [1], [0, 0, 1, 1], [], []>} : vector<128x64xbf16>, vector<64x64xbf16>, vector<128x64xf32> -> vector<128x64xf32>
    %55 = vector.extract_strided_slice %49 {offsets = [1, 0, 0], sizes = [8, 16, 64], strides = [1, 1, 1]} : vector<10x16x64xbf16> to vector<8x16x64xbf16>
    %56 = vector.shape_cast %55 : vector<8x16x64xbf16> to vector<128x64xbf16>
    %c3 = arith.constant 3 : index
    %c0_49 = arith.constant 0 : index
    %c0_50 = arith.constant 0 : index
    %57 = vector.load %arg8[%c3, %c0_49, %c0_50] : memref<9x64x64xbf16, #tpu.memory_space<vmem>>, vector<1x64x64xbf16>
    %58 = vector.shape_cast %57 : vector<1x64x64xbf16> to vector<64x64xbf16>
    %cst_51 = arith.constant dense<0.000000e+00> : vector<128x64xf32>
    %59 = tpu.matmul %56, %58, %cst_51 {dimension_numbers = #tpu.dot_dimension_numbers<[1], [0], [0], [1], [0, 0, 1, 1], [], []>} : vector<128x64xbf16>, vector<64x64xbf16>, vector<128x64xf32> -> vector<128x64xf32>
    %60 = arith.addf %54, %59 : vector<128x64xf32>
    %61 = vector.extract_strided_slice %49 {offsets = [2, 0, 0], sizes = [8, 16, 64], strides = [1, 1, 1]} : vector<10x16x64xbf16> to vector<8x16x64xbf16>
    %62 = vector.shape_cast %61 : vector<8x16x64xbf16> to vector<128x64xbf16>
    %c6 = arith.constant 6 : index
    %c0_52 = arith.constant 0 : index
    %c0_53 = arith.constant 0 : index
    %63 = vector.load %arg8[%c6, %c0_52, %c0_53] : memref<9x64x64xbf16, #tpu.memory_space<vmem>>, vector<1x64x64xbf16>
    %64 = vector.shape_cast %63 : vector<1x64x64xbf16> to vector<64x64xbf16>
    %cst_54 = arith.constant dense<0.000000e+00> : vector<128x64xf32>
    %65 = tpu.matmul %62, %64, %cst_54 {dimension_numbers = #tpu.dot_dimension_numbers<[1], [0], [0], [1], [0, 0, 1, 1], [], []>} : vector<128x64xbf16>, vector<64x64xbf16>, vector<128x64xf32> -> vector<128x64xf32>
    %66 = arith.addf %60, %65 : vector<128x64xf32>
    %c0_55 = arith.constant 0 : index
    %c16_56 = arith.constant 16 : index
    %c0_57 = arith.constant 0 : index
    %67 = vector.load %arg13[%c0_55, %c16_56, %c0_57] : memref<10x33x64xbf16, #tpu.memory_space<vmem>>, vector<10x16x64xbf16>
    %68 = vector.extract_strided_slice %67 {offsets = [0, 0, 0], sizes = [8, 16, 64], strides = [1, 1, 1]} : vector<10x16x64xbf16> to vector<8x16x64xbf16>
    %69 = vector.shape_cast %68 : vector<8x16x64xbf16> to vector<128x64xbf16>
    %c1_58 = arith.constant 1 : index
    %c0_59 = arith.constant 0 : index
    %c0_60 = arith.constant 0 : index
    %70 = vector.load %arg8[%c1_58, %c0_59, %c0_60] : memref<9x64x64xbf16, #tpu.memory_space<vmem>>, vector<1x64x64xbf16>
    %71 = vector.shape_cast %70 : vector<1x64x64xbf16> to vector<64x64xbf16>
    %cst_61 = arith.constant dense<0.000000e+00> : vector<128x64xf32>
    %72 = tpu.matmul %69, %71, %cst_61 {dimension_numbers = #tpu.dot_dimension_numbers<[1], [0], [0], [1], [0, 0, 1, 1], [], []>} : vector<128x64xbf16>, vector<64x64xbf16>, vector<128x64xf32> -> vector<128x64xf32>
    %73 = arith.addf %66, %72 : vector<128x64xf32>
    %74 = vector.extract_strided_slice %67 {offsets = [1, 0, 0], sizes = [8, 16, 64], strides = [1, 1, 1]} : vector<10x16x64xbf16> to vector<8x16x64xbf16>
    %75 = vector.shape_cast %74 : vector<8x16x64xbf16> to vector<128x64xbf16>
    %c4 = arith.constant 4 : index
    %c0_62 = arith.constant 0 : index
    %c0_63 = arith.constant 0 : index
    %76 = vector.load %arg8[%c4, %c0_62, %c0_63] : memref<9x64x64xbf16, #tpu.memory_space<vmem>>, vector<1x64x64xbf16>
    %77 = vector.shape_cast %76 : vector<1x64x64xbf16> to vector<64x64xbf16>
    %cst_64 = arith.constant dense<0.000000e+00> : vector<128x64xf32>
    %78 = tpu.matmul %75, %77, %cst_64 {dimension_numbers = #tpu.dot_dimension_numbers<[1], [0], [0], [1], [0, 0, 1, 1], [], []>} : vector<128x64xbf16>, vector<64x64xbf16>, vector<128x64xf32> -> vector<128x64xf32>
    %79 = arith.addf %73, %78 : vector<128x64xf32>
    %80 = vector.extract_strided_slice %67 {offsets = [2, 0, 0], sizes = [8, 16, 64], strides = [1, 1, 1]} : vector<10x16x64xbf16> to vector<8x16x64xbf16>
    %81 = vector.shape_cast %80 : vector<8x16x64xbf16> to vector<128x64xbf16>
    %c7 = arith.constant 7 : index
    %c0_65 = arith.constant 0 : index
    %c0_66 = arith.constant 0 : index
    %82 = vector.load %arg8[%c7, %c0_65, %c0_66] : memref<9x64x64xbf16, #tpu.memory_space<vmem>>, vector<1x64x64xbf16>
    %83 = vector.shape_cast %82 : vector<1x64x64xbf16> to vector<64x64xbf16>
    %cst_67 = arith.constant dense<0.000000e+00> : vector<128x64xf32>
    %84 = tpu.matmul %81, %83, %cst_67 {dimension_numbers = #tpu.dot_dimension_numbers<[1], [0], [0], [1], [0, 0, 1, 1], [], []>} : vector<128x64xbf16>, vector<64x64xbf16>, vector<128x64xf32> -> vector<128x64xf32>
    %85 = arith.addf %79, %84 : vector<128x64xf32>
    %c0_68 = arith.constant 0 : index
    %c17 = arith.constant 17 : index
    %c0_69 = arith.constant 0 : index
    %86 = vector.load %arg13[%c0_68, %c17, %c0_69] : memref<10x33x64xbf16, #tpu.memory_space<vmem>>, vector<10x16x64xbf16>
    %87 = vector.extract_strided_slice %86 {offsets = [0, 0, 0], sizes = [8, 16, 64], strides = [1, 1, 1]} : vector<10x16x64xbf16> to vector<8x16x64xbf16>
    %88 = vector.shape_cast %87 : vector<8x16x64xbf16> to vector<128x64xbf16>
    %c2 = arith.constant 2 : index
    %c0_70 = arith.constant 0 : index
    %c0_71 = arith.constant 0 : index
    %89 = vector.load %arg8[%c2, %c0_70, %c0_71] : memref<9x64x64xbf16, #tpu.memory_space<vmem>>, vector<1x64x64xbf16>
    %90 = vector.shape_cast %89 : vector<1x64x64xbf16> to vector<64x64xbf16>
    %cst_72 = arith.constant dense<0.000000e+00> : vector<128x64xf32>
    %91 = tpu.matmul %88, %90, %cst_72 {dimension_numbers = #tpu.dot_dimension_numbers<[1], [0], [0], [1], [0, 0, 1, 1], [], []>} : vector<128x64xbf16>, vector<64x64xbf16>, vector<128x64xf32> -> vector<128x64xf32>
    %92 = arith.addf %85, %91 : vector<128x64xf32>
    %93 = vector.extract_strided_slice %86 {offsets = [1, 0, 0], sizes = [8, 16, 64], strides = [1, 1, 1]} : vector<10x16x64xbf16> to vector<8x16x64xbf16>
    %94 = vector.shape_cast %93 : vector<8x16x64xbf16> to vector<128x64xbf16>
    %c5 = arith.constant 5 : index
    %c0_73 = arith.constant 0 : index
    %c0_74 = arith.constant 0 : index
    %95 = vector.load %arg8[%c5, %c0_73, %c0_74] : memref<9x64x64xbf16, #tpu.memory_space<vmem>>, vector<1x64x64xbf16>
    %96 = vector.shape_cast %95 : vector<1x64x64xbf16> to vector<64x64xbf16>
    %cst_75 = arith.constant dense<0.000000e+00> : vector<128x64xf32>
    %97 = tpu.matmul %94, %96, %cst_75 {dimension_numbers = #tpu.dot_dimension_numbers<[1], [0], [0], [1], [0, 0, 1, 1], [], []>} : vector<128x64xbf16>, vector<64x64xbf16>, vector<128x64xf32> -> vector<128x64xf32>
    %98 = arith.addf %92, %97 : vector<128x64xf32>
    %99 = vector.extract_strided_slice %86 {offsets = [2, 0, 0], sizes = [8, 16, 64], strides = [1, 1, 1]} : vector<10x16x64xbf16> to vector<8x16x64xbf16>
    %100 = vector.shape_cast %99 : vector<8x16x64xbf16> to vector<128x64xbf16>
    %c8 = arith.constant 8 : index
    %c0_76 = arith.constant 0 : index
    %c0_77 = arith.constant 0 : index
    %101 = vector.load %arg8[%c8, %c0_76, %c0_77] : memref<9x64x64xbf16, #tpu.memory_space<vmem>>, vector<1x64x64xbf16>
    %102 = vector.shape_cast %101 : vector<1x64x64xbf16> to vector<64x64xbf16>
    %cst_78 = arith.constant dense<0.000000e+00> : vector<128x64xf32>
    %103 = tpu.matmul %100, %102, %cst_78 {dimension_numbers = #tpu.dot_dimension_numbers<[1], [0], [0], [1], [0, 0, 1, 1], [], []>} : vector<128x64xbf16>, vector<64x64xbf16>, vector<128x64xf32> -> vector<128x64xf32>
    %104 = arith.addf %98, %103 : vector<128x64xf32>
    %c0_79 = arith.constant 0 : index
    %c0_80 = arith.constant 0 : index
    %105 = vector.load %arg9[%c0_79, %c0_80] : memref<1x64xf32, #tpu.memory_space<vmem>>, vector<1x64xf32>
    %106 = vector.broadcast %105 : vector<1x64xf32> to vector<128x64xf32>
    %107 = arith.addf %104, %106 : vector<128x64xf32>
    %cst_81 = arith.constant 0.000000e+00 : f32
    %108 = vector.broadcast %cst_81 : f32 to vector<128x64xf32>
    %109 = arith.maximumf %107, %108 : vector<128x64xf32>
    %110 = arith.truncf %109 : vector<128x64xf32> to vector<128x64xbf16>
    %c0_82 = arith.constant 0 : index
    %c0_83 = arith.constant 0 : index
    %111 = vector.load %arg10[%c0_82, %c0_83] : memref<64x64xbf16, #tpu.memory_space<vmem>>, vector<64x64xbf16>
    %cst_84 = arith.constant dense<0.000000e+00> : vector<128x64xf32>
    %112 = tpu.matmul %110, %111, %cst_84 {dimension_numbers = #tpu.dot_dimension_numbers<[1], [0], [0], [1], [0, 0, 1, 1], [], []>} : vector<128x64xbf16>, vector<64x64xbf16>, vector<128x64xf32> -> vector<128x64xf32>
    %c0_85 = arith.constant 0 : index
    %c0_86 = arith.constant 0 : index
    %113 = vector.load %arg11[%c0_85, %c0_86] : memref<1x64xf32, #tpu.memory_space<vmem>>, vector<1x64xf32>
    %114 = vector.broadcast %113 : vector<1x64xf32> to vector<128x64xf32>
    %115 = arith.addf %112, %114 : vector<128x64xf32>
    %116 = vector.shape_cast %115 : vector<128x64xf32> to vector<8x16x64xf32>
    %c0_87 = arith.constant 0 : index
    %c0_88 = arith.constant 0 : index
    %c0_89 = arith.constant 0 : index
    %c0_90 = arith.constant 0 : index
    %117 = vector.load %arg5[%c0_87, %c0_88, %c0_89, %c0_90] : memref<1x8x16x64xbf16, #tpu.memory_space<vmem>>, vector<1x8x16x64xbf16>
    %118 = vector.shape_cast %117 : vector<1x8x16x64xbf16> to vector<8x16x64xbf16>
    %119 = arith.extf %118 : vector<8x16x64xbf16> to vector<8x16x64xf32>
    %120 = arith.addf %116, %119 : vector<8x16x64xf32>
    %cst_91 = arith.constant 0.000000e+00 : f32
    %121 = vector.broadcast %cst_91 : f32 to vector<8x16x64xf32>
    %122 = arith.maximumf %120, %121 : vector<8x16x64xf32>
    %123 = arith.truncf %122 : vector<8x16x64xf32> to vector<8x16x64xbf16>
    %c0_92 = arith.constant 0 : index
    %c0_93 = arith.constant 0 : index
    %c0_94 = arith.constant 0 : index
    %c0_95 = arith.constant 0 : index
    %124 = vector.load %arg12[%c0_92, %c0_93, %c0_94, %c0_95] : memref<1x8x16x64xbf16, #tpu.memory_space<vmem>>, vector<1x8x16x64xbf16>
    %125 = vector.shape_cast %124 : vector<1x8x16x64xbf16> to vector<8x16x64xbf16>
    %126 = vector.shape_cast %123 : vector<8x16x64xbf16> to vector<1x8x16x64xbf16>
    tpu.vector_store %arg12[%c0_92, %c0_93, %c0_94, %c0_95], %126 {strides = array<i32>} : memref<1x8x16x64xbf16, #tpu.memory_space<vmem>>, vector<1x8x16x64xbf16>,
    return
  }
  func.func @transform_0(%arg0: i32, %arg1: i32) -> (i32, i32, i32, i32) {
    %c0_i32 = arith.constant 0 : i32
    %c0_i32_0 = arith.constant 0 : i32
    %c0_i32_1 = arith.constant 0 : i32
    return %arg0, %arg1, %c0_i32, %c0_i32_0 : i32, i32, i32, i32
  }
  func.func @transform_1(%arg0: i32, %arg1: i32) -> (i32, i32, i32, i32) {
    %c8_i32 = arith.constant 8 : i32
    %0 = arith.muli %arg1, %c8_i32 : i32
    %c1_i32 = arith.constant 1 : i32
    %1 = arith.subi %0, %c1_i32 : i32
    %c0_i32 = arith.constant 0 : i32
    %2 = arith.maxsi %1, %c0_i32 : i32
    %c0_i32_0 = arith.constant 0 : i32
    %c0_i32_1 = arith.constant 0 : i32
    %c0_i32_2 = arith.constant 0 : i32
    return %arg0, %2, %c0_i32_0, %c0_i32_1 : i32, i32, i32, i32
  }
  func.func @transform_2(%arg0: i32, %arg1: i32) -> (i32, i32, i32, i32) {
    %c1_i32 = arith.constant 1 : i32
    %0 = arith.addi %arg1, %c1_i32 : i32
    %c8_i32 = arith.constant 8 : i32
    %1 = arith.muli %0, %c8_i32 : i32
    %c15_i32 = arith.constant 15 : i32
    %2 = arith.minsi %1, %c15_i32 : i32
    %c0_i32 = arith.constant 0 : i32
    %c0_i32_0 = arith.constant 0 : i32
    %c0_i32_1 = arith.constant 0 : i32
    return %arg0, %2, %c0_i32, %c0_i32_0 : i32, i32, i32, i32
  }
  func.func @transform_3(%arg0: i32, %arg1: i32) -> (i32, i32, i32, i32) {
    %c0_i32 = arith.constant 0 : i32
    %c0_i32_0 = arith.constant 0 : i32
    %c0_i32_1 = arith.constant 0 : i32
    return %arg0, %arg1, %c0_i32, %c0_i32_0 : i32, i32, i32, i32
  }
  func.func @transform_4(%arg0: i32, %arg1: i32) -> (i32, i32) {
    %c0_i32 = arith.constant 0 : i32
    %c0_i32_0 = arith.constant 0 : i32
    %c0_i32_1 = arith.constant 0 : i32
    return %c0_i32, %c0_i32_0 : i32, i32
  }
  func.func @transform_5(%arg0: i32, %arg1: i32) -> (i32, i32) {
    %c0_i32 = arith.constant 0 : i32
    %c0_i32_0 = arith.constant 0 : i32
    %c0_i32_1 = arith.constant 0 : i32
    return %c0_i32, %c0_i32_0 : i32, i32
  }
  func.func @transform_6(%arg0: i32, %arg1: i32) -> (i32, i32, i32) {
    %c0_i32 = arith.constant 0 : i32
    %c0_i32_0 = arith.constant 0 : i32
    %c0_i32_1 = arith.constant 0 : i32
    %c0_i32_2 = arith.constant 0 : i32
    return %c0_i32, %c0_i32_0, %c0_i32_1 : i32, i32, i32
  }
  func.func @transform_7(%arg0: i32, %arg1: i32) -> (i32, i32) {
    %c0_i32 = arith.constant 0 : i32
    %c0_i32_0 = arith.constant 0 : i32
    %c0_i32_1 = arith.constant 0 : i32
    return %c0_i32, %c0_i32_0 : i32, i32
  }
  func.func @transform_8(%arg0: i32, %arg1: i32) -> (i32, i32) {
    %c0_i32 = arith.constant 0 : i32
    %c0_i32_0 = arith.constant 0 : i32
    %c0_i32_1 = arith.constant 0 : i32
    return %c0_i32, %c0_i32_0 : i32, i32
  }
  func.func @transform_9(%arg0: i32, %arg1: i32) -> (i32, i32) {
    %c0_i32 = arith.constant 0 : i32
    %c0_i32_0 = arith.constant 0 : i32
    %c0_i32_1 = arith.constant 0 : i32
    return %c0_i32, %c0_i32_0 : i32, i32
  }
  func.func @transform_10(%arg0: i32, %arg1: i32) -> (i32, i32, i32, i32) {
    %c0_i32 = arith.constant 0 : i32
    %c0_i32_0 = arith.constant 0 : i32
    %c0_i32_1 = arith.constant 0 : i32
    return %arg0, %arg1, %c0_i32, %c0_i32_0 : i32, i32, i32, i32
  }
}

</mosaic_0001>

<bundles_post_ra>
// kernel: tpu_custom_call.1
= control target key start
LH: loop header
LB: loop body
LE: loop exit
PB: predicated region body
PF: predicated region fallthrough
CT: control target
= control target key end

     0   :  { %s6496_s0 = inlined_call_operand.hbm [shape: bf16[2,16,16,64], index: 0, kind: input, shape index: {}]   ;;  %s6497_s1 = inlined_call_operand.hbm [shape: bf16[2,16,16,64], index: 1, kind: input, shape index: {}]   ;;  %s6498_s2 = inlined_call_operand.hbm [shape: bf16[2,16,16,64], index: 2, kind: input, shape index: {}]   ;;  %s6499_s3 = inlined_call_operand.hbm [shape: bf16[2,16,16,64], index: 3, kind: input, shape index: {}]   ;;  %s6500_s4 = inlined_call_operand.hbm [shape: bf16[64,64], index: 4, kind: input, shape index: {}]   ;;  %s6501_s5 = inlined_call_operand.vmem [shape: f32[1,64], index: 5, kind: input, shape index: {}]   ;;  %s6502_s6 = inlined_call_operand.hbm [shape: bf16[9,64,64], index: 6, kind: input, shape index: {}]   ;;  %s6503_s7 = inlined_call_operand.vmem [shape: f32[1,64], index: 7, kind: input, shape index: {}]   ;;  %s6504_s8 = inlined_call_operand.hbm [shape: bf16[64,64], index: 8, kind: input, shape index: {}]   ;;  %s6505_s9 = inlined_call_operand.vmem [shape: f32[1,64], index: 9, kind: input, shape index: {}]   ;;  %s6506_s10 = inlined_call_operand.hbm [shape: bf16[2,16,16,64], index: 10, kind: output, shape index: {}]  }
   0x1   :  { %6534 = sst [smem:[#allocation67_spill]] %s6496_s0 }
   0x2   :  { %6535 = sst [smem:[#allocation68_spill]] %s6497_s1 }
   0x3   :  { %6536 = sst [smem:[#allocation69_spill]] %s6498_s2 }
   0x4   :  { %6537 = sst [smem:[#allocation70_spill]] %s6499_s3 }
   0x5   :  { %6538 = sst [smem:[#allocation71_spill]] %s6500_s4 }
   0x6   :  { %6539 = sst [smem:[#allocation72_spill]] %s6501_s5 }
   0x7   :  { %6540 = sst [smem:[#allocation73_spill]] %s6502_s6 }
   0x8   :  { %6541 = sst [smem:[#allocation74_spill]] %s6503_s7 }
   0x9   :  { %6542 = sst [smem:[#allocation75_spill]] %s6504_s8 }
   0xa   :  { %6543 = sst [smem:[#allocation76_spill]] %s6505_s9 }
   0xb   :  { %6544 = sst [smem:[#allocation77_spill]] %s6506_s10 }
   0xc   :  { %15 = vsyncpa [#allocation4], 0 }
   0xd   :  { %17 = vsyncpa [#allocation4 + $0x1], 0 }
   0xe   :  { %18 = vsyncpa [#allocation7], 0 }
   0xf   :  { %20 = vsyncpa [#allocation7 + $0x1], 0 }
  0x10   :  { %21 = vsyncpa [#allocation10], 0 }
  0x11   :  { %23 = vsyncpa [#allocation10 + $0x1], 0 }
  0x12   :  { %24 = vsyncpa [#allocation13], 0 }
  0x13   :  { %25 = vsyncpa [#allocation5], 0 }
  0x14   :  { %27 = vsyncpa [#allocation5 + $0x1], 0  ;;  %s5140_s13 = smov 0   ;;  %s5142_s14 = smov 0  }
  0x15   :  { %s5144_s15 = smov 0   ;;  %s5146_s16 = smov 0  }
  0x16   :  { %s5148_s17 = smov 0   ;;  %s5150_s18 = smov 0  }
  0x17   :  { %s5152_s19 = smov 0   ;;  %s5154_s20 = smov 0  }
  0x18   :  { %s5156_s21 = smov 0   ;;  %s5158_s22 = smov 0  }
  0x19   :  { %s5160_s23 = smov 0   ;;  %s5162_s24 = smov 0  }
  0x1a   :  { %s5164_s25 = smov 0   ;;  %s5166_s26 = smov 0  }
  0x1b LB: > { %6545 = sst [smem:[#allocation23_spill]] %s5017_s13  ;;  %s5211_s27 = sadd.s32 4294967295, %s5069_s26   ;;  %s5069_s26 = sphi %s5166_s26, %s33_s26   ;;  %s5065_s25 = sphi %s5164_s25, %s6695_s25   ;;  %s5061_s24 = sphi %s5162_s24, %s6694_s24   ;;  %s5057_s23 = sphi %s5160_s23, %s6693_s23   ;;  %s5053_s22 = sphi %s5158_s22, %s6692_s22   ;;  %s5049_s21 = sphi %s5156_s21, %s6691_s21   ;;  %s5045_s20 = sphi %s5154_s20, %s6698_s20   ;;  %s5041_s19 = sphi %s5152_s19, %s6697_s19   ;;  %s5037_s18 = sphi %s5150_s18, %s6689_s18   ;;  %s5033_s17 = sphi %s5148_s17, %s6688_s17   ;;  %s5029_s16 = sphi %s5146_s16, %s6687_s16   ;;  %s5025_s15 = sphi %s5144_s15, %s6696_s15   ;;  %s5021_s14 = sphi %s5142_s14, %s6686_s14   ;;  %s5017_s13 = sphi %s5140_s13, %s6685_s13  }
  0x1c   : > { %6546 = sst [smem:[#allocation24_spill]] %s5021_s14  ;;  %p3701_p0 = scmp.ge.s32.totalorder %s5069_s26, 1 }
  0x1d   : > { %6547 = sst [smem:[#allocation25_spill]] %s5025_s15  ;;  %p6525_p1 = scmp.eq.s32.totalorder %s5211_s27, 0 }
  0x1e   : > { %6548 = sst [smem:[#allocation26_spill]] %s5033_s17  ;;  %p332_p3 = scmp.lt.s32.totalorder %s5069_s26, 5 }
  0x1f   : > { %6549 = sst [smem:[#allocation27_spill]] %s5037_s18  ;;  %s5071_s29 = smov [#allocation11]  }
  0x20   : > { %6550 = sst [smem:[#allocation28_spill]] %s5049_s21  ;;  %p5217_p4 = pnand %p3701_p0, %p332_p3 }
  0x21   : > { %6551 = sst [smem:[#allocation29_spill]] %s5053_s22  ;;  %s344_s30 = sshll.u32 %s5071_s29, 4  ;;  %s345_s30 = int_to_ptr.vmem [resolvable:$true] %s344_s30 }
  0x22   : > { %6552 = sst [smem:[#allocation30_spill]] %s5057_s23  ;;  %p4502_p5 = pneg %p5217_p4 }
  0x23   : > { %6553 = sst [smem:[#allocation31_spill]] %s5061_s24  ;;  %s5072_s12 = smov [#allocation12]  }
  0x24   : > { %6554 = sst [smem:[#allocation32_spill]] %s5065_s25  ;;  %p5225_p6 = pnand %p4502_p5, %p6525_p1 }
  0x25   : > { %s6555_s28 = scalar_select %p5217_p4, 1, 0 }
  0x26   : > { %s360_s10 = sshll.u32 %s5072_s12, 4  ;;  %p4717_p7 = pneg %p5225_p6  ;;  %s361_s10 = int_to_ptr.vmem [resolvable:$true] %s360_s10 }
  0x27   : > { %6556 = sst [smem:[#allocation33_spill]] %s6555_s28  ;;  %s4726_s23 = scalar_lea.vmem %s345_s30, 512 }
  0x28   : > { %p4727_p8 = scmp.ne.s32.totalorder %s345_s30, %s4726_s23  ;;  %p4734_p11 = scmp.lt.s32.totalorder %s345_s30, %s345_s30 }
  0x29   : > { %p4735_p12 = scmp.lt.s32.totalorder %s4726_s23, %s4726_s23 }
  0x2a   : > { %p4729_p9 = pnand %p4727_p8, %p4717_p7 }
  0x2b   : > { %p4736_p13 = por %p4735_p12, %p4734_p11 }
  0x2c   : > { %p4730_p10 = pneg %p4729_p9 }
  0x2e   : > { %p4737_p0 = pnand %p4736_p13, %p4730_p10 }
  0x30   : > { %4740 = shalt.err (!%p4737_p0)
}
  0x31   : > { %s6509_s29 = smov 64   ;;  %s6511_s9 = smov 4  }
  0x32   : > { %s6558_s4 = sld [smem:[#allocation71_spill]]  ;;  %s4752_s5 = scalar_lea.vmem %s361_s10, 4608 }
  0x33   : > { %p4753_p3 = scmp.ne.s32.totalorder %s361_s10, %s4752_s5  ;;  %p4760_p9 = scmp.lt.s32.totalorder %s361_s10, %s361_s10 }
  0x34   : > { %p4761_p10 = scmp.lt.s32.totalorder %s4752_s5, %s4752_s5 }
  0x35   : > { %p4755_p5 = pnand %p4753_p3, %p4717_p7 }
  0x36   : > { %p4762_p11 = por %p4761_p10, %p4760_p9 }
  0x37   : > { %p4756_p8 = pneg %p4755_p5 }
  0x38   : > { %4505 = dma.hbm_to_vmem [thread:$0]  (!%p5225_p6), %s6558_s4, 512, %s345_s30, [#allocation10], %s6509_s29, %s6509_s29, %s6511_s9  }
  0x39   : > { %p4763_p12 = pnand %p4762_p11, %p4756_p8 }
  0x3b   : > { %4766 = shalt.err (!%p4763_p12)
}
  0x3c   : > { %s6559_s6 = sld [smem:[#allocation73_spill]]  ;;  %s42_s5 = sadd.s32 1, %s5061_s24 }
  0x3d   : > { %p43_p13 = scmp.ge.s32.totalorder %s42_s5, 2  ;;  %s45_s7 = sadd.s32 1, %s5065_s25 }
  0x3e   : > { %p6527_p0 = scmp.eq.s32.totalorder %s5069_s26, 0  ;;  %s3695_s30 = sshll.u32 %s5061_s24, 3 }
  0x3f   : > { %s6700_s5 = smov (%p43_p13, %s42_s5), 0  ;;  %s6702_s7 = smov (!%p43_p13, %s45_s7), %s5065_s25 }
  0x40   : > { %6560 = sst [smem:[#allocation34_spill]] %s6700_s5  ;;  %s50_s22 = ssub.s32 %s5061_s24, %s6700_s5 }
  0x41   : > { %s3696_s12 = sadd.s32 4294967295, %s3695_s30  ;;  %p47_p3 = scmp.ge.s32.totalorder %s6702_s7, 2 }
  0x42   : > { %4508 = dma.hbm_to_vmem [thread:$0]  (!%p5225_p6), %s6559_s6, 4608, %s361_s10, [#allocation13], %s6509_s29, %s6509_s29, %s6511_s9  }
  0x43   : > { %p79_p5 = scmp.gt.s32.totalorder %s3696_s12, 0  ;;  %s3697_s10 = sshll.u32 %s6700_s5, 3 }
  0x44   : > { %s90_s23 = sadd.s32 1, %s5037_s18  ;;  %s6704_s7 = smov (%p47_p3, %s6702_s7), 0 }
  0x45   : > { %6561 = sst [smem:[#allocation35_spill]] %s6704_s7  ;;  %s6706_s12 = smov (!%p79_p5, %s3696_s12), 0 }
  0x46   : > { %s5268_s29 = ssub.s32 %s5065_s25, %s6704_s7  ;;  %s3698_s9 = sadd.s32 4294967295, %s3697_s10 }
  0x47   : > { %6562 = sst [smem:[#allocation36_spill]] %s5268_s29  ;;  %s5271_s4 = sor.u32 %s50_s22, %s5268_s29 }
  0x48   : > { %p83_p8 = scmp.gt.s32.totalorder %s3698_s9, 0  ;;  %p97_p10 = scmp.ne.s32.totalorder %s5037_s18, %s5033_s17 }
  0x49   : > { %p103_p12 = scmp.ne.s32.totalorder %s5033_s17, %s5029_s16  ;;  %s5284_s5 = sadd.s32 8, %s3695_s30 }
  0x4a   : > { %s6708_s9 = smov (!%p83_p8, %s3698_s9), 0  ;;  %p5278_p11 = por %p97_p10, %p6527_p0 }
  0x4b   : > { %s86_s7 = ssub.s32 %s6706_s12, %s6708_s9  ;;  %6564 = sst [smem:[#allocation37_spill]] %s5284_s5 }
  0x4c   : > { %s87_s22 = sor.u32 %s86_s7, %s5268_s29  ;;  %p5289_p13 = por %p103_p12, %p6525_p1 }
  0x4d   : > { %p88_p3 = scmp.eq.s32.totalorder %s87_s22, 0  ;;  %s5294_s2 = sadd.s32 8, %s3697_s10 }
  0x4e   : > { %s6565_s28 = scalar_select %p5289_p13, 1, 0 }
  0x4f   : > { %p6526_p8 = scmp.lt.s32.totalorder %s5069_s26, 4  ;;  %s5302_s9 = sshll.u32 %s5065_s25, 5 }
  0x50   : > { %6566 = sst [smem:[#allocation38_spill]] %s6565_s28  ;;  %s419_s7 = sand.u32 1, %s5037_s18  }
  0x51   : > { %s5298_s13 = scalar_select %p88_p3, %s5037_s18, %s90_s23  }
  0x52   : > { %s3711_s30 = sshll.u32 %s419_s7, 3  ;;  %s3714_s17 = sshll.u32 %s6706_s12, 1 }
  0x53   : > { %6567 = sst [smem:[#allocation39_spill]] %s5298_s13  ;;  %s431_s28 = sadd.s32 %s3714_s17, %s5302_s9 }
  0x54   : > { %s421_s22 = scalar_lea.vmem [#allocation6], %s3711_s30  ;;  %s3716_s14 = sshll.u32 %s431_s28, 6 }
  0x55   : > { %s434_s29 = sshll.u32 %s421_s22, 4  ;;  %s6568_s1 = sld [smem:[#allocation68_spill]]  ;;  %s435_s29 = int_to_ptr.vmem [resolvable:$true] %s434_s29 }
  0x56   : > { %p5314_p12 = pnand %p6526_p8, %p5278_p11  ;;  %s5075_s16 = smov [#allocation14]  }
  0x57   : > { %s376_s25 = sshll.u32 %s5075_s16, 4  ;;  %s6570_s7 = sand.u32 1, %s5069_s26   ;;  %s377_s25 = int_to_ptr.vmem [resolvable:$true] %s376_s25 }
  0x58   : > { %s5320_s12 = scalar_lea.sflag [#allocation7], %s6570_s7  ;;  %p4769_p3 = pneg %p5314_p12 }
  0x59   : > { %s4780_s17 = scalar_lea.vmem %s435_s29, 128  ;;  %s5076_s15 = smov [#allocation6]  }
  0x5a   : > { %p4781_p10 = scmp.ne.s32.totalorder %s435_s29, %s4780_s17 }
  0x5b   : > { %s433_s5 = scalar_lea.hbm %s6568_s1, %s3716_s14  ;;  %s4785_s14 = sshll.u32 %s5076_s15, 4  ;;  %s4786_s14 = int_to_ptr.vmem [resolvable:$false] %s4785_s14 }
  0x5c   : > { %p4783_p5 = pnand %p4781_p10, %p4769_p3  ;;  %s4787_s6 = scalar_lea.vmem %s4786_s14, 256 }
  0x5d   : > { %p4788_p11 = scmp.lt.s32.totalorder %s435_s29, %s4786_s14  ;;  %p4789_p8 = scmp.lt.s32.totalorder %s4787_s6, %s4780_s17 }
  0x5e   : > { %p4784_p1 = pneg %p4783_p5 }
  0x5f   : > { %p4790_p2 = por %p4789_p8, %p4788_p11 }
  0x61   : > { %p4791_p0 = pnand %p4790_p2, %p4784_p1 }
  0x63   : > { %4794 = shalt.err (!%p4791_p0)
}
  0x64   : > { %s6571_s28 = smov 4   ;;  %s6572_s16 = smov 64  }
  0x65   : > { %4518 = dma.hbm_to_vmem [thread:$0]  (!%p5314_p12), %s433_s5, 128, %s435_s29, %s5320_s12, %s6572_s16, %s6572_s16, %s6571_s28  }
  0x66   : > { %s4806_s30 = scalar_lea.vmem %s377_s25, 512  ;;  %p4814_p9 = scmp.lt.s32.totalorder %s377_s25, %s377_s25 }
  0x67   : > { %p4807_p5 = scmp.ne.s32.totalorder %s377_s25, %s4806_s30  ;;  %p4815_p13 = scmp.lt.s32.totalorder %s4806_s30, %s4806_s30 }
  0x69   : > { %p4809_p10 = pnand %p4807_p5, %p4717_p7  ;;  %p4816_p8 = por %p4815_p13, %p4814_p9 }
  0x6b   : > { %p4810_p3 = pneg %p4809_p10 }
  0x6d   : > { %p4817_p1 = pnand %p4816_p8, %p4810_p3 }
  0x6f   : > { %4820 = shalt.err (!%p4817_p1)
}
  0x70   : > { %s6573_s8 = sld [smem:[#allocation75_spill]]  ;;  %s3694_s11 = sadd.s32 4294967294, %s5069_s26  }
  0x71   : > { %s54_s29 = sadd.s32 1, %s5049_s21  ;;  %p61_p2 = scmp.ne.s32.totalorder %s5049_s21, %s5045_s20 }
  0x72   : > { %p6574_p7 = scmp.eq.s32.totalorder %s5271_s4, 0  ;;  %p6576_p0 = scmp.eq.s32.totalorder %s5069_s26, 0 }
  0x73   : > { %p67_p13 = scmp.ne.s32.totalorder %s5045_s20, %s5041_s19  ;;  %p6578_p12 = scmp.eq.s32.totalorder %s5211_s27, 3 }
  0x74   : > { %s5348_s5 = scalar_select %p6574_p7, %s5049_s21, %s54_s29  }
  0x75   : > { %p5352_p9 = por %p6576_p0, %p61_p2  ;;  %p5360_p11 = por %p6578_p12, %p61_p2 }
  0x76   : > { %4511 = dma.hbm_to_vmem [thread:$0]  (!%p5225_p6), %s6573_s8, 512, %s377_s25, [#allocation13], %s6572_s16, %s6572_s16, %s6571_s28  }
  0x77   : > { %6575 = sst [smem:[#allocation40_spill]] %s5348_s5  ;;  %p325_p6 = scmp.eq.s32.totalorder %s3694_s11, 3 }
  0x78   : > { %s6579_s7 = scalar_select %p5360_p11, 1, 0 }
  0x79   : > { %p6580_p5 = scmp.eq.s32.totalorder %s5211_s27, 0  ;;  %s393_s4 = sand.u32 1, %s5049_s21  }
  0x7a   : > { %p5371_p3 = por %p325_p6, %p67_p13  ;;  %s3706_s15 = sshll.u32 %s393_s4, 6 }
  0x7b   : > { %p5366_p10 = por %p6580_p5, %p67_p13  ;;  %s3970_s14 = sshll.u32 %s5061_s24, 4 }
  0x7c   : > { %s6582_s17 = scalar_select %p5371_p3, 1, 0 }
  0x7d   : > { %s404_s6 = sadd.s32 %s3970_s14, %s5302_s9  ;;  %s397_s22 = scalar_lea.vmem [#allocation3], %s3706_s15 }
  0x7e   : > { %s3710_s30 = sshll.u32 %s404_s6, 6  ;;  %s407_s10 = sshll.u32 %s397_s22, 4  ;;  %s408_s10 = int_to_ptr.vmem [resolvable:$true] %s407_s10 }
  0x7f   : > { %s6583_s0 = sld [smem:[#allocation67_spill]]  ;;  %p6584_p8 = scmp.lt.s32.totalorder %s5069_s26, 4 }
  0x80   : > { %s6586_s3 = sld [smem:[#allocation70_spill]]  ;;  %s475_s6 = scalar_lea.vmem [#allocation9], %s3706_s15 }
  0x81   : > { %p5384_p1 = pnand %p6584_p8, %p5352_p9  ;;  %s485_s22 = sshll.u32 %s475_s6, 4  ;;  %s5393_s22 = int_to_ptr.vmem [resolvable:$true] %s485_s22 }
  0x82   : > { %s394_s1 = scalar_lea.sflag [#allocation4], %s393_s4  ;;  %s4834_s23 = scalar_lea.vmem %s408_s10, 1024 }
  0x83   : > { %p4823_p2 = pneg %p5384_p1  ;;  %p4835_p7 = scmp.ne.s32.totalorder %s408_s10, %s4834_s23 }
  0x84   : > { %s5077_s29 = smov [#allocation3]  }
  0x85   : > { %s406_s11 = scalar_lea.hbm %s6583_s0, %s3710_s30  ;;  %p4837_p0 = pnand %p4835_p7, %p4823_p2 }
  0x86   : > { %s5391_s14 = scalar_lea.hbm %s6586_s3, %s3710_s30  ;;  %s4839_s0 = sshll.u32 %s5077_s29, 4  ;;  %s4840_s0 = int_to_ptr.vmem [resolvable:$false] %s4839_s0 }
  0x87   : > { %p4838_p9 = pneg %p4837_p0  ;;  %s4841_s21 = scalar_lea.vmem %s4840_s0, 2048 }
  0x88   : > { %p4842_p13 = scmp.lt.s32.totalorder %s408_s10, %s4840_s0  ;;  %p4843_p12 = scmp.lt.s32.totalorder %s4841_s21, %s4834_s23 }
  0x8a   : > { %p4844_p6 = por %p4843_p12, %p4842_p13 }
  0x8c   : > { %p4845_p5 = pnand %p4844_p6, %p4838_p9 }
  0x8e   : > { %4848 = shalt.err (!%p4845_p5)
}
  0x8f   : > { %s6587_s5 = sld [smem:[#allocation37_spill]]  ;;  %p6593_p7 = scmp.lt.s32.totalorder %s5294_s2, 15 }
  0x90   : > { %s6588_s4 = sld [smem:[#allocation25_spill]]  ;;  %p6594_p13 = scmp.eq.s32.totalorder %s5069_s26, 0 }
  0x91   : > { %s6589_s15 = sld [smem:[#allocation24_spill]]  ;;  %s6712_s2 = smov (!%p6593_p7, %s5294_s2), 15 }
  0x92   : > { %s6590_s30 = sld [smem:[#allocation23_spill]]  ;;  %p6596_p5 = scmp.eq.s32.totalorder %s5211_s27, 0 }
  0x93   : > { %s6591_s6 = sld [smem:[#allocation36_spill]]  ;;  %p6599_p7 = scmp.lt.s32.totalorder %s5069_s26, 4 }
  0x94   : > { %4515 = dma.hbm_to_vmem [thread:$0]  (!%p5384_p1), %s406_s11, 1024, %s408_s10, %s394_s1, %s6572_s16, %s6572_s16, %s6571_s28  }
  0x95   : > { %p6592_p8 = scmp.lt.s32.totalorder %s6587_s5, 15  ;;  %s6598_s3 = sld [smem:[#allocation69_spill]] }
  0x96   : > { %s126_s0 = sadd.s32 1, %s6588_s4 }
  0x97   : > { %s6710_s5 = smov (!%p6592_p8, %s6587_s5), 15  ;;  %p133_p0 = scmp.ne.s32.totalorder %s6588_s4, %s6589_s15 }
  0x98   : > { %s122_s23 = ssub.s32 %s6710_s5, %s6712_s2  ;;  %p139_p9 = scmp.ne.s32.totalorder %s6589_s15, %s6590_s30 }
  0x99   : > { %s123_s29 = sor.u32 %s122_s23, %s6591_s6  ;;  %p5419_p12 = por %p133_p0, %p6594_p13 }
  0x9a   : > { %p124_p6 = scmp.eq.s32.totalorder %s123_s29, 0  ;;  %p5425_p8 = por %p139_p9, %p6596_p5 }
  0x9b   : > { %s446_s2 = sand.u32 1, %s6588_s4   ;;  %s3719_s11 = sshll.u32 %s6710_s5, 1 }
  0x9c   : > { %s6597_s10 = scalar_select %p5425_p8, 1, 0 }
  0x9d   : > { %s6714_s4 = smov (!%p124_p6, %s6588_s4), %s126_s0  ;;  %s3717_s1 = sshll.u32 %s446_s2, 3 }
  0x9e   : > { %s458_s15 = sadd.s32 %s3719_s11, %s5302_s9  ;;  %s448_s29 = scalar_lea.vmem [#allocation8], %s3717_s1 }
  0x9f   : > { %s3721_s30 = sshll.u32 %s458_s15, 6  ;;  %s461_s13 = sshll.u32 %s448_s29, 4  ;;  %s5439_s13 = int_to_ptr.vmem [resolvable:$true] %s461_s13 }
  0xa0   : > { %s5437_s24 = scalar_lea.hbm %s6598_s3, %s3721_s30  ;;  %p5445_p0 = pnand %p6599_p7, %p5419_p12 }
  0xa1   : > { %s6601_s5 = sand.u32 1, %s5069_s26   ;;  %s4862_s9 = scalar_lea.vmem %s5393_s22, 1024 }
  0xa2   : > { %s472_s0 = scalar_lea.sflag [#allocation10], %s6601_s5  ;;  %p4863_p9 = scmp.ne.s32.totalorder %s5393_s22, %s4862_s9 }
  0xa3   : > { %s5078_s3 = smov [#allocation9]  }
  0xa4   : > { %p4865_p13 = pnand %p4863_p9, %p4823_p2  ;;  %s4867_s2 = sshll.u32 %s5078_s3, 4  ;;  %s4868_s2 = int_to_ptr.vmem [resolvable:$false] %s4867_s2 }
  0xa5   : > { %s4869_s11 = scalar_lea.vmem %s4868_s2, 2048  ;;  %p4870_p5 = scmp.lt.s32.totalorder %s5393_s22, %s4868_s2 }
  0xa6   : > { %p4866_p6 = pneg %p4865_p13  ;;  %p4871_p3 = scmp.lt.s32.totalorder %s4869_s11, %s4862_s9 }
  0xa8   : > { %p4872_p11 = por %p4871_p3, %p4870_p5 }
  0xaa   : > { %p4873_p8 = pnand %p4872_p11, %p4866_p6 }
  0xac   : > { %4876 = shalt.err (!%p4873_p8)
}
  0xad   : > { %4524 = dma.hbm_to_vmem [thread:$0]  (!%p5384_p1), %s5391_s14, 1024, %s5393_s22, %s472_s0, %s6572_s16, %s6572_s16, %s6571_s28  }
  0xae   : > { %p4879_p2 = pneg %p5445_p0  ;;  %s4890_s21 = scalar_lea.vmem %s5439_s13, 128 }
  0xaf   : > { %p4891_p12 = scmp.ne.s32.totalorder %s5439_s13, %s4890_s21  ;;  %s5079_s1 = smov [#allocation8]  }
  0xb0   : > { %s4895_s15 = sshll.u32 %s5079_s1, 4  ;;  %s4896_s15 = int_to_ptr.vmem [resolvable:$false] %s4895_s15 }
  0xb1   : > { %p4893_p7 = pnand %p4891_p12, %p4879_p2  ;;  %s4897_s8 = scalar_lea.vmem %s4896_s15, 256 }
  0xb2   : > { %p4898_p11 = scmp.lt.s32.totalorder %s5439_s13, %s4896_s15  ;;  %p4899_p8 = scmp.lt.s32.totalorder %s4897_s8, %s4890_s21 }
  0xb3   : > { %p4894_p3 = pneg %p4893_p7 }
  0xb4   : > { %p4900_p9 = por %p4899_p8, %p4898_p11 }
  0xb6   : > { %p4901_p13 = pnand %p4900_p9, %p4894_p3 }
  0xb8   : > { %4904 = shalt.err (!%p4901_p13)
}
  0xb9   : > { %4521 = dma.hbm_to_vmem [thread:$0]  (!%p5445_p0), %s5437_s24, 128, %s5439_s13, %s5320_s12, %s6572_s16, %s6572_s16, %s6571_s28  }
  0xba   : > { %497 = sbr.rel (%p5217_p4) target bundleno = 1050 (0x41a), region = 60 }
  0xbf   : > { %s5480_s22 = sand.u32 1, %s5045_s20  }
  0xc0   : > { %s5483_s30 = sshll.u32 %s5480_s22, 6  ;;  %s500_s18 = scalar_lea.sflag [#allocation4], %s5480_s22 }
  0xc1   : > { %s5487_s6 = scalar_lea.vmem [#allocation3], %s5483_s30 }
  0xc2   : > { %4988 = dma.done.wait (%p5366_p10), %s500_s18, 1024  }
  0xc3   : > { %4990 = vsyncadd (%p5366_p10), %s500_s18, 4294966272  ;;  %s6603_s13 = sld [smem:[#allocation26_spill]]  ;;  %s508_s12 = sand.u32 1, %s5211_s27  }
  0xc4   : > { %s6604_s24 = sld [smem:[#allocation38_spill]]  ;;  %s509_s23 = scalar_lea.sflag [#allocation7], %s508_s12 }
  0xc9   : > { %s510_s28 = sand.u32 1, %s6603_s13  }
  0xca   : > { %s5495_s16 = sshll.u32 %s510_s28, 3  ;;  %p6605_p4 = scmp.ne.s32.totalorder %s6604_s24, 0 }
  0xcb   : > { %s512_s29 = scalar_lea.vmem [#allocation6], %s5495_s16 }
  0xcc   : > { %4992 = dma.done.wait (%p6605_p4), %s509_s23, 128  }
  0xcd   : > { %4994 = vsyncadd (%p6605_p4), %s509_s23, 4294967168  ;;  %s6606_s5 = sld [smem:[#allocation24_spill]]  ;;  %p6607_p1 = scmp.ne.s32.totalorder %s6597_s10, 0 }
  0xd3   : > { %s519_s0 = sand.u32 1, %s6606_s5  }
  0xd4   : > { %s5503_s9 = sshll.u32 %s519_s0, 3 }
  0xd5   : > { %s521_s3 = scalar_lea.vmem [#allocation8], %s5503_s9 }
  0xd6   : > { %4996 = dma.done.wait (%p6607_p1), %s509_s23, 128  }
  0xd7   : > { %4998 = vsyncadd (%p6607_p1), %s509_s23, 4294967168  ;;  %s527_s2 = scalar_lea.sflag [#allocation10], %s508_s12  ;;  %s5511_s11 = scalar_lea.vmem [#allocation9], %s5483_s30 }
  0xd8   : > { %5000 = dma.done.wait (%p5366_p10), %s527_s2, 1024  }
  0xd9   : > { %5002 = vsyncadd (%p5366_p10), %s527_s2, 4294966272  ;;  %p6608_p0 = scmp.eq.s32.totalorder %s5211_s27, 0 }
  0xdb   : > { %5004 = dma.done.wait (%p6608_p0), [#allocation10], 512   ;;  %p6609_p6 = pmov %p6608_p0 }
  0xdc   : > { %p6610_p5 = pmov %p6608_p0 }
  0xdd   : > { %5006 = vsyncadd (%p6609_p6), [#allocation10], 4294966784 }
  0xde   : > { %5008 = dma.done.wait (%p6610_p5), [#allocation13], 5120   ;;  %p6611_p2 = pmov %p6608_p0 }
  0xdf   : > { %v5080_v0 = vmov 0.0   ;;  %vm5081_vm0 = vmmov 0   ;;  %v4658_v1 = vld [vmem:[#allocation11 + $0x18] sm:$0xff]   ;;  %v4659_v2 = vld [vmem:[#allocation11 + $0x10] sm:$0xff]   ;;  %v4660_v3 = vld [vmem:[#allocation11 + $0x8] sm:$0xff]   ;;  %vm701_vm1 = vcmask 523264  }
  0xe0   : > { %5010 = vsyncadd (%p6611_p2), [#allocation13], 4294962176  ;;  %4216 = vmatprep.subr.bf16.mxu1 %v5080_v0  ;;  %4224 = vmatprep.mubr.msk.bf16.mxu1 %vm5081_vm0, %v5080_v0  ;;  %v4662_v4 = vld [vmem:[%s5487_s6] sm:$0xff]   ;;  %v4663_v6 = vld [vmem:[%s5487_s6 + $0x8] sm:$0xff]   ;;  %vm967_vm2 = vcmask 519171   ;;  %vm1000_vm6 = vcmask 516096  }
  0xe1   : > { %4192 = vmatprep.subr.bf16.mxu0 %v4658_v1  ;;  %4217 = vmatpush3.bf16.msra.mxu1 %v4658_v1  ;;  %v4661_v5 = vld [vmem:[#allocation11] sm:$0xff]   ;;  %v4665_v8 = vld [vmem:[%s5487_s6 + $0x10] sm:$0xff]   ;;  %v4672_v9 = vld [vmem:[#allocation12 + $0x78] sm:$0xff]   ;;  %vm968_vm3 = vsmask.f32 7950  ;;  %s6616_s27 = sld [smem:[#allocation29_spill]] }
  0xe2   : > { %4193 = vmatpush3.bf16.msra.mxu0 %v4658_v1  ;;  %4218 = vmatprep.subr.bf16.mxu1 %v5080_v0  ;;  %v4664_v7 = vld [vmem:[%s512_s29] sm:$0xff]   ;;  %v4666_v10 = vld [vmem:[%s5487_s6 + $0x18] sm:$0xff]   ;;  %v4669_v14 = vld [vmem:[%s5487_s6 + $0x30] sm:$0xff]   ;;  %vm1001_vm5 = vsmask.f32 256  ;;  %s6617_s1 = sld [smem:[#allocation72_spill]] }
  0xe3   : > { %4194 = vmatprep.subr.bf16.mxu0 %v4659_v2  ;;  %4200 = vmatprep.mubr.msk.bf16.mxu0 %vm701_vm1, %v4662_v4  ;;  %v4667_v11 = vld [vmem:[%s5487_s6 + $0x20] sm:$0xff]   ;;  %v4671_v12 = vld [vmem:[%s521_s3] sm:$0xff]   ;;  %v4668_v13 = vld [vmem:[%s5487_s6 + $0x28] sm:$0xff]   ;;  %vm1040_vm9 = vcmask 519168   ;;  %vm1156_vm10 = vsmask.f32 4368 }
  0xe4   : > { %v4670_v15 = vld [vmem:[%s5487_s6 + $0x38] sm:$0xff]   ;;  %vm5549_vm4 = vmand %vm967_vm2, %vm968_vm3  ;;  %v973_v17 = vld [vmem:[#allocation2 + $0x18] sm:$0x8]  ;;  %vm2391_vm13 = vsmask.f32 3328  ;;  %s6652_s18 = sld [smem:[#allocation74_spill]] }
  0xe5   : > { %4219 = vmatpush3.bf16.msra.mxu1 %v4659_v2  ;;  %v976_v18 = vld [vmem:[#allocation2 + $0x2c] sm:$0x8]  ;;  %v974_v19 = vsel %vm5549_vm4, 0, %v973_v17  ;;  %v4675_v21 = vld [vmem:[#allocation12 + $0x18] sm:$0xff]   ;;  %v4673_v23 = vld [vmem:[#allocation12 + $0x70] sm:$0xff]   ;;  %s6679_s24 = sld [smem:[#allocation76_spill]] }
  0xe6   : > { %4195 = vmatpush3.bf16.msra.mxu0 %v4659_v2  ;;  %4220 = vmatprep.subr.bf16.mxu1 %v5080_v0  ;;  %v977_v20 = vsel %vm5549_vm4, 0, %v976_v18  ;;  %975 = vst [vmem:[#allocation2 + $0x18] sm:$0x8] %v974_v19  ;;  %v970_v22 = vld [vmem:[#allocation2 + $0x4] sm:$0x8]  ;;  %v4676_v25 = vld [vmem:[#allocation12 + $0x10] sm:$0xff]   ;;  %vm5577_vm7 = vmand %vm1000_vm6, %vm1001_vm5 }
  0xe7   : > { %4196 = vmatprep.subr.bf16.mxu0 %v4660_v3  ;;  %978 = vst [vmem:[#allocation2 + $0x2c] sm:$0x8] %v977_v20  ;;  %v971_v24 = vsel %vm5549_vm4, 0, %v970_v22  ;;  %v4678_v26 = vld [vmem:[#allocation12 + $0x8] sm:$0xff]   ;;  %v4679_v28 = vld [vmem:[#allocation12] sm:$0xff]   ;;  %v5567_v38 = vld [vmem:[#allocation12 + $0xd8] sm:$0xff]  }
  0xe8   : > { %972 = vst [vmem:[#allocation2 + $0x4] sm:$0x8] %v971_v24  ;;  %v4674_v27 = vld [vmem:[#allocation12 + $0x68] sm:$0xff]   ;;  %v4677_v30 = vld [vmem:[#allocation12 + $0x60] sm:$0xff]   ;;  %v979_v32 = vld [vmem:[#allocation2 + $0x40] sm:$0x8] }
  0xe9   : > { %4221 = vmatpush3.bf16.msra.mxu1 %v4660_v3  ;;  %v982_v29 = vld [vmem:[#allocation2 + $0x54] sm:$0x8]  ;;  %v980_v33 = vsel %vm5549_vm4, 0, %v979_v32  ;;  %v988_v34 = vld [vmem:[#allocation2 + $0x7c] sm:$0x8]  ;;  %v5574_v43 = vld [vmem:[#allocation12 + $0x38] sm:$0xff]  }
  0xea   : > { %4197 = vmatpush3.bf16.msra.mxu0 %v4660_v3  ;;  %4222 = vmatprep.subr.bf16.mxu1 %v5080_v0  ;;  %v983_v31 = vsel %vm5549_vm4, 0, %v982_v29  ;;  %981 = vst [vmem:[#allocation2 + $0x40] sm:$0x8] %v980_v33  ;;  %v989_v35 = vsel %vm5549_vm4, 0, %v988_v34  ;;  %v985_v36 = vld [vmem:[#allocation2 + $0x68] sm:$0x8]  ;;  %vm5682_vm11 = vmor %vm1001_vm5, %vm1156_vm10 }
  0xeb   : > { %4198 = vmatprep.subr.bf16.mxu0 %v4661_v5  ;;  %984 = vst [vmem:[#allocation2 + $0x54] sm:$0x8] %v983_v31  ;;  %990 = vst [vmem:[#allocation2 + $0x7c] sm:$0x8] %v989_v35  ;;  %v986_v37 = vsel %vm5549_vm4, 0, %v985_v36  ;;  %p847_p10 = scmp.gt.s32.totalorder %s6616_s27, 0 }
  0xec   : > { %987 = vst [vmem:[#allocation2 + $0x68] sm:$0x8] %v986_v37  ;;  %v994_v39 = vld [vmem:[#allocation2 + $0xa4] sm:$0x8]  ;;  %v991_v41 = vld [vmem:[#allocation2 + $0x90] sm:$0x8] }
  0xed   : > { %4223 = vmatpush3.bf16.msra.mxu1 %v4661_v5  ;;  %v995_v40 = vsel %vm5549_vm4, 0, %v994_v39  ;;  %v992_v42 = vsel %vm5549_vm4, 0, %v991_v41  ;;  %v1006_v45 = vld [vmem:[#allocation2 + $0x24] sm:$0x1]  ;;  %v1009_v47 = vld [vmem:[#allocation2 + $0x38] sm:$0x1] }
  0xee   : > { %4199 = vmatpush3.bf16.msra.mxu0 %v4661_v5  ;;  %4228 = vmatprep.subr.bf16.mxu1 %v5080_v0  ;;  %996 = vst [vmem:[#allocation2 + $0xa4] sm:$0x8] %v995_v40  ;;  %993 = vst [vmem:[#allocation2 + $0x90] sm:$0x8] %v992_v42  ;;  %v1007_v46 = vsel %vm5577_vm7, 0, %v1006_v45  ;;  %v1010_v48 = vsel %vm5577_vm7, 0, %v1009_v47 }
  0xef   : > { %4240 = vmatprep.subr.bf16.mxu0 %v4672_v9  ;;  %1008 = vst [vmem:[#allocation2 + $0x24] sm:$0x1] %v1007_v46  ;;  %1011 = vst [vmem:[#allocation2 + $0x38] sm:$0x1] %v1010_v48  ;;  %v1015_v49 = vld [vmem:[#allocation2 + $0x60] sm:$0x1] }
  0xf0   : > { %4225 = vmatmul.mubr.msk.bf16.vlgmr.msra.gmra.mxu1 %vm701_vm1, %v4664_v7  ;;  %v1016_v50 = vsel %vm5577_vm7, 0, %v1015_v49  ;;  %v1012_v51 = vld [vmem:[#allocation2 + $0x4c] sm:$0x1]  ;;  %v1003_v53 = vld [vmem:[#allocation2 + $0x10] sm:$0x1]  ;;  %p907_p12 = scmp.lt.s32.totalorder %s6616_s27, 1 }
  0xf1   : > { %4201 = vmatmul.mubr.msk.bf16.vlgmr.msra.gmra.mxu0 %vm701_vm1, %v4663_v6  ;;  %4229 = vmatpush3.bf16.msra.mxu1 %v4658_v1  ;;  %1017 = vst [vmem:[#allocation2 + $0x60] sm:$0x1] %v1016_v50  ;;  %v1013_v52 = vsel %vm5577_vm7, 0, %v1012_v51  ;;  %v1004_v54 = vsel %vm5577_vm7, 0, %v1003_v53  ;;  %v1021_v55 = vld [vmem:[#allocation2 + $0x88] sm:$0x1] }
  0xf2   : > { %4204 = vmatprep.mubr.msk.bf16.mxu0 %vm701_vm1, %v4665_v8  ;;  %4230 = vmatprep.subr.bf16.mxu1 %v5080_v0  ;;  %1014 = vst [vmem:[#allocation2 + $0x4c] sm:$0x1] %v1013_v52  ;;  %1005 = vst [vmem:[#allocation2 + $0x10] sm:$0x1] %v1004_v54  ;;  %v1022_v56 = vsel %vm5577_vm7, 0, %v1021_v55  ;;  %s6361_s12 = scalar_lea.vmem [#allocation15], %s5483_s30 }
  0xf3   : > { %4236 = vmatprep.mubr.msk.bf16.mxu1 %vm5081_vm0, %v5080_v0  ;;  %4241 = vmatpush3.bf16.msra.mxu0 %v4672_v9  ;;  %v1018_v57 = vld [vmem:[#allocation2 + $0x74] sm:$0x1]  ;;  %1023 = vst [vmem:[#allocation2 + $0x88] sm:$0x1] %v1022_v56  ;;  %v1027_v59 = vld [vmem:[#allocation2 + $0xb0] sm:$0x1] }
  0xf4   : > { %4242 = vmatprep.subr.bf16.mxu0 %v4673_v23  ;;  %v1019_v58 = vsel %vm5577_vm7, 0, %v1018_v57  ;;  %v1028_v60 = vsel %vm5577_vm7, 0, %v1027_v59  ;;  %v1024_v61 = vld [vmem:[#allocation2 + $0x9c] sm:$0x1]  ;;  %v997_v62 = vld [vmem:[#allocation2 + $0xb8] sm:$0x8] }
  0xf5   : > { %4231 = vmatpush3.bf16.msra.mxu1 %v4659_v2  ;;  %1020 = vst [vmem:[#allocation2 + $0x74] sm:$0x1] %v1019_v58  ;;  %1029 = vst [vmem:[#allocation2 + $0xb0] sm:$0x1] %v1028_v60  ;;  %v1025_v63 = vsel %vm5577_vm7, 0, %v1024_v61  ;;  %s6680_s30 = sld [smem:[#allocation30_spill]] }
  0xf6   : > { %4232 = vmatprep.subr.bf16.mxu1 %v5080_v0  ;;  %1026 = vst [vmem:[#allocation2 + $0x9c] sm:$0x1] %v1025_v63  ;;  %v1030_v1 = vld [vmem:[#allocation2 + $0xc4] sm:$0x1]  ;;  %s901_s25 = scalar_select %p847_p10, 1, 0 }
  0xf7   : > { %4243 = vmatpush3.bf16.msra.mxu0 %v4673_v23  ;;  %v1031_v2 = vsel %vm5577_vm7, 0, %v1030_v1  ;;  %v1129_v23 = vld [vmem:[#allocation2 + $0x18] sm:$0x8]  ;;  %v1138_v29 = vld [vmem:[#allocation2 + $0x54] sm:$0x8]  ;;  %s4010_s28 = sshll.u32 %s6616_s27, 4 }
  0xf8   : > { %4244 = vmatprep.subr.bf16.mxu0 %v4674_v27  ;;  %1032 = vst [vmem:[#allocation2 + $0xc4] sm:$0x1] %v1031_v2  ;;  %v902_v4 = vstv %s901_s25  ;;  %v1135_v33 = vld [vmem:[#allocation2 + $0x40] sm:$0x8]  ;;  %v1144_v34 = vld [vmem:[#allocation2 + $0x7c] sm:$0x8] }
  0xf9   : > { %4205 = vmatmul.mubr.msk.bf16.gmra.mxu0 %vm701_vm1, %v4666_v10  ;;  %4233 = vmatpush3.bf16.msra.mxu1 %v4660_v3  ;;  %v5608_v3 = vld [vmem:[%s6617_s1] ss:$0 sm:$0xff]  ;;  %vm5612_vm8 = vcmp.eq.s32.totalorder %v902_v4, 1  ;;  %v1181_v37 = vshrl.u32 %v1129_v23, 16  ;;  %v1141_v45 = vld [vmem:[#allocation2 + $0x68] sm:$0x8] }
  0xfa   : > { %4208 = vmatprep.mubr.msk.bf16.mxu0 %vm701_vm1, %v4667_v11  ;;  %4234 = vmatprep.subr.bf16.mxu1 %v5080_v0  ;;  %v998_v0 = vsel %vm5549_vm4, 0, %v997_v62  ;;  %v1225_v48 = vshrl.u32 %v1135_v33, 16  ;;  %v1247_v49 = vshrl.u32 %v1138_v29, 16  ;;  %v1291_v50 = vshrl.u32 %v1144_v34, 16  ;;  %s5636_s15 = scalar_select %p907_p12, 1, 0 }
  0xfb   : > { %4245 = vmatpush3.bf16.msra.mxu0 %v4674_v27  ;;  %999 = vst [vmem:[#allocation2 + $0xb8] sm:$0x8] %v998_v0  ;;  %v5632_v55 = vrot.slane %v1181_v37, 11  ;;  %v1269_v56 = vshrl.u32 %v1141_v45, 16  ;;  %v5642_v61 = vld [vmem:[#allocation2 + $0x90] sm:$0x8] }
  0xfc   : > { %4246 = vmatprep.subr.bf16.mxu0 %v4677_v30  ;;  %v5648_v1 = vrot.slane %v1225_v48, 11  ;;  %v5650_v2 = vrot.slane %v1247_v49, 11  ;;  %v5652_v4 = vrot.slane %v1291_v50, 11  ;;  %vm2392_vm14 = vsmask.f32 7440  ;;  %s3962_s16 = sshll.u32 %s6680_s30, 5 }
  0xfd   : > { %4235 = vmatpush3.bf16.msra.mxu1 %v4661_v5  ;;  %vm5983_vm15 = vmor %vm2391_vm13, %vm2392_vm14  ;;  %s3497_s23 = sadd.s32 %s4010_s28, %s3962_s16  ;;  %s3500_s29 = sshll.u32 %s6361_s12, 4  ;;  %s6410_s29 = int_to_ptr.vmem [resolvable:$true] %s3500_s29 }
  0xfe   : > { %4264 = vmatprep.subr.bf16.mxu1 %v4675_v21  ;;  %s3963_s5 = sshll.u32 %s3497_s23, 6  ;;  %s6681_s3 = sld [smem:[#allocation77_spill]] }
  0xff   : > { %4247 = vmatpush3.bf16.msra.mxu0 %v4677_v30  ;;  %s4905_s27 = scalar_lea.vmem %s6410_s29, 1024  ;;  %p6682_p3 = scmp.ne.s32.totalorder %s6579_s7, 0 }
 0x100   : > { %4237 = vmatmul.mubr.msk.bf16.vlgmr.msra.gmra.mxu1 %vm701_vm1, %v4671_v12  ;;  %4288 = vmatprep.subr.bf16.mxu0 %v5567_v38  ;;  %p4906_p7 = scmp.ne.s32.totalorder %s6410_s29, %s4905_s27  ;;  %s5082_s25 = smov [#allocation15]  }
 0x101   : > { %4209 = vmatmul.mubr.msk.bf16.gmra.mxu0 %vm701_vm1, %v4668_v13  ;;  %4265 = vmatpush3.bf16.msra.mxu1 %v4675_v21  ;;  %s4909_s10 = sshll.u32 %s5082_s25, 4  ;;  %s4910_s10 = int_to_ptr.vmem [resolvable:$false] %s4909_s10 }
 0x102   : > { %4212 = vmatprep.mubr.msk.bf16.mxu0 %vm701_vm1, %v4669_v14  ;;  %4266 = vmatprep.subr.bf16.mxu1 %v4676_v25  ;;  %p4907_p11 = pnand %p4906_p7, %p6682_p3  ;;  %s4911_s21 = scalar_lea.vmem %s4910_s10, 2048 }
 0x103   : > { %p4912_p9 = scmp.lt.s32.totalorder %s6410_s29, %s4910_s10  ;;  %p4913_p13 = scmp.lt.s32.totalorder %s4911_s21, %s4905_s27 }
 0x104   : > { %s6417_s2 = scalar_lea.hbm %s6681_s3, %s3963_s5  ;;  %p4908_p8 = pneg %p4907_p11 }
 0x105   : > { %4267 = vmatpush3.bf16.msra.mxu1 %v4676_v25  ;;  %v1132_v25 = vld [vmem:[#allocation2 + $0x2c] sm:$0x8]  ;;  %p4914_p4 = por %p4913_p13, %p4912_p9 }
 0x106   : > { %4268 = vmatprep.subr.bf16.mxu1 %v4678_v26  ;;  %v1203_v39 = vshrl.u32 %v1132_v25, 16 }
 0x107   : > { %p4915_p1 = pnand %p4914_p4, %p4908_p8 }
 0x108   : > { %v5640_v60 = vrot.slane %v1203_v39, 11 }
 0x109   : > { %4213 = vmatmul.mubr.msk.bf16.gmra.mxu0 %vm701_vm1, %v4670_v15  ;;  %4269 = vmatpush3.bf16.msra.mxu1 %v4678_v26 }
 0x10a   : > { %4270 = vmatprep.subr.bf16.mxu1 %v4679_v28 }
 0x10d   : > { %4271 = vmatpush3.bf16.msra.mxu1 %v4679_v28  ;;  %v1126_v28 = vld [vmem:[#allocation2 + $0x4] sm:$0x8] }
 0x10e   : > { %4312 = vmatprep.subr.bf16.mxu1 %v5574_v43  ;;  %v1159_v47 = vshrl.u32 %v1126_v28, 16 }
 0x110   : > { %v5646_v0 = vrot.slane %v1159_v47, 11 }
 0x1b0   : > { %v892_v5 = vpop.f32.mrf.mxu1 }
 0x1b1   : > { %v4202_v6 = vpop.f32.mrf.mxu0  ;;  %v893_v7 = vadd.f32 %v5608_v3, %v892_v5 }
 0x1b2   : > { %v769_v8 = vadd.f32 %v4202_v6, %v5608_v3  ;;  %v4226_v10 = vpop.f32.mrf.mxu1 }
 0x1b3   : > { %v899_v11 = vmax.f32 %v893_v7, 0.0  ;;  %v760_v12 = vpop.f32.mrf.mxu0 }
 0x1b4   : > { %v825_v13 = vmax.f32 %v769_v8, 0.0  ;;  %v761_v14 = vadd.f32 %v5608_v3, %v760_v12  ;;  %v895_v15 = vpop.f32.mrf.mxu1 }
 0x1b5   : > { %v904_v16 = vsel %vm5612_vm8, %v899_v11, 0.0  ;;  %v4203_v17 = vpop.f32.mrf.mxu0  ;;  %v896_v18 = vadd.f32 %v5608_v3, %v895_v15  ;;  %v962_v15 = vstv %s5636_s15 }
 0x1b6   : > { %v3978_v19 = vpack.c.bf16 %v825_v13, %v825_v13  ;;  %v3974_v20 = vpack.c.bf16 %v904_v16, %v904_v16  ;;  %v823_v21 = vmax.f32 %v761_v14, 0.0  ;;  %v772_v22 = vadd.f32 %v4203_v17, %v5608_v3  ;;  %v4227_v24 = vpop.f32.mrf.mxu1 }
 0x1b7   : > { %v900_v26 = vmax.f32 %v896_v18, 0.0  ;;  %v763_v27 = vpop.f32.mrf.mxu0  ;;  %v5664_v14 = vrot.slane %v1269_v56, 11  ;;  %v1313_v16 = vshrl.u32 %v5642_v61, 16  ;;  %vm5776_vm12 = vcmp.eq.s32.totalorder %v962_v15, 1 }
 0x1b8   : > { %1102 = vst.msk [vmem:[#allocation2 + $0x30] sm:$0xf] %vm1040_vm9, %v3978_v19  ;;  %1041 = vst.msk [vmem:[#allocation2 + $0x8] sm:$0xf] %vm1040_vm9, %v3974_v20  ;;  %v3976_v30 = vpack.c.bf16 %v823_v21, %v823_v21  ;;  %v826_v31 = vmax.f32 %v772_v22, 0.0  ;;  %v764_v32 = vadd.f32 %v5608_v3, %v763_v27 }
 0x1b9   : > { %v905_v35 = vsel %vm5612_vm8, %v900_v26, 0.0  ;;  %v4206_v36 = vpop.f32.mrf.mxu0 }
 0x1ba   : > { %1100 = vst.msk [vmem:[#allocation2 + $0x1c] sm:$0xf] %vm1040_vm9, %v3976_v30  ;;  %v3979_v40 = vpack.c.bf16 %v826_v31, %v826_v31  ;;  %v3975_v41 = vpack.c.bf16 %v905_v35, %v905_v35  ;;  %v824_v42 = vmax.f32 %v764_v32, 0.0  ;;  %v785_v44 = vadd.f32 %v4206_v36, %v5608_v3 }
 0x1bb   : > { %v776_v46 = vpop.f32.mrf.mxu0 }
 0x1bc   : > { %1103 = vst.msk [vmem:[#allocation2 + $0x34] sm:$0xf] %vm1040_vm9, %v3979_v40  ;;  %1042 = vst.msk [vmem:[#allocation2 + $0xc] sm:$0xf] %vm1040_vm9, %v3975_v41  ;;  %v3977_v51 = vpack.c.bf16 %v824_v42, %v824_v42  ;;  %v829_v52 = vmax.f32 %v785_v44, 0.0  ;;  %v777_v53 = vadd.f32 %v5608_v3, %v776_v46 }
 0x1bd   : > { %v4207_v54 = vpop.f32.mrf.mxu0 }
 0x1be   : > { %1101 = vst.msk [vmem:[#allocation2 + $0x20] sm:$0xf] %vm1040_vm9, %v3977_v51  ;;  %v3982_v57 = vpack.c.bf16 %v829_v52, %v829_v52  ;;  %v827_v58 = vmax.f32 %v777_v53, 0.0  ;;  %v788_v59 = vadd.f32 %v4207_v54, %v5608_v3 }
 0x1bf   : > { %v779_v62 = vpop.f32.mrf.mxu0  ;;  %v5644_v63 = vld [vmem:[#allocation2 + $0x8] sm:$0xf]  ;;  %v5657_v9 = vld [vmem:[#allocation2 + $0x30] sm:$0xf] }
 0x1c0   : > { %1106 = vst.msk [vmem:[#allocation2 + $0x58] sm:$0xf] %vm1040_vm9, %v3982_v57  ;;  %v3980_v5 = vpack.c.bf16 %v827_v58, %v827_v58  ;;  %v830_v6 = vmax.f32 %v788_v59, 0.0  ;;  %v780_v7 = vadd.f32 %v5608_v3, %v779_v62  ;;  %v1164_v8 = vshrl.u32 %v5644_v63, 16  ;;  %v5659_v10 = vpop.f32.mrf.mxu1 }
 0x1c1   : > { %v4210_v11 = vpop.f32.mrf.mxu0  ;;  %v1167_v12 = vshll.u32 %v5644_v63, 16  ;;  %v5662_v13 = vld [vmem:[#allocation2 + $0x1c] sm:$0xf]  ;;  %v1208_v26 = vshrl.u32 %v5657_v9, 16  ;;  %v1211_v27 = vshll.u32 %v5657_v9, 16 }
 0x1c2   : > { %1104 = vst.msk [vmem:[#allocation2 + $0x44] sm:$0xf] %vm1040_vm9, %v3980_v5  ;;  %v3983_v17 = vpack.c.bf16 %v830_v6, %v830_v6  ;;  %v828_v18 = vmax.f32 %v780_v7, 0.0  ;;  %v801_v19 = vadd.f32 %v4210_v11, %v5608_v3  ;;  %v1166_v20 = vrot.slane %v1164_v8, 7  ;;  %v4238_v21 = vpop.f32.mrf.mxu1  ;;  %v2364_v34 = vld [vmem:[#allocation2 + $0x1c] sm:$0xf] }
 0x1c3   : > { %v792_v22 = vpop.f32.mrf.mxu0  ;;  %v5670_v23 = vld [vmem:[#allocation2 + $0xc] sm:$0xf]  ;;  %v1186_v24 = vshrl.u32 %v5662_v13, 16  ;;  %v1189_v25 = vshll.u32 %v5662_v13, 16  ;;  %v5696_v52 = vld [vmem:[#allocation2 + $0x34] sm:$0xf] }
 0x1c4   : > { %1107 = vst.msk [vmem:[#allocation2 + $0x5c] sm:$0xf] %vm1040_vm9, %v3983_v17  ;;  %v3981_v28 = vpack.c.bf16 %v828_v18, %v828_v18  ;;  %v833_v29 = vmax.f32 %v801_v19, 0.0  ;;  %v793_v30 = vadd.f32 %v5608_v3, %v792_v22  ;;  %v1169_v31 = vor.u32 %v1167_v12, %v1166_v20  ;;  %v5678_v32 = vpop.f32.mrf.mxu1 }
 0x1c5   : > { %v4211_v33 = vpop.f32.mrf.mxu0  ;;  %v1171_v35 = vrot.slane %v1166_v20, 4  ;;  %v1173_v36 = vshrl.u32 %v5670_v23, 16  ;;  %v1176_v37 = vshll.u32 %v5670_v23, 16  ;;  %v5688_v39 = vld [vmem:[#allocation2 + $0x20] sm:$0xf]  ;;  %v1188_v40 = vrot.slane %v1186_v24, 7 }
 0x1c6   : > { %1105 = vst.msk [vmem:[#allocation2 + $0x48] sm:$0xf] %vm1040_vm9, %v3981_v28  ;;  %v3986_v41 = vpack.c.bf16 %v833_v29, %v833_v29  ;;  %v831_v42 = vmax.f32 %v793_v30, 0.0  ;;  %v804_v44 = vadd.f32 %v4211_v33, %v5608_v3  ;;  %v1170_v45 = vsel %vm5682_vm11, %v5646_v0, %v1169_v31  ;;  %v4239_v46 = vpop.f32.mrf.mxu1 }
 0x1c7   : > { %v795_v47 = vpop.f32.mrf.mxu0  ;;  %v1175_v48 = vrot.slane %v1173_v36, 7  ;;  %v1191_v49 = vor.u32 %v1189_v25, %v1188_v40  ;;  %v1193_v50 = vrot.slane %v1188_v40, 4  ;;  %v1195_v51 = vshrl.u32 %v5688_v39, 16  ;;  %v5724_v40 = vld [vmem:[#allocation2 + $0x58] sm:$0xf] }
 0x1c8   : > { %1110 = vst.msk [vmem:[#allocation2 + $0x80] sm:$0xf] %vm1040_vm9, %v3986_v41  ;;  %v3984_v53 = vpack.c.bf16 %v831_v42, %v831_v42  ;;  %v834_v54 = vmax.f32 %v804_v44, 0.0  ;;  %v796_v56 = vadd.f32 %v5608_v3, %v795_v47  ;;  %v1198_v57 = vshll.u32 %v5688_v39, 16  ;;  %v4684_v41 = vld [vmem:[#allocation12 + $0x30] sm:$0xff]  }
 0x1c9   : > { %v4214_v58 = vpop.f32.mrf.mxu0  ;;  %v1178_v59 = vor.u32 %v1176_v37, %v1175_v48  ;;  %v1192_v62 = vsel %vm5682_vm11, %v5632_v55, %v1191_v49  ;;  %v1197_v0 = vrot.slane %v1195_v51, 7  ;;  %v1210_v5 = vrot.slane %v1208_v26, 7  ;;  %v5711_v25 = vld [vmem:[#allocation2 + $0x44] sm:$0xf] }
 0x1ca   : > { %1108 = vst.msk [vmem:[#allocation2 + $0x6c] sm:$0xf] %vm1040_vm9, %v3984_v53  ;;  %v3987_v6 = vpack.c.bf16 %v834_v54, %v834_v54  ;;  %v832_v7 = vmax.f32 %v796_v56, 0.0  ;;  %v817_v8 = vadd.f32 %v4214_v58, %v5608_v3  ;;  %v1217_v11 = vshrl.u32 %v5696_v52, 16 }
 0x1cb   : > { %v808_v12 = vpop.f32.mrf.mxu0  ;;  %v1179_v17 = vsel %vm5682_vm11, %v1171_v35, %v1178_v59  ;;  %v1200_v18 = vor.u32 %v1198_v57, %v1197_v0  ;;  %v1213_v19 = vor.u32 %v1211_v27, %v1210_v5  ;;  %v1215_v20 = vrot.slane %v1210_v5, 4  ;;  %v5734_v51 = vld [vmem:[#allocation2 + $0x5c] sm:$0xf] }
 0x1cc   : > { %1111 = vst.msk [vmem:[#allocation2 + $0x84] sm:$0xf] %vm1040_vm9, %v3987_v6  ;;  %v3985_v55 = vpack.c.bf16 %v832_v7, %v832_v7  ;;  %v837_v21 = vmax.f32 %v817_v8, 0.0  ;;  %v809_v22 = vadd.f32 %v5608_v3, %v808_v12  ;;  %v3810_v24 = vcombine.low %v1170_v45, %v1179_v17  ;;  %v4681_v5 = vld [vmem:[#allocation12 + $0xd0] sm:$0xff]   ;;  %v4686_v7 = vld [vmem:[#allocation12 + $0x28] sm:$0xff]  }
 0x1cd   : > { %v4215_v26 = vpop.f32.mrf.mxu0  ;;  %v1201_v28 = vsel %vm5682_vm11, %v1193_v50, %v1200_v18  ;;  %v1214_v29 = vsel %vm5682_vm11, %v5640_v60, %v1213_v19  ;;  %v1219_v30 = vrot.slane %v1217_v11, 7  ;;  %v1220_v27 = vshll.u32 %v5696_v52, 16  ;;  %v5719_v31 = vld [vmem:[#allocation2 + $0x48] sm:$0xf] }
 0x1ce   : > { %1109 = vst.msk [vmem:[#allocation2 + $0x70] sm:$0xf] %vm1040_vm9, %v3985_v55  ;;  %v3990_v33 = vpack.c.bf16 %v837_v21, %v837_v21  ;;  %v835_v35 = vmax.f32 %v809_v22, 0.0  ;;  %v820_v36 = vadd.f32 %v4215_v26, %v5608_v3  ;;  %4272 = vmatprep.mubr.msk.bf16.mxu1 %vm701_vm1, %v3810_v24  ;;  %v3790_v37 = vcombine.low %v1192_v62, %v1201_v28 }
 0x1cf   : > { %v811_v42 = vpop.f32.mrf.mxu0  ;;  %v1222_v44 = vor.u32 %v1220_v27, %v1219_v30  ;;  %v1230_v60 = vshrl.u32 %v5711_v25, 16  ;;  %v1233_v45 = vshll.u32 %v5711_v25, 16  ;;  %v1239_v46 = vshrl.u32 %v5719_v31, 16 }
 0x1d0   : > { %1114 = vst.msk [vmem:[#allocation2 + $0xa8] sm:$0xf] %vm1040_vm9, %v3990_v33  ;;  %v3988_v47 = vpack.c.bf16 %v835_v35, %v835_v35  ;;  %v838_v48 = vmax.f32 %v820_v36, 0.0  ;;  %v812_v49 = vadd.f32 %v5608_v3, %v811_v42  ;;  %4248 = vmatprep.mubr.msk.bf16.mxu0 %vm701_vm1, %v3790_v37  ;;  %4273 = vmatmul.mubr.msk.bf16.vlgmr.msra.gmra.mxu1 %vm701_vm1, %v3790_v37  ;;  %v1242_v50 = vshll.u32 %v5719_v31, 16  ;;  %v4687_v33 = vld [vmem:[#allocation12 + $0x20] sm:$0xff]  }
 0x1d1   : > { %v1223_v53 = vsel %vm5682_vm11, %v1215_v20, %v1222_v44  ;;  %v1232_v54 = vrot.slane %v1230_v60, 7  ;;  %v1241_v56 = vrot.slane %v1239_v46, 7  ;;  %v1252_v57 = vshrl.u32 %v5724_v40, 16  ;;  %v5739_v58 = vld [vmem:[#allocation2 + $0x6c] sm:$0xf]  ;;  %4313 = vmatpush3.bf16.msra.mxu1 %v5574_v43 }
 0x1d2   : > { %1112 = vst.msk [vmem:[#allocation2 + $0x94] sm:$0xf] %vm1040_vm9, %v3988_v47  ;;  %v3991_v59 = vpack.c.bf16 %v838_v48, %v838_v48  ;;  %v836_v62 = vmax.f32 %v812_v49, 0.0  ;;  %v5743_v0 = vcombine.low %v1214_v29, %v1223_v53  ;;  %v1255_v6 = vshll.u32 %v5724_v40, 16  ;;  %4314 = vmatprep.subr.bf16.mxu1 %v4684_v41  ;;  %v5753_v20 = vld [vmem:[#allocation2 + $0x80] sm:$0xf] }
 0x1d3   : > { %v1235_v8 = vor.u32 %v1233_v45, %v1232_v54  ;;  %v1237_v11 = vrot.slane %v1232_v54, 4  ;;  %v1244_v12 = vor.u32 %v1242_v50, %v1241_v56  ;;  %v1254_v17 = vrot.slane %v1252_v57, 7  ;;  %v4682_v29 = vld [vmem:[#allocation12 + $0xc8] sm:$0xff]   ;;  %v5770_v27 = vld [vmem:[#allocation2 + $0x84] sm:$0xf] }
 0x1d4   : > { %1115 = vst.msk [vmem:[#allocation2 + $0xac] sm:$0xf] %vm1040_vm9, %v3991_v59  ;;  %v3989_v18 = vpack.c.bf16 %v836_v62, %v836_v62  ;;  %4249 = vmatmul.mubr.msk.bf16.vlgmr.msra.gmra.mxu0 %vm701_vm1, %v5743_v0  ;;  %4276 = vmatprep.mubr.msk.bf16.mxu1 %vm701_vm1, %v5743_v0  ;;  %v1261_v43 = vshrl.u32 %v5734_v51, 16  ;;  %v1274_v19 = vshrl.u32 %v5739_v58, 16  ;;  %v953_v55 = vadd.f32 %v5608_v3, %v5659_v10 }
 0x1d5   : > { %4289 = vmatpush3.bf16.msra.mxu0 %v5567_v38  ;;  %v1236_v21 = vsel %vm5682_vm11, %v5648_v1, %v1235_v8  ;;  %v1245_v22 = vsel %vm5682_vm11, %v1237_v11, %v1244_v12  ;;  %v1257_v24 = vor.u32 %v1255_v6, %v1254_v17  ;;  %v1264_v26 = vshll.u32 %v5734_v51, 16  ;;  %v5764_v28 = vld [vmem:[#allocation2 + $0x70] sm:$0xf]  ;;  %4315 = vmatpush3.bf16.msra.mxu1 %v4684_v41  ;;  %v5799_v6 = vld [vmem:[#allocation12 + $0xf8] sm:$0xff]  }
 0x1d6   : > { %1113 = vst.msk [vmem:[#allocation2 + $0x98] sm:$0xf] %vm1040_vm9, %v3989_v18  ;;  %v5767_v10 = vcombine.low %v1236_v21, %v1245_v22  ;;  %4290 = vmatprep.subr.bf16.mxu0 %v4681_v5  ;;  %v1263_v38 = vrot.slane %v1261_v43, 7  ;;  %v1276_v30 = vrot.slane %v1274_v19, 7  ;;  %v1277_v1 = vshll.u32 %v5739_v58, 16  ;;  %4316 = vmatprep.subr.bf16.mxu1 %v4686_v7 }
 0x1d7   : > { %v1259_v35 = vrot.slane %v1254_v17, 4  ;;  %v1283_v36 = vshrl.u32 %v5764_v28, 16  ;;  %v1296_v37 = vshrl.u32 %v5753_v20, 16  ;;  %v1258_v42 = vsel %vm5682_vm11, %v5650_v2, %v1257_v24  ;;  %v5804_v17 = vld [vmem:[#allocation2 + $0xa8] sm:$0xf] }
 0x1d8   : > { %4252 = vmatprep.mubr.msk.bf16.mxu0 %vm701_vm1, %v5767_v10  ;;  %4277 = vmatmul.mubr.msk.bf16.gmra.mxu1 %vm701_vm1, %v5767_v10  ;;  %v1266_v44 = vor.u32 %v1264_v26, %v1263_v38  ;;  %v1279_v60 = vor.u32 %v1277_v1, %v1276_v30  ;;  %v1286_v45 = vshll.u32 %v5764_v28, 16  ;;  %v1299_v47 = vshll.u32 %v5753_v20, 16  ;;  %v1150_v1 = vld [vmem:[#allocation2 + $0xa4] sm:$0x8] }
 0x1d9   : > { %4291 = vmatpush3.bf16.msra.mxu0 %v4681_v5  ;;  %v1285_v46 = vrot.slane %v1283_v36, 7  ;;  %v1298_v15 = vrot.slane %v1296_v37, 7  ;;  %v1305_v48 = vshrl.u32 %v5770_v27, 16  ;;  %v5790_v49 = vld [vmem:[#allocation2 + $0x94] sm:$0xf]  ;;  %4317 = vmatpush3.bf16.msra.mxu1 %v4686_v7  ;;  %v1281_v53 = vrot.slane %v1276_v30, 4 }
 0x1da   : > { %v1267_v50 = vsel %vm5682_vm11, %v1259_v35, %v1266_v44  ;;  %4292 = vmatprep.subr.bf16.mxu0 %v4682_v29  ;;  %v959_v2 = vmax.f32 %v953_v55, 0.0  ;;  %v956_v54 = vadd.f32 %v5608_v3, %v5678_v32  ;;  %4318 = vmatprep.subr.bf16.mxu1 %v4687_v33  ;;  %v1308_v62 = vshll.u32 %v5770_v27, 16  ;;  %v4685_v5 = vld [vmem:[#allocation12 + $0xc0] sm:$0xff]   ;;  %v4688_v36 = vld [vmem:[#allocation12 + $0x98] sm:$0xff]  }
 0x1db   : > { %v5796_v56 = vcombine.low %v1258_v42, %v1267_v50  ;;  %v1288_v57 = vor.u32 %v1286_v45, %v1285_v46  ;;  %v1301_v59 = vor.u32 %v1299_v47, %v1298_v15  ;;  %v1307_v7 = vrot.slane %v1305_v48, 7  ;;  %v5821_v26 = vld [vmem:[#allocation2 + $0xac] sm:$0xf] }
 0x1dc   : > { %v964_v8 = vsel %vm5776_vm12, %v959_v2, 0.0  ;;  %v960_v11 = vmax.f32 %v956_v54, 0.0  ;;  %v1318_v12 = vshrl.u32 %v5790_v49, 16  ;;  %v1280_v3 = vsel %vm5682_vm11, %v5664_v14, %v1279_v60 }
 0x1dd   : > { %4253 = vmatmul.mubr.msk.bf16.gmra.mxu0 %vm701_vm1, %v5796_v56  ;;  %4280 = vmatprep.mubr.msk.bf16.mxu1 %vm701_vm1, %v5796_v56  ;;  %v1289_v32 = vsel %vm5682_vm11, %v1281_v53, %v1288_v57  ;;  %v1303_v18 = vrot.slane %v1298_v15, 4  ;;  %v3992_v43 = vpack.c.bf16 %v964_v8, %v964_v8  ;;  %v5815_v19 = vld [vmem:[#allocation2 + $0x98] sm:$0xf]  ;;  %v1310_v21 = vor.u32 %v1308_v62, %v1307_v7 }
 0x1de   : > { %v5817_v55 = vcombine.low %v1280_v3, %v1289_v32  ;;  %4293 = vmatpush3.bf16.msra.mxu0 %v4682_v29  ;;  %v965_v22 = vsel %vm5776_vm12, %v960_v11, 0.0  ;;  %v1320_v24 = vrot.slane %v1318_v12, 7  ;;  %4319 = vmatpush3.bf16.msra.mxu1 %v4687_v33  ;;  %v1321_v38 = vshll.u32 %v5790_v49, 16  ;;  %v4689_v3 = vld [vmem:[#allocation12 + $0x90] sm:$0xff]  }
 0x1df   : > { %1124 = vst.msk [vmem:[#allocation2 + $0xbc] sm:$0xf] %vm1040_vm9, %v3992_v43  ;;  %v3993_v14 = vpack.c.bf16 %v965_v22, %v965_v22  ;;  %v1327_v30 = vshrl.u32 %v5815_v19, 16  ;;  %4294 = vmatprep.subr.bf16.mxu0 %v4685_v5  ;;  %v1348_v35 = vshrl.u32 %v5804_v17, 16  ;;  %4360 = vmatprep.subr.bf16.mxu1 %v5799_v6  ;;  %v1302_v29 = vsel %vm5682_vm11, %v5652_v4, %v1301_v59 }
 0x1e0   : > { %4256 = vmatprep.mubr.msk.bf16.mxu0 %vm701_vm1, %v5817_v55  ;;  %4281 = vmatmul.mubr.msk.bf16.gmra.mxu1 %vm701_vm1, %v5817_v55  ;;  %v1311_v33 = vsel %vm5682_vm11, %v1303_v18, %v1310_v21  ;;  %v3788_v37 = vrot.slane %v1313_v16, 11  ;;  %v1330_v41 = vshll.u32 %v5815_v19, 16  ;;  %v1323_v44 = vor.u32 %v1321_v38, %v1320_v24  ;;  %v4697_v21 = vld [vmem:[#allocation12 + $0x58] sm:$0xff]  }
 0x1e1   : > { %v5840_v42 = vcombine.low %v1302_v29, %v1311_v33  ;;  %1125 = vst.msk [vmem:[#allocation2 + $0xc0] sm:$0xf] %vm1040_vm9, %v3993_v14  ;;  %v1329_v60 = vrot.slane %v1327_v30, 7  ;;  %v1357_v45 = vshrl.u32 %v5821_v26, 16  ;;  %v1343_v46 = vshrl.u32 %v1150_v1, 16 }
 0x1e2   : > { %v1350_v15 = vrot.slane %v1348_v35, 7  ;;  %4295 = vmatpush3.bf16.msra.mxu0 %v4685_v5  ;;  %v1325_v4 = vrot.slane %v1320_v24, 4  ;;  %v1360_v16 = vshll.u32 %v5821_v26, 16  ;;  %v1351_v48 = vshll.u32 %v5804_v17, 16 }
 0x1e3   : > { %4284 = vmatprep.mubr.msk.bf16.mxu1 %vm701_vm1, %v5840_v42  ;;  %v1332_v47 = vor.u32 %v1330_v41, %v1329_v60  ;;  %v1359_v61 = vrot.slane %v1357_v45, 7  ;;  %4336 = vmatprep.subr.bf16.mxu0 %v4688_v36  ;;  %v1324_v50 = vsel %vm5682_vm11, %v3788_v37, %v1323_v44  ;;  %v3789_v57 = vrot.slane %v1343_v46, 11  ;;  %v4698_v37 = vld [vmem:[#allocation12 + $0x50] sm:$0xff]   ;;  %v4705_v41 = vld [vmem:[#allocation12 + $0xa8] sm:$0xff]   ;;  %v2362_v46 = vld [vmem:[#allocation2 + $0xc] sm:$0xf] }
 0x1e4   : > { %v1353_v59 = vor.u32 %v1351_v48, %v1350_v15  ;;  %v1355_v62 = vrot.slane %v1350_v15, 4  ;;  %v3837_v5 = vcombine.low %v5644_v63, %v5670_v23  ;;  %v5872_v63 = vcombine.low %v5662_v13, %v5688_v39  ;;  %v4692_v23 = vld [vmem:[#allocation12 + $0xf0] sm:$0xff]   ;;  %v4696_v13 = vld [vmem:[#allocation12 + $0xe0] sm:$0xff]  }
 0x1e5   : > { %4257 = vmatmul.mubr.msk.bf16.gmra.mxu0 %vm701_vm1, %v5840_v42  ;;  %v1333_v53 = vsel %vm5682_vm11, %v1325_v4, %v1332_v47  ;;  %v1362_v2 = vor.u32 %v1360_v16, %v1359_v61  ;;  %v5876_v12 = vcombine.low %v5657_v9, %v5696_v52  ;;  %v5889_v9 = vcombine.low %v5711_v25, %v5719_v31  ;;  %v4690_v52 = vld [vmem:[#allocation12 + $0x88] sm:$0xff]   ;;  %v4694_v25 = vld [vmem:[#allocation12 + $0x80] sm:$0xff]   ;;  %v4700_v31 = vld [vmem:[#allocation12 + $0xb8] sm:$0xff]  }
 0x1e6   : > { %v5854_v54 = vcombine.low %v1324_v50, %v1333_v53  ;;  %v1354_v8 = vsel %vm5682_vm11, %v3789_v57, %v1353_v59  ;;  %v5893_v39 = vcombine.low %v5724_v40, %v5734_v51  ;;  %v1153_v40 = vld [vmem:[#allocation2 + $0xb8] sm:$0x8]  ;;  %v5911_v32 = vcombine.low %v5739_v58, %v5764_v28  ;;  %v2369_v47 = vld [vmem:[#allocation2 + $0x38] sm:$0x1]  ;;  %v4706_v48 = vld [vmem:[#allocation12 + $0xa0] sm:$0xff]  }
 0x1e7   : > { %v1363_v7 = vsel %vm5682_vm11, %v1355_v62, %v1362_v2  ;;  %v5915_v18 = vcombine.low %v5753_v20, %v5770_v27  ;;  %v1670_v43 = vshrl.u32 %v1153_v40, 16  ;;  %v5928_v38 = vcombine.low %v5790_v49, %v5815_v19  ;;  %v4702_v49 = vld [vmem:[#allocation12 + $0xb0] sm:$0xff]   ;;  %v2365_v19 = vld [vmem:[#allocation2 + $0x20] sm:$0xf]  ;;  %v4699_v50 = vld [vmem:[#allocation12 + $0x48] sm:$0xff]  }
 0x1e8   : > { %4260 = vmatprep.mubr.msk.bf16.mxu0 %vm701_vm1, %v5854_v54  ;;  %4285 = vmatmul.mubr.msk.bf16.gmra.mxu1 %vm701_vm1, %v5854_v54  ;;  %v3797_v11 = vcombine.low %v1354_v8, %v1363_v7  ;;  %v2428_v29 = vshll.u32 %v2365_v19, 16  ;;  %v2432_v33 = vshrl.u32 %v2365_v19, 16  ;;  %v2419_v44 = vshrl.u32 %v2364_v34, 16 }
 0x1e9   : > { %4320 = vmatprep.mubr.msk.bf16.mxu1 %vm701_vm1, %v3837_v5  ;;  %v3823_v58 = vrot.slane %v1670_v43, 11  ;;  %v2422_v60 = vshll.u32 %v2364_v34, 16  ;;  %v2404_v53 = vshll.u32 %v2362_v46, 16  ;;  %v2408_v2 = vshrl.u32 %v2362_v46, 16  ;;  %v2368_v5 = vld [vmem:[#allocation2 + $0x34] sm:$0xf] }
 0x1ea   : > { %v5947_v15 = vrot.slane %v2428_v29, 5  ;;  %v2434_v4 = vrot.slane %v2432_v33, 4  ;;  %v2421_v57 = vrot.slane %v2419_v44, 4  ;;  %v2462_v7 = vshll.u32 %v2369_v47, 16  ;;  %v5973_v34 = vld [vmem:[#allocation12 + $0x118] sm:$0xff]  }
 0x1eb   : > { %v2424_v59 = vrot.slane %v2422_v60, 5  ;;  %v2452_v40 = vshll.u32 %v2368_v5, 16  ;;  %v2377_v60 = vld [vmem:[#allocation2 + $0x70] sm:$0xf] }
 0x1ec   : > { %v2435_v8 = vor.u32 %v2434_v4, %v5947_v15  ;;  %v5960_v43 = vrot.slane %v2462_v7, 5 }
 0x1ed   : > { %4261 = vmatmul.mubr.msk.bf16.gmra.mxu0 %vm701_vm1, %v3797_v11 }
 0x1ee   : > { %4296 = vmatprep.mubr.msk.bf16.mxu0 %vm701_vm1, %v5743_v0  ;;  %v4695_v0 = vld [vmem:[#allocation12 + $0xe8] sm:$0xff]  }
 0x1f0   : > { %4321 = vmatmul.mubr.msk.bf16.vlgmr.msra.gmra.mxu1 %vm701_vm1, %v5872_v63 }
 0x1f1   : > { %4324 = vmatprep.mubr.msk.bf16.mxu1 %vm701_vm1, %v5876_v12  ;;  %4361 = vmatpush3.bf16.msra.mxu1 %v5799_v6 }
 0x1f2   : > { %4362 = vmatprep.subr.bf16.mxu1 %v4692_v23 }
 0x1f5   : > { %4297 = vmatmul.mubr.msk.bf16.vlgmr.msra.gmra.mxu0 %vm701_vm1, %v5767_v10  ;;  %4363 = vmatpush3.bf16.msra.mxu1 %v4692_v23  ;;  %v5899_v10 = vld [vmem:[#allocation2 + $0xbc] sm:$0xf]  ;;  %v2375_v23 = vld [vmem:[#allocation2 + $0x60] sm:$0x1] }
 0x1f6   : > { %4337 = vmatpush3.bf16.msra.mxu0 %v4688_v36  ;;  %4300 = vmatprep.mubr.msk.bf16.mxu0 %vm701_vm1, %v5796_v56  ;;  %v5901_v56 = vld [vmem:[#allocation2 + $0xc0] sm:$0xf]  ;;  %v1675_v51 = vshrl.u32 %v5899_v10, 16  ;;  %v1678_v22 = vshll.u32 %v5899_v10, 16  ;;  %v2366_v36 = vld [vmem:[#allocation2 + $0x24] sm:$0x1] }
 0x1f7   : > { %4338 = vmatprep.subr.bf16.mxu0 %v4689_v3  ;;  %4364 = vmatprep.subr.bf16.mxu1 %v4695_v0  ;;  %v1684_v6 = vshrl.u32 %v5901_v56, 16  ;;  %v1687_v14 = vshll.u32 %v5901_v56, 16  ;;  %v2438_v45 = vshll.u32 %v2366_v36, 16 }
 0x1f8   : > { %4325 = vmatmul.mubr.msk.bf16.gmra.mxu1 %vm701_vm1, %v5889_v9 }
 0x1f9   : > { %4328 = vmatprep.mubr.msk.bf16.mxu1 %vm701_vm1, %v5893_v39  ;;  %4365 = vmatpush3.bf16.msra.mxu1 %v4695_v0  ;;  %v1686_v24 = vrot.slane %v1684_v6, 7  ;;  %v5953_v62 = vrot.slane %v2438_v45, 5  ;;  %v2425_v6 = vor.u32 %v2424_v59, %v2421_v57  ;;  %v3870_v45 = vcombine.low %v5899_v10, %v5901_v56 }
 0x1fa   : > { %4339 = vmatpush3.bf16.msra.mxu0 %v4689_v3  ;;  %4366 = vmatprep.subr.bf16.mxu1 %v4696_v13  ;;  %v2528_v57 = vshrl.u32 %v2377_v60, 16 }
 0x1fb   : > { %4340 = vmatprep.subr.bf16.mxu0 %v4690_v52  ;;  %v1689_v27 = vor.u32 %v1687_v14, %v1686_v24  ;;  %v2372_v24 = vld [vmem:[#allocation2 + $0x4c] sm:$0x1] }
 0x1fc   : > { %v2486_v33 = vshll.u32 %v2372_v24, 16 }
 0x1fd   : > { %4301 = vmatmul.mubr.msk.bf16.gmra.mxu0 %vm701_vm1, %v5817_v55  ;;  %4367 = vmatpush3.bf16.msra.mxu1 %v4696_v13  ;;  %v1677_v55 = vrot.slane %v1675_v51, 7  ;;  %v2370_v13 = vld [vmem:[#allocation2 + $0x44] sm:$0xf]  ;;  %v2456_v51 = vshrl.u32 %v2368_v5, 16 }
 0x1fe   : > { %4304 = vmatprep.mubr.msk.bf16.mxu0 %vm701_vm1, %v5840_v42  ;;  %4341 = vmatpush3.bf16.msra.mxu0 %v4690_v52  ;;  %v2361_v42 = vld [vmem:[#allocation2 + $0x8] sm:$0xf]  ;;  %v2467_v14 = vshrl.u32 %v2370_v13, 16 }
 0x1ff   : > { %4342 = vmatprep.subr.bf16.mxu0 %v4694_v25  ;;  %4408 = vmatprep.subr.bf16.mxu1 %v4700_v31  ;;  %v1680_v20 = vor.u32 %v1678_v22, %v1677_v55  ;;  %v1682_v28 = vrot.slane %v1677_v55, 4  ;;  %v2395_v61 = vshrl.u32 %v2361_v42, 16  ;;  %v2398_v16 = vshll.u32 %v2361_v42, 16  ;;  %v4704_v52 = vld [vmem:[#allocation12 + $0x40] sm:$0xff]  }
 0x200   : > { %4329 = vmatmul.mubr.msk.bf16.gmra.mxu1 %vm701_vm1, %v5911_v32  ;;  %v2458_v19 = vrot.slane %v2456_v51, 4 }
 0x201   : > { %4332 = vmatprep.mubr.msk.bf16.mxu1 %vm701_vm1, %v5915_v18  ;;  %v1681_v30 = vsel %vm5682_vm11, %v3823_v58, %v1680_v20  ;;  %v1690_v1 = vsel %vm5682_vm11, %v1682_v28, %v1689_v27  ;;  %v2400_v3 = vrot.slane %v2398_v16, 5  ;;  %v2470_v58 = vshll.u32 %v2370_v13, 16 }
 0x202   : > { %4343 = vmatpush3.bf16.msra.mxu0 %v4694_v25  ;;  %v3824_v35 = vcombine.low %v1681_v30, %v1690_v1  ;;  %v5958_v25 = vrot.slane %v2404_v53, 5  ;;  %v2510_v20 = vshll.u32 %v2375_v23, 16  ;;  %v2436_v28 = vrot.slane %v2435_v8, 4 }
 0x203   : > { %4384 = vmatprep.subr.bf16.mxu0 %v4697_v21  ;;  %v2472_v42 = vrot.slane %v2470_v58, 5  ;;  %v2488_v13 = vrot.slane %v2486_v33, 5  ;;  %v2379_v58 = vld [vmem:[#allocation2 + $0x80] sm:$0xf] }
 0x204   : > { %v5987_v44 = vrot.slane %v2510_v20, 5  ;;  %v2441_v46 = vsel %vm5983_vm15, %v2436_v28, %v5953_v62  ;;  %v2539_v33 = vshrl.u32 %v2379_v58, 16 }
 0x205   : > { %4305 = vmatmul.mubr.msk.bf16.gmra.mxu0 %vm701_vm1, %v5854_v54  ;;  %v2367_v54 = vld [vmem:[#allocation2 + $0x30] sm:$0xf] }
 0x206   : > { %4308 = vmatprep.mubr.msk.bf16.mxu0 %vm701_vm1, %v3797_v11  ;;  %v2363_v11 = vld [vmem:[#allocation2 + $0x10] sm:$0x1]  ;;  %v2443_v0 = vshrl.u32 %v2367_v54, 16 }
 0x207   : > { %v2414_v22 = vshll.u32 %v2363_v11, 16  ;;  %v2378_v11 = vld [vmem:[#allocation2 + $0x74] sm:$0x1] }
 0x208   : > { %4333 = vmatmul.mubr.msk.bf16.gmra.mxu1 %vm701_vm1, %v5928_v38  ;;  %v2445_v30 = vrot.slane %v2443_v0, 4 }
 0x209   : > { %4368 = vmatprep.mubr.msk.bf16.mxu1 %vm701_vm1, %v5876_v12 }
 0x20d   : > { %4309 = vmatmul.mubr.msk.bf16.gmra.mxu0 %vm701_vm1, %v3824_v35  ;;  %v5968_v35 = vcombine.low %v5804_v17, %v5821_v26  ;;  %v2416_v26 = vrot.slane %v2414_v22, 5 }
 0x20e   : > { %4344 = vmatprep.mubr.msk.bf16.mxu0 %vm701_vm1, %v5872_v63  ;;  %v2371_v63 = vld [vmem:[#allocation2 + $0x48] sm:$0xf] }
 0x20f   : > { %v2480_v55 = vshrl.u32 %v2371_v63, 16 }
 0x210   : > { %4369 = vmatmul.mubr.msk.bf16.vlgmr.msra.gmra.mxu1 %vm701_vm1, %v5889_v9 }
 0x211   : > { %4372 = vmatprep.mubr.msk.bf16.mxu1 %vm701_vm1, %v5893_v39  ;;  %4409 = vmatpush3.bf16.msra.mxu1 %v4700_v31  ;;  %v2410_v31 = vrot.slane %v2408_v2, 4  ;;  %v2482_v29 = vrot.slane %v2480_v55, 4  ;;  %v2376_v2 = vld [vmem:[#allocation2 + $0x6c] sm:$0xf] }
 0x212   : > { %4410 = vmatprep.subr.bf16.mxu1 %v4702_v49  ;;  %v2518_v23 = vshll.u32 %v2376_v2, 16 }
 0x215   : > { %4345 = vmatmul.mubr.msk.bf16.vlgmr.msra.gmra.mxu0 %vm701_vm1, %v5876_v12  ;;  %4411 = vmatpush3.bf16.msra.mxu1 %v4702_v49  ;;  %v2397_v12 = vrot.slane %v2395_v61, 4  ;;  %v5971_v49 = vrot.slane %v2452_v40, 5  ;;  %v2373_v61 = vld [vmem:[#allocation2 + $0x58] sm:$0xf] }
 0x216   : > { %4385 = vmatpush3.bf16.msra.mxu0 %v4697_v21  ;;  %4348 = vmatprep.mubr.msk.bf16.mxu0 %vm701_vm1, %v5889_v9  ;;  %v2446_v9 = vshll.u32 %v2367_v54, 16  ;;  %v2476_v21 = vshll.u32 %v2371_v63, 16  ;;  %v2524_v54 = vshll.u32 %v2377_v60, 16  ;;  %v2491_v5 = vshrl.u32 %v2373_v61, 16 }
 0x217   : > { %4386 = vmatprep.subr.bf16.mxu0 %v4698_v37  ;;  %4412 = vmatprep.subr.bf16.mxu1 %v4705_v41  ;;  %v2401_v27 = vor.u32 %v2400_v3, %v2397_v12  ;;  %v2494_v7 = vshll.u32 %v2373_v61, 16  ;;  %v2515_v63 = vshrl.u32 %v2376_v2, 16  ;;  %v2541_v2 = vrot.slane %v2539_v33, 4 }
 0x218   : > { %4373 = vmatmul.mubr.msk.bf16.gmra.mxu1 %vm701_vm1, %v5911_v32  ;;  %v2448_v1 = vrot.slane %v2446_v9, 5  ;;  %v5977_v36 = vrot.slane %v2476_v21, 5  ;;  %v2493_v40 = vrot.slane %v2491_v5, 4  ;;  %v2383_v21 = vld [vmem:[#allocation2 + $0x98] sm:$0xf] }
 0x219   : > { %4376 = vmatprep.mubr.msk.bf16.mxu1 %vm701_vm1, %v5915_v18  ;;  %4413 = vmatpush3.bf16.msra.mxu1 %v4705_v41  ;;  %v2469_v41 = vrot.slane %v2467_v14, 4  ;;  %v2402_v4 = vrot.slane %v2401_v27, 4  ;;  %v2496_v51 = vrot.slane %v2494_v7, 5  ;;  %v2517_v24 = vrot.slane %v2515_v63, 4  ;;  %v2385_v7 = vld [vmem:[#allocation2 + $0xa8] sm:$0xf] }
 0x21a   : > { %4387 = vmatpush3.bf16.msra.mxu0 %v4698_v37  ;;  %4414 = vmatprep.subr.bf16.mxu1 %v4706_v48  ;;  %v2374_v37 = vld [vmem:[#allocation2 + $0x5c] sm:$0xf]  ;;  %v2449_v47 = vor.u32 %v2448_v1, %v2445_v30  ;;  %v2483_v56 = vor.u32 %v2482_v29, %v5977_v36  ;;  %v2520_v14 = vrot.slane %v2518_v23, 5  ;;  %v2382_v1 = vld [vmem:[#allocation2 + $0x94] sm:$0xf]  ;;  %v2576_v29 = vshrl.u32 %v2383_v21, 16 }
 0x21b   : > { %4388 = vmatprep.subr.bf16.mxu0 %v4699_v50  ;;  %v2504_v53 = vshrl.u32 %v2374_v37, 16  ;;  %v2473_v62 = vor.u32 %v2472_v42, %v2469_v41  ;;  %v2407_v8 = vsel %vm5983_vm15, %v2402_v4, %v5958_v25  ;;  %v2563_v42 = vshrl.u32 %v2382_v1, 16  ;;  %v2381_v4 = vld [vmem:[#allocation2 + $0x88] sm:$0x1] }
 0x21c   : > { %v2484_v9 = vrot.slane %v2483_v56, 4  ;;  %v2521_v41 = vor.u32 %v2520_v14, %v2517_v24  ;;  %v2566_v60 = vshll.u32 %v2382_v1, 16  ;;  %v2384_v56 = vld [vmem:[#allocation2 + $0x9c] sm:$0x1]  ;;  %v2387_v24 = vld [vmem:[#allocation2 + $0xb0] sm:$0x1] }
 0x21d   : > { %4349 = vmatmul.mubr.msk.bf16.gmra.mxu0 %vm701_vm1, %v5893_v39  ;;  %4415 = vmatpush3.bf16.msra.mxu1 %v4706_v48  ;;  %v2411_v39 = vor.u32 %v2410_v31, %v5958_v25  ;;  %v2459_v48 = vor.u32 %v2458_v19, %v5971_v49  ;;  %v2506_v0 = vrot.slane %v2504_v53, 4  ;;  %v2380_v31 = vld [vmem:[#allocation2 + $0x84] sm:$0xf]  ;;  %v2474_v25 = vrot.slane %v2473_v62, 4  ;;  %v4710_v1 = vld [vmem:[#allocation12 + $0x100] sm:$0xff]  }
 0x21e   : > { %4352 = vmatprep.mubr.msk.bf16.mxu0 %vm701_vm1, %v5911_v32  ;;  %4389 = vmatpush3.bf16.msra.mxu0 %v4699_v50  ;;  %v2426_v32 = vrot.slane %v2425_v6, 4  ;;  %v2500_v50 = vshll.u32 %v2374_v37, 16  ;;  %v2534_v6 = vshll.u32 %v2378_v11, 16  ;;  %v2548_v27 = vshll.u32 %v2380_v31, 16 }
 0x21f   : > { %4390 = vmatprep.subr.bf16.mxu0 %v4704_v52  ;;  %v2412_v16 = vrot.slane %v2411_v39, 4  ;;  %v2552_v30 = vshrl.u32 %v2380_v31, 16  ;;  %v2489_v39 = vsel %vm5983_vm15, %v2484_v9, %v2488_v13  ;;  %v2542_v37 = vshll.u32 %v2379_v58, 16 }
 0x220   : > { %4377 = vmatmul.mubr.msk.bf16.gmra.mxu1 %vm701_vm1, %v5928_v38  ;;  %v2431_v10 = vsel %vm5983_vm15, %v2426_v32, %v5947_v15  ;;  %v2450_v15 = vrot.slane %v2449_v47, 4  ;;  %v6011_v3 = vrot.slane %v2500_v50, 5  ;;  %v2572_v32 = vshll.u32 %v2383_v21, 16  ;;  %v2386_v50 = vld [vmem:[#allocation2 + $0xac] sm:$0xf]  ;;  %v4709_v21 = vld [vmem:[#allocation12 + $0x108] sm:$0xff]  }
 0x221   : > { %4380 = vmatprep.mubr.msk.bf16.mxu1 %vm701_vm1, %v5968_v35  ;;  %v6002_v59 = vcombine.low %v2431_v10, %v2441_v46  ;;  %v2417_v12 = vsel %vm5983_vm15, %v2412_v16, %v2416_v26  ;;  %v6038_v47 = vrot.slane %v2548_v27, 5  ;;  %v2536_v61 = vrot.slane %v2534_v6, 5 }
 0x222   : > { %4391 = vmatpush3.bf16.msra.mxu0 %v4704_v52  ;;  %v2530_v52 = vrot.slane %v2528_v57, 4  ;;  %v3883_v55 = vcombine.low %v2407_v8, %v2417_v12  ;;  %v2455_v22 = vsel %vm5983_vm15, %v2450_v15, %v5971_v49  ;;  %v2507_v28 = vor.u32 %v2506_v0, %v6011_v3  ;;  %v4708_v15 = vld [vmem:[#allocation12 + $0x110] sm:$0xff]  }
 0x223   : > { %4432 = vmatprep.subr.bf16.mxu0 %v5973_v34  ;;  %v2479_v49 = vsel %vm5983_vm15, %v2474_v25, %v5977_v36  ;;  %v2574_v16 = vrot.slane %v2572_v32, 5  ;;  %v2544_v10 = vrot.slane %v2542_v37, 5  ;;  %v2558_v57 = vshll.u32 %v2381_v4, 16  ;;  %v2388_v4 = vld [vmem:[#allocation2 + $0xbc] sm:$0xf] }
 0x224   : > { %v2508_v46 = vrot.slane %v2507_v28, 4  ;;  %v2565_v62 = vrot.slane %v2563_v42, 4  ;;  %v2568_v5 = vrot.slane %v2566_v60, 5  ;;  %v2790_v63 = vshll.u32 %v2386_v50, 16 }
 0x225   : > { %4353 = vmatmul.mubr.msk.bf16.gmra.mxu0 %vm701_vm1, %v5915_v18  ;;  %v2460_v18 = vrot.slane %v2459_v48, 4  ;;  %v2578_v48 = vrot.slane %v2576_v29, 4  ;;  %v2794_v23 = vshrl.u32 %v2386_v50, 16  ;;  %v2582_v0 = vshll.u32 %v2384_v56, 16 }
 0x226   : > { %4356 = vmatprep.mubr.msk.bf16.mxu0 %vm701_vm1, %v5928_v38  ;;  %v6014_v38 = vrot.slane %v2524_v54, 5  ;;  %v2522_v54 = vrot.slane %v2521_v41, 4  ;;  %v2513_v8 = vsel %vm5983_vm15, %v2508_v46, %v5987_v44  ;;  %v2545_v13 = vor.u32 %v2544_v10, %v2541_v2  ;;  %v2390_v10 = vld [vmem:[#allocation2 + $0xc4] sm:$0x1] }
 0x227   : > { %v2465_v20 = vsel %vm5983_vm15, %v2460_v18, %v5960_v43  ;;  %v2497_v43 = vor.u32 %v2496_v51, %v2493_v40  ;;  %v2579_v18 = vor.u32 %v2578_v48, %v2574_v16  ;;  %v2784_v44 = vshll.u32 %v2385_v7, 16 }
 0x228   : > { %4381 = vmatmul.mubr.msk.bf16.gmra.mxu1 %vm701_vm1, %v3870_v45  ;;  %v2531_v19 = vor.u32 %v2530_v52, %v6014_v38  ;;  %v6034_v26 = vcombine.low %v2455_v22, %v2465_v20  ;;  %v6036_v45 = vcombine.low %v2479_v49, %v2489_v39  ;;  %v2781_v52 = vshrl.u32 %v2385_v7, 16 }
 0x229   : > { %4416 = vmatprep.mubr.msk.bf16.mxu1 %vm701_vm1, %v6002_v59  ;;  %v2498_v53 = vrot.slane %v2497_v43, 4  ;;  %v2527_v25 = vsel %vm5983_vm15, %v2522_v54, %v6014_v38  ;;  %v2560_v40 = vrot.slane %v2558_v57, 5  ;;  %v2569_v51 = vor.u32 %v2568_v5, %v2565_v62 }
 0x22a   : > { %v2532_v36 = vrot.slane %v2531_v19, 4  ;;  %v2580_v22 = vrot.slane %v2579_v18, 4  ;;  %v2546_v14 = vrot.slane %v2545_v13, 4  ;;  %v2783_v58 = vrot.slane %v2781_v52, 4 }
 0x22b   : > { %v2503_v9 = vsel %vm5983_vm15, %v2498_v53, %v6011_v3  ;;  %v2792_v3 = vrot.slane %v2790_v63, 5  ;;  %v2786_v20 = vrot.slane %v2784_v44, 5  ;;  %v2570_v38 = vrot.slane %v2569_v51, 4 }
 0x22c   : > { %v2537_v12 = vsel %vm5983_vm15, %v2532_v36, %v2536_v61  ;;  %v3887_v31 = vcombine.low %v2503_v9, %v2513_v8  ;;  %v2551_v19 = vsel %vm5983_vm15, %v2546_v14, %v6038_v47  ;;  %v2960_v36 = vshll.u32 %v2388_v4, 16 }
 0x22d   : > { %4357 = vmatmul.mubr.msk.bf16.gmra.mxu0 %vm701_vm1, %v5968_v35  ;;  %v2554_v35 = vrot.slane %v2552_v30, 4  ;;  %v2800_v30 = vshll.u32 %v2387_v24, 16  ;;  %v2787_v32 = vor.u32 %v2786_v20, %v2783_v58  ;;  %v2575_v49 = vsel %vm5983_vm15, %v2570_v38, %v2574_v16  ;;  %v4714_v38 = vld [vmem:[#allocation14] sm:$0xff]  }
 0x22e   : > { %4392 = vmatprep.mubr.msk.bf16.mxu0 %vm701_vm1, %v3883_v55  ;;  %v2796_v55 = vrot.slane %v2794_v23, 4  ;;  %v2962_v50 = vrot.slane %v2960_v36, 5 }
 0x22f   : > { %v2555_v11 = vor.u32 %v2554_v35, %v6038_v47  ;;  %v2802_v37 = vrot.slane %v2800_v30, 5  ;;  %v2788_v41 = vrot.slane %v2787_v32, 4  ;;  %v2389_v47 = vld [vmem:[#allocation2 + $0xc0] sm:$0xf]  ;;  %v2957_v35 = vshrl.u32 %v2388_v4, 16 }
 0x230   : > { %4417 = vmatmul.mubr.msk.bf16.vlgmr.msra.gmra.mxu1 %vm701_vm1, %v6034_v26  ;;  %v2797_v27 = vor.u32 %v2796_v55, %v2792_v3  ;;  %v2966_v61 = vshll.u32 %v2389_v47, 16  ;;  %v2970_v16 = vshrl.u32 %v2389_v47, 16 }
 0x231   : > { %4420 = vmatprep.mubr.msk.bf16.mxu1 %vm701_vm1, %v6036_v45  ;;  %v2556_v6 = vrot.slane %v2555_v11, 4  ;;  %v2793_v60 = vsel %vm5983_vm15, %v2788_v41, %v2792_v3  ;;  %v2959_v48 = vrot.slane %v2957_v35, 4  ;;  %v4712_v11 = vld [vmem:[#allocation14 + $0x10] sm:$0xff]  }
 0x232   : > { %v2798_v33 = vrot.slane %v2797_v27, 4  ;;  %v2968_v53 = vrot.slane %v2966_v61, 5  ;;  %v2972_v2 = vrot.slane %v2970_v16, 4 }
 0x233   : > { %v2561_v28 = vsel %vm5983_vm15, %v2556_v6, %v2560_v40 }
 0x234   : > { %v3889_v29 = vcombine.low %v2551_v19, %v2561_v28  ;;  %v2803_v42 = vsel %vm5983_vm15, %v2798_v33, %v2802_v37  ;;  %v2973_v56 = vor.u32 %v2972_v2, %v2968_v53 }
 0x235   : > { %4393 = vmatmul.mubr.msk.bf16.vlgmr.msra.gmra.mxu0 %vm701_vm1, %v6002_v59  ;;  %v3888_v59 = vcombine.low %v2527_v25, %v2537_v12  ;;  %v3903_v46 = vcombine.low %v2793_v60, %v2803_v42 }
 0x236   : > { %4433 = vmatpush3.bf16.msra.mxu0 %v5973_v34  ;;  %4396 = vmatprep.mubr.msk.bf16.mxu0 %vm701_vm1, %v6034_v26  ;;  %v2584_v34 = vrot.slane %v2582_v0, 5  ;;  %v2974_v57 = vrot.slane %v2973_v56, 4  ;;  %v4713_v0 = vld [vmem:[#allocation14 + $0x8] sm:$0xff]  }
 0x237   : > { %4434 = vmatprep.subr.bf16.mxu0 %v4708_v15 }
 0x238   : > { %4421 = vmatmul.mubr.msk.bf16.gmra.mxu1 %vm701_vm1, %v3887_v31  ;;  %v2585_v39 = vsel %vm5983_vm15, %v2580_v22, %v2584_v34 }
 0x239   : > { %4424 = vmatprep.mubr.msk.bf16.mxu1 %vm701_vm1, %v3888_v59  ;;  %v3890_v43 = vcombine.low %v2575_v49, %v2585_v39 }
 0x23a   : > { %4435 = vmatpush3.bf16.msra.mxu0 %v4708_v15  ;;  %v4711_v15 = vld [vmem:[#allocation14 + $0x18] sm:$0xff]  }
 0x23b   : > { %4436 = vmatprep.subr.bf16.mxu0 %v4709_v21  ;;  %4456 = vmatprep.subr.bf16.mxu1 %v4711_v15 }
 0x23c   : > { %4457 = vmatpush3.bf16.msra.mxu1 %v4711_v15 }
 0x23d   : > { %4397 = vmatmul.mubr.msk.bf16.gmra.mxu0 %vm701_vm1, %v6036_v45  ;;  %4458 = vmatprep.subr.bf16.mxu1 %v4712_v11 }
 0x23e   : > { %4400 = vmatprep.mubr.msk.bf16.mxu0 %vm701_vm1, %v3887_v31  ;;  %4437 = vmatpush3.bf16.msra.mxu0 %v4709_v21 }
 0x23f   : > { %4438 = vmatprep.subr.bf16.mxu0 %v4710_v1 }
 0x240   : > { %4425 = vmatmul.mubr.msk.bf16.gmra.mxu1 %vm701_vm1, %v3889_v29 }
 0x241   : > { %4428 = vmatprep.mubr.msk.bf16.mxu1 %vm701_vm1, %v3890_v43  ;;  %4459 = vmatpush3.bf16.msra.mxu1 %v4712_v11 }
 0x242   : > { %4439 = vmatpush3.bf16.msra.mxu0 %v4710_v1  ;;  %4460 = vmatprep.subr.bf16.mxu1 %v4713_v0 }
 0x245   : > { %4401 = vmatmul.mubr.msk.bf16.gmra.mxu0 %vm701_vm1, %v3888_v59  ;;  %4461 = vmatpush3.bf16.msra.mxu1 %v4713_v0 }
 0x246   : > { %4404 = vmatprep.mubr.msk.bf16.mxu0 %vm701_vm1, %v3889_v29  ;;  %4462 = vmatprep.subr.bf16.mxu1 %v4714_v38 }
 0x248   : > { %4429 = vmatmul.mubr.msk.bf16.gmra.mxu1 %vm701_vm1, %v3903_v46 }
 0x249   : > { %4463 = vmatpush3.bf16.msra.mxu1 %v4714_v38 }
 0x24d   : > { %4405 = vmatmul.mubr.msk.bf16.gmra.mxu0 %vm701_vm1, %v3890_v43 }
 0x24e   : > { %4440 = vmatprep.mubr.msk.bf16.mxu0 %vm701_vm1, %v6034_v26  ;;  %v2963_v26 = vor.u32 %v2962_v50, %v2959_v48 }
 0x250   : > { %v2964_v54 = vrot.slane %v2963_v26, 4 }
 0x252   : > { %v2969_v5 = vsel %vm5983_vm15, %v2964_v54, %v2968_v53 }
 0x255   : > { %4441 = vmatmul.mubr.msk.bf16.vlgmr.msra.gmra.mxu0 %vm701_vm1, %v6036_v45  ;;  %v2976_v45 = vshll.u32 %v2390_v10, 16 }
 0x256   : > { %4444 = vmatprep.mubr.msk.bf16.mxu0 %vm701_vm1, %v3887_v31 }
 0x257   : > { %v2978_v62 = vrot.slane %v2976_v45, 5 }
 0x259   : > { %v2979_v7 = vsel %vm5983_vm15, %v2974_v57, %v2978_v62 }
 0x25a   : > { %v3916_v8 = vcombine.low %v2969_v5, %v2979_v7 }
 0x25d   : > { %4445 = vmatmul.mubr.msk.bf16.gmra.mxu0 %vm701_vm1, %v3888_v59 }
 0x25e   : > { %4448 = vmatprep.mubr.msk.bf16.mxu0 %vm701_vm1, %v3889_v29 }
 0x265   : > { %4449 = vmatmul.mubr.msk.bf16.gmra.mxu0 %vm701_vm1, %v3890_v43 }
 0x266   : > { %4452 = vmatprep.mubr.msk.bf16.mxu0 %vm701_vm1, %v3903_v46 }
 0x26d   : > { %4453 = vmatmul.mubr.msk.bf16.gmra.mxu0 %vm701_vm1, %v3916_v8 }
 0x290   : > { %v4274_v63 = vpop.f32.mrf.mxu1 }
 0x292   : > { %v1606_v23 = vpop.f32.mrf.mxu1 }
 0x294   : > { %v4250_v12 = vpop.f32.mrf.mxu0  ;;  %v4275_v18 = vpop.f32.mrf.mxu1 }
 0x295   : > { %v1615_v9 = vadd.f32 %v4274_v63, %v4250_v12 }
 0x296   : > { %v1479_v13 = vpop.f32.mrf.mxu0  ;;  %v1609_v52 = vpop.f32.mrf.mxu1 }
 0x297   : > { %v1607_v17 = vadd.f32 %v1606_v23, %v1479_v13 }
 0x298   : > { %v4251_v44 = vpop.f32.mrf.mxu0  ;;  %v4278_v31 = vpop.f32.mrf.mxu1 }
 0x299   : > { %v1618_v25 = vadd.f32 %v4275_v18, %v4251_v44 }
 0x29a   : > { %v1482_v40 = vpop.f32.mrf.mxu0  ;;  %v1622_v51 = vpop.f32.mrf.mxu1 }
 0x29b   : > { %v1610_v59 = vadd.f32 %v1609_v52, %v1482_v40 }
 0x29c   : > { %v4279_v6 = vpop.f32.mrf.mxu1 }
 0x29d   : > { %v4254_v21 = vpop.f32.mrf.mxu0 }
 0x29e   : > { %v1631_v3 = vadd.f32 %v4278_v31, %v4254_v21  ;;  %v1625_v55 = vpop.f32.mrf.mxu1 }
 0x29f   : > { %v1495_v22 = vpop.f32.mrf.mxu0 }
 0x2a0   : > { %v1623_v34 = vadd.f32 %v1622_v51, %v1495_v22  ;;  %v4282_v24 = vpop.f32.mrf.mxu1 }
 0x2a1   : > { %v4255_v14 = vpop.f32.mrf.mxu0 }
 0x2a2   : > { %v1634_v58 = vadd.f32 %v4279_v6, %v4255_v14  ;;  %v1638_v20 = vpop.f32.mrf.mxu1 }
 0x2a3   : > { %v1498_v28 = vpop.f32.mrf.mxu0 }
 0x2a4   : > { %v1626_v27 = vadd.f32 %v1625_v55, %v1498_v28  ;;  %v4283_v30 = vpop.f32.mrf.mxu1 }
 0x2a5   : > { %v4258_v1 = vpop.f32.mrf.mxu0 }
 0x2a6   : > { %v1647_v39 = vadd.f32 %v4282_v24, %v4258_v1  ;;  %v1641_v19 = vpop.f32.mrf.mxu1 }
 0x2a7   : > { %v1511_v32 = vpop.f32.mrf.mxu0 }
 0x2a8   : > { %v1639_v29 = vadd.f32 %v1638_v20, %v1511_v32  ;;  %v4286_v49 = vpop.f32.mrf.mxu1 }
 0x2a9   : > { %v4259_v43 = vpop.f32.mrf.mxu0 }
 0x2aa   : > { %v1650_v33 = vadd.f32 %v4283_v30, %v4259_v43  ;;  %v1654_v37 = vpop.f32.mrf.mxu1 }
 0x2ab   : > { %v1514_v41 = vpop.f32.mrf.mxu0 }
 0x2ac   : > { %v1642_v42 = vadd.f32 %v1641_v19, %v1514_v41  ;;  %v4287_v60 = vpop.f32.mrf.mxu1 }
 0x2ad   : > { %v4262_v46 = vpop.f32.mrf.mxu0 }
 0x2ae   : > { %v1663_v4 = vadd.f32 %v4286_v49, %v4262_v46  ;;  %v1657_v47 = vpop.f32.mrf.mxu1 }
 0x2af   : > { %v1527_v35 = vpop.f32.mrf.mxu0 }
 0x2b0   : > { %v1655_v36 = vadd.f32 %v1654_v37, %v1527_v35  ;;  %v6099_v61 = vpop.f32.mrf.mxu1 }
 0x2b1   : > { %v4263_v16 = vpop.f32.mrf.mxu0 }
 0x2b2   : > { %v1666_v48 = vadd.f32 %v4287_v60, %v4263_v16  ;;  %v6101_v50 = vpop.f32.mrf.mxu1 }
 0x2b3   : > { %v1530_v53 = vpop.f32.mrf.mxu0 }
 0x2b4   : > { %v1658_v2 = vadd.f32 %v1657_v47, %v1530_v53  ;;  %v6103_v10 = vpop.f32.mrf.mxu1 }
 0x2b5   : > { %v4298_v26 = vpop.f32.mrf.mxu0 }
 0x2b6   : > { %v6105_v56 = vadd.f32 %v4298_v26, %v1615_v9  ;;  %v6107_v45 = vpop.f32.mrf.mxu1 }
 0x2b7   : > { %v1764_v54 = vpop.f32.mrf.mxu0 }
 0x2b8   : > { %v6109_v57 = vadd.f32 %v1764_v54, %v1607_v17  ;;  %v6111_v62 = vpop.f32.mrf.mxu1 }
 0x2b9   : > { %v4299_v5 = vpop.f32.mrf.mxu0 }
 0x2ba   : > { %v6113_v7 = vadd.f32 %v4299_v5, %v1618_v25  ;;  %v6115_v8 = vpop.f32.mrf.mxu1 }
 0x2bb   : > { %v1767_v15 = vpop.f32.mrf.mxu0 }
 0x2bc   : > { %v6117_v11 = vadd.f32 %v1767_v15, %v1610_v59  ;;  %v6119_v63 = vpop.f32.mrf.mxu1 }
 0x2bd   : > { %v4302_v23 = vpop.f32.mrf.mxu0 }
 0x2be   : > { %v6121_v12 = vadd.f32 %v4302_v23, %v1631_v3  ;;  %v6123_v18 = vpop.f32.mrf.mxu1 }
 0x2bf   : > { %v1780_v0 = vpop.f32.mrf.mxu0 }
 0x2c0   : > { %v6125_v9 = vadd.f32 %v1780_v0, %v1623_v34  ;;  %v6127_v13 = vpop.f32.mrf.mxu1 }
 0x2c1   : > { %v4303_v52 = vpop.f32.mrf.mxu0 }
 0x2c2   : > { %v6129_v17 = vadd.f32 %v4303_v52, %v1634_v58  ;;  %v6131_v44 = vpop.f32.mrf.mxu1 }
 0x2c3   : > { %v1783_v31 = vpop.f32.mrf.mxu0 }
 0x2c4   : > { %v6133_v25 = vadd.f32 %v1783_v31, %v1626_v27  ;;  %v6135_v40 = vpop.f32.mrf.mxu1 }
 0x2c5   : > { %v4306_v51 = vpop.f32.mrf.mxu0 }
 0x2c6   : > { %v6137_v59 = vadd.f32 %v4306_v51, %v1647_v39  ;;  %v6139_v6 = vpop.f32.mrf.mxu1 }
 0x2c7   : > { %v1796_v21 = vpop.f32.mrf.mxu0 }
 0x2c8   : > { %v6141_v3 = vadd.f32 %v1796_v21, %v1639_v29  ;;  %v6143_v55 = vpop.f32.mrf.mxu1 }
 0x2c9   : > { %v4307_v22 = vpop.f32.mrf.mxu0 }
 0x2ca   : > { %v6145_v34 = vadd.f32 %v4307_v22, %v1650_v33  ;;  %v6147_v24 = vpop.f32.mrf.mxu1 }
 0x2cb   : > { %6626 = vst [vmem:[#allocation41_spill] sm:$0xff] %v6147_v24  ;;  %v1799_v14 = vpop.f32.mrf.mxu0  ;;  %v2037_v24 = vadd.f32 %v6101_v50, %v6109_v57  ;;  %v2043_v50 = vadd.f32 %v6111_v62, %v6121_v12 }
 0x2cc   : > { %v6149_v58 = vadd.f32 %v1799_v14, %v1642_v42  ;;  %v6151_v20 = vpop.f32.mrf.mxu1 }
 0x2cd   : > { %6627 = vst [vmem:[#allocation42_spill] sm:$0xff] %v6151_v20  ;;  %v4310_v38 = vpop.f32.mrf.mxu0 }
 0x2ce   : > { %v6153_v28 = vadd.f32 %v4310_v38, %v1663_v4  ;;  %v6155_v27 = vpop.f32.mrf.mxu1 }
 0x2cf   : > { %6628 = vst [vmem:[#allocation43_spill] sm:$0xff] %v6155_v27  ;;  %v1812_v30 = vpop.f32.mrf.mxu0 }
 0x2d0   : > { %v6157_v1 = vadd.f32 %v1812_v30, %v1655_v36  ;;  %v6159_v39 = vpop.f32.mrf.mxu1 }
 0x2d1   : > { %v4311_v19 = vpop.f32.mrf.mxu0 }
 0x2d2   : > { %6629 = vst [vmem:[#allocation44_spill] sm:$0xff] %v6157_v1  ;;  %v6161_v32 = vadd.f32 %v4311_v19, %v1666_v48  ;;  %v6163_v29 = vpop.f32.mrf.mxu1 }
 0x2d3   : > { %v1815_v49 = vpop.f32.mrf.mxu0 }
 0x2d4   : > { %6630 = vst [vmem:[#allocation45_spill] sm:$0xff] %v6161_v32  ;;  %v6165_v43 = vadd.f32 %v1815_v49, %v1658_v2  ;;  %v6167_v33 = vpop.f32.mrf.mxu1 }
 0x2d5   : > { %v4346_v37 = vpop.f32.mrf.mxu0 }
 0x2d6   : > { %6631 = vst [vmem:[#allocation46_spill] sm:$0xff] %v6165_v43  ;;  %v6169_v41 = vpop.f32.mrf.mxu1 }
 0x2d7   : > { %v2128_v42 = vpop.f32.mrf.mxu0 }
 0x2d8   : > { %v6171_v60 = vpop.f32.mrf.mxu1 }
 0x2d9   : > { %v4347_v46 = vpop.f32.mrf.mxu0 }
 0x2da   : > { %v6173_v4 = vpop.f32.mrf.mxu1 }
 0x2db   : > { %v2131_v47 = vpop.f32.mrf.mxu0 }
 0x2dc   : > { %v6175_v35 = vpop.f32.mrf.mxu1 }
 0x2dd   : > { %v4350_v36 = vpop.f32.mrf.mxu0 }
 0x2de   : > { %v6177_v16 = vpop.f32.mrf.mxu1 }
 0x2df   : > { %6632 = vst [vmem:[#allocation47_spill] sm:$0xff] %v6177_v16  ;;  %v2144_v48 = vpop.f32.mrf.mxu0 }
 0x2e0   : > { %v6179_v53 = vpop.f32.mrf.mxu1 }
 0x2e1   : > { %6633 = vst [vmem:[#allocation48_spill] sm:$0xff] %v6179_v53  ;;  %v4351_v2 = vpop.f32.mrf.mxu0 }
 0x2e2   : > { %v6181_v26 = vpop.f32.mrf.mxu1 }
 0x2e3   : > { %6634 = vst [vmem:[#allocation49_spill] sm:$0xff] %v6181_v26  ;;  %v6183_v54 = vpop.f32.mrf.mxu0 }
 0x2e4   : > { %v6185_v5 = vpop.f32.mrf.mxu1 }
 0x2e5   : > { %6635 = vst [vmem:[#allocation50_spill] sm:$0xff] %v6185_v5  ;;  %v6187_v15 = vpop.f32.mrf.mxu0 }
 0x2e6   : > { %v6189_v23 = vpop.f32.mrf.mxu1 }
 0x2e7   : > { %6636 = vst [vmem:[#allocation51_spill] sm:$0xff] %v6189_v23  ;;  %v6191_v0 = vpop.f32.mrf.mxu0 }
 0x2e8   : > { %v6193_v52 = vpop.f32.mrf.mxu1 }
 0x2e9   : > { %6637 = vst [vmem:[#allocation52_spill] sm:$0xff] %v6193_v52  ;;  %v6195_v31 = vpop.f32.mrf.mxu0 }
 0x2ea   : > { %6638 = vst [vmem:[#allocation53_spill] sm:$0xff] %v6195_v31  ;;  %v6197_v51 = vpop.f32.mrf.mxu1 }
 0x2eb   : > { %6639 = vst [vmem:[#allocation54_spill] sm:$0xff] %v6197_v51  ;;  %v6199_v21 = vpop.f32.mrf.mxu0 }
 0x2ec   : > { %6640 = vst [vmem:[#allocation55_spill] sm:$0xff] %v6199_v21  ;;  %v6203_v14 = vpop.f32.mrf.mxu1  ;;  %v2039_v21 = vadd.f32 %v6099_v61, %v6105_v56  ;;  %v2038_v61 = vadd.f32 %v6107_v45, %v6117_v11 }
 0x2ed   : > { %v6201_v22 = vpop.f32.mrf.mxu0  ;;  %6642 = vst [vmem:[#allocation57_spill] sm:$0xff] %v6203_v14 }
 0x2ee   : > { %6641 = vst [vmem:[#allocation56_spill] sm:$0xff] %v6201_v22  ;;  %v6209_v19 = vpop.f32.mrf.mxu1  ;;  %v2193_v16 = vadd.f32 %v4346_v37, %v2039_v21  ;;  %v2192_v21 = vadd.f32 %v2131_v47, %v2038_v61  ;;  %v2044_v47 = vadd.f32 %v6119_v63, %v6129_v17  ;;  %v2047_v17 = vadd.f32 %v6127_v13, %v6137_v59 }
 0x2ef   : > { %v6205_v38 = vpop.f32.mrf.mxu0  ;;  %6645 = vst [vmem:[#allocation60_spill] sm:$0xff] %v6209_v19  ;;  %v2046_v13 = vadd.f32 %v6139_v6, %v6149_v58  ;;  %v6656_v58 = vld [vmem:[#allocation47_spill] sm:$0xff] }
 0x2f0   : > { %6643 = vst [vmem:[#allocation58_spill] sm:$0xff] %v6205_v38  ;;  %v4418_v23 = vpop.f32.mrf.mxu1  ;;  %v2347_v56 = vadd.f32 %v6159_v39, %v2193_v16  ;;  %v2346_v12 = vadd.f32 %v6169_v41, %v2192_v21  ;;  %v2045_v41 = vadd.f32 %v6131_v44, %v6141_v3 }
 0x2f1   : > { %v6207_v30 = vpop.f32.mrf.mxu0 }
 0x2f2   : > { %6644 = vst [vmem:[#allocation59_spill] sm:$0xff] %v6207_v30  ;;  %v2877_v43 = vpop.f32.mrf.mxu1 }
 0x2f3   : > { %v6211_v49 = vpop.f32.mrf.mxu0 }
 0x2f4   : > { %6646 = vst [vmem:[#allocation61_spill] sm:$0xff] %v6211_v49  ;;  %v4419_v20 = vpop.f32.mrf.mxu1 }
 0x2f5   : > { %v4394_v52 = vpop.f32.mrf.mxu0 }
 0x2f6   : > { %v6213_v22 = vpop.f32.mrf.mxu1  ;;  %v2766_v57 = vadd.f32 %v4394_v52, %v2347_v56  ;;  %v2198_v52 = vadd.f32 %v4351_v2, %v2044_v47 }
 0x2f7   : > { %v2701_v27 = vpop.f32.mrf.mxu0 }
 0x2f8   : > { %v6219_v30 = vpop.f32.mrf.mxu1  ;;  %v2352_v59 = vadd.f32 %v6175_v35, %v2198_v52  ;;  %v6661_v52 = vld [vmem:[#allocation55_spill] sm:$0xff] }
 0x2f9   : > { %v4395_v5 = vpop.f32.mrf.mxu0  ;;  %6649 = vst [vmem:[#allocation64_spill] sm:$0xff] %v6219_v30  ;;  %v2040_v30 = vadd.f32 %v6103_v10, %v6113_v7  ;;  %v2041_v10 = vadd.f32 %v6115_v8, %v6125_v9  ;;  %v2042_v8 = vadd.f32 %v6123_v18, %v6133_v25  ;;  %v6275_v18 = vld [vmem:[%s6652_s18] ss:$0 sm:$0xff] }
 0x2fa   : > { %v6227_v53 = vpop.f32.mrf.mxu1 }
 0x2fb   : > { %v2704_v51 = vpop.f32.mrf.mxu0  ;;  %v2194_v1 = vadd.f32 %v4347_v46, %v2040_v30  ;;  %v2197_v46 = vadd.f32 %v4350_v36, %v2043_v50  ;;  %v2195_v39 = vadd.f32 %v2144_v48, %v2041_v10  ;;  %v2196_v63 = vadd.f32 %v6183_v54, %v2042_v8 }
 0x2fc   : > { %v2200_v8 = vadd.f32 %v6661_v52, %v2046_v13 }
 0x2fd   : > { %v4398_v32 = vpop.f32.mrf.mxu0  ;;  %v2348_v11 = vadd.f32 %v6167_v33, %v2194_v1  ;;  %v2351_v1 = vadd.f32 %v6171_v60, %v2197_v46  ;;  %v2349_v2 = vadd.f32 %v6173_v4, %v2195_v39  ;;  %v2048_v60 = vadd.f32 %v6135_v40, %v6145_v34 }
 0x2fe   : > { %v2199_v34 = vadd.f32 %v6191_v0, %v2045_v41  ;;  %v6660_v0 = vld [vmem:[#allocation48_spill] sm:$0xff] }
 0x2ff   : > { %v2717_v26 = vpop.f32.mrf.mxu0  ;;  %v2767_v62 = vadd.f32 %v4395_v5, %v2348_v11 }
 0x300   : > { %v2768_v44 = vadd.f32 %v2717_v26, %v2349_v2  ;;  %v2350_v26 = vadd.f32 %v6656_v58, %v2196_v63 }
 0x301   : > { %v6215_v14 = vpop.f32.mrf.mxu0  ;;  %v2943_v54 = vadd.f32 %v4419_v20, %v2767_v62  ;;  %v6653_v20 = vld [vmem:[#allocation44_spill] sm:$0xff] }
 0x302   : > { %6647 = vst [vmem:[#allocation62_spill] sm:$0xff] %v6215_v14  ;;  %v2944_v39 = vadd.f32 %v6227_v53, %v2768_v44 }
 0x303   : > { %v6217_v38 = vpop.f32.mrf.mxu0 }
 0x304   : > { %6648 = vst [vmem:[#allocation63_spill] sm:$0xff] %v6217_v38  ;;  %v2191_v38 = vadd.f32 %v2128_v42, %v2037_v24 }
 0x305   : > { %v6221_v19 = vpop.f32.mrf.mxu0 }
 0x306   : > { %6650 = vst [vmem:[#allocation65_spill] sm:$0xff] %v6221_v19  ;;  %v6237_v19 = vpop.f32.mrf.mxu1  ;;  %v2345_v24 = vadd.f32 %v6163_v29, %v2191_v38  ;;  %v2942_v29 = vadd.f32 %v4418_v23, %v2766_v57  ;;  %v2201_v23 = vadd.f32 %v6187_v15, %v2047_v17  ;;  %v6658_v57 = vld [vmem:[#allocation53_spill] sm:$0xff] }
 0x307   : > { %v6223_v49 = vpop.f32.mrf.mxu0 }
 0x308   : > { %6651 = vst [vmem:[#allocation66_spill] sm:$0xff] %v6223_v49  ;;  %v6251_v7 = vpop.f32.mrf.mxu1  ;;  %v2764_v45 = vadd.f32 %v2701_v27, %v2345_v24  ;;  %v2765_v27 = vadd.f32 %v2704_v51, %v2346_v12  ;;  %v2051_v51 = vadd.f32 %v6143_v55, %v6153_v28  ;;  %v6657_v28 = vld [vmem:[#allocation64_spill] sm:$0xff]  ;;  %v2202_v24 = vadd.f32 %v6658_v57, %v2048_v60 }
 0x309   : > { %v6229_v31 = vpop.f32.mrf.mxu0  ;;  %v6655_v61 = vld [vmem:[#allocation62_spill] sm:$0xff]  ;;  %v2355_v46 = vadd.f32 %v6660_v0, %v2201_v23  ;;  %v6664_v60 = vld [vmem:[#allocation56_spill] sm:$0xff] }
 0x30a   : > { %v6263_v9 = vpop.f32.mrf.mxu1  ;;  %v2940_v48 = vadd.f32 %v2877_v43, %v2764_v45  ;;  %v2770_v43 = vadd.f32 %v4398_v32, %v2351_v1  ;;  %v2941_v40 = vadd.f32 %v6213_v22, %v2765_v27  ;;  %v6654_v32 = vld [vmem:[#allocation41_spill] sm:$0xff]  ;;  %v2771_v6 = vadd.f32 %v6655_v61, %v2352_v59  ;;  %v6668_v59 = vld [vmem:[#allocation50_spill] sm:$0xff] }
 0x30b   : > { %v6233_v14 = vpop.f32.mrf.mxu0  ;;  %v2049_v15 = vadd.f32 %v6654_v32, %v6653_v20  ;;  %v6659_v22 = vld [vmem:[#allocation63_spill] sm:$0xff]  ;;  %v6663_v1 = vld [vmem:[#allocation49_spill] sm:$0xff]  ;;  %v2205_v53 = vadd.f32 %v6664_v60, %v2051_v51  ;;  %v2356_v13 = vadd.f32 %v6668_v59, %v2202_v24  ;;  %v6669_v20 = vld [vmem:[#allocation58_spill] sm:$0xff] }
 0x30c   : > { %v2909_v3 = vpop.f32.mrf.mxu1  ;;  %v2946_v50 = vadd.f32 %v6657_v28, %v2770_v43  ;;  %v2769_v10 = vadd.f32 %v6659_v22, %v2350_v26  ;;  %v2947_v63 = vadd.f32 %v6237_v19, %v2771_v6  ;;  %v6665_v43 = vld [vmem:[#allocation45_spill] sm:$0xff]  ;;  %v6670_v61 = vld [vmem:[#allocation46_spill] sm:$0xff]  ;;  %v6671_v6 = vld [vmem:[#allocation43_spill] sm:$0xff] }
 0x30d   : > { %v6239_v49 = vpop.f32.mrf.mxu0  ;;  %v2203_v32 = vadd.f32 %v6669_v20, %v2049_v15  ;;  %v2050_v51 = vadd.f32 %v6671_v6, %v6670_v61  ;;  %v2775_v58 = vadd.f32 %v6229_v31, %v2356_v13  ;;  %v6672_v26 = vld [vmem:[#allocation51_spill] sm:$0xff]  ;;  %v6674_v22 = vld [vmem:[#allocation52_spill] sm:$0xff] }
 0x30e   : > { %v4427_v45 = vpop.f32.mrf.mxu1  ;;  %v2945_v19 = vadd.f32 %v6251_v7, %v2769_v10  ;;  %v6673_v7 = vld [vmem:[#allocation59_spill] sm:$0xff]  ;;  %v2359_v10 = vadd.f32 %v6674_v22, %v2205_v53 }
 0x30f   : > { %v6244_v37 = vpop.f32.mrf.mxu0  ;;  %v6667_v23 = vld [vmem:[#allocation66_spill] sm:$0xff] }
 0x311   : > { %v6253_v42 = vpop.f32.mrf.mxu0 }
 0x313   : > { %v6258_v16 = vpop.f32.mrf.mxu0 }
 0x315   : > { %v4442_v36 = vpop.f32.mrf.mxu0 }
 0x316   : > { %v3118_v33 = vadd.f32 %v4442_v36, %v2942_v29  ;;  %v6662_v36 = vld [vmem:[#allocation65_spill] sm:$0xff] }
 0x317   : > { %v3053_v25 = vpop.f32.mrf.mxu0  ;;  %v2774_v27 = vadd.f32 %v6662_v36, %v2355_v46 }
 0x318   : > { %v3116_v5 = vadd.f32 %v3053_v25, %v2940_v48  ;;  %v3141_v38 = vadd.f32 %v6275_v18, %v3118_v33  ;;  %v2353_v33 = vadd.f32 %v6663_v1, %v2199_v34 }
 0x319   : > { %v4443_v4 = vpop.f32.mrf.mxu0 }
 0x31a   : > { %v3119_v30 = vadd.f32 %v4443_v4, %v2943_v54  ;;  %v3139_v56 = vadd.f32 %v6275_v18, %v3116_v5  ;;  %v3157_v47 = vmax.f32 %v3141_v38, 0.0  ;;  %v6666_v5 = vld [vmem:[#allocation42_spill] sm:$0xff]  ;;  %v2772_v44 = vadd.f32 %v6667_v23, %v2353_v33  ;;  %v2912_v4 = vpop.f32.mrf.mxu1 }
 0x31b   : > { %v3056_v35 = vpop.f32.mrf.mxu0  ;;  %v2052_v54 = vadd.f32 %v6666_v5, %v6665_v43  ;;  %v6678_v43 = vld [vmem:[#allocation60_spill] sm:$0xff] }
 0x31c   : > { %v3142_v21 = vadd.f32 %v6275_v18, %v3119_v30  ;;  %v3117_v55 = vadd.f32 %v3056_v35, %v2941_v40  ;;  %v3155_v17 = vmax.f32 %v3139_v56, 0.0  ;;  %v2354_v35 = vadd.f32 %v6672_v26, %v2200_v8  ;;  %v4430_v24 = vpop.f32.mrf.mxu1 }
 0x31d   : > { %v4446_v11 = vpop.f32.mrf.mxu0  ;;  %v2206_v57 = vadd.f32 %v6673_v7, %v2052_v54  ;;  %v2948_v0 = vadd.f32 %v2909_v3, %v2772_v44 }
 0x31e   : > { %v3158_v62 = vmax.f32 %v3142_v21, 0.0  ;;  %v3140_v12 = vadd.f32 %v6275_v18, %v3117_v55  ;;  %v3122_v29 = vadd.f32 %v4446_v11, %v2946_v50  ;;  %v2950_v50 = vadd.f32 %v6263_v9, %v2774_v27 }
 0x31f   : > { %v3069_v48 = vpop.f32.mrf.mxu0  ;;  %v2773_v15 = vadd.f32 %v6233_v14, %v2354_v35  ;;  %v2778_v9 = vadd.f32 %v6239_v49, %v2359_v10  ;;  %v2951_v14 = vadd.f32 %v4427_v45, %v2775_v58 }
 0x320   : > { %v3172_v41 = vpack.c.bf16 %v3158_v62, %v3157_v47  ;;  %v3156_v2 = vmax.f32 %v3140_v12, 0.0  ;;  %v3120_v25 = vadd.f32 %v3069_v48, %v2944_v39  ;;  %v3145_v40 = vadd.f32 %v6275_v18, %v3122_v29  ;;  %v6675_v62 = vld [vmem:[#allocation61_spill] sm:$0xff]  ;;  %v6676_v29 = vld [vmem:[#allocation54_spill] sm:$0xff]  ;;  %v2925_v48 = vpop.f32.mrf.mxu1 }
 0x321   : > { %v4447_v38 = vpop.f32.mrf.mxu0  ;;  %v2204_v12 = vadd.f32 %v6675_v62, %v2050_v51  ;;  %v2357_v52 = vadd.f32 %v6676_v29, %v2203_v32  ;;  %v2949_v53 = vadd.f32 %v2912_v4, %v2773_v15 }
 0x322   : > { %v3171_v30 = vpack.c.bf16 %v3156_v2, %v3155_v17  ;;  %v3123_v34 = vadd.f32 %v4447_v38, %v2947_v63  ;;  %v3143_v21 = vadd.f32 %v6275_v18, %v3120_v25  ;;  %v3161_v46 = vmax.f32 %v3145_v40, 0.0  ;;  %v6677_v63 = vld [vmem:[#allocation57_spill] sm:$0xff]  ;;  %v4431_v59 = vpop.f32.mrf.mxu1 }
 0x323   : > { %v3072_v56 = vpop.f32.mrf.mxu0  ;;  %v2776_v3 = vadd.f32 %v6244_v37, %v2357_v52  ;;  %v2360_v17 = vadd.f32 %v6677_v63, %v2206_v57  ;;  %v2358_v5 = vadd.f32 %v6678_v43, %v2204_v12  ;;  %v2954_v37 = vadd.f32 %v4430_v24, %v2778_v9 }
 0x324   : > { %v3146_v55 = vadd.f32 %v6275_v18, %v3123_v34  ;;  %v3121_v28 = vadd.f32 %v3072_v56, %v2945_v19  ;;  %4464 = vmatprep.mubr.msk.bf16.mxu1 %vm701_vm1, %v3171_v30  ;;  %v3159_v36 = vmax.f32 %v3143_v21, 0.0  ;;  %v2928_v58 = vpop.f32.mrf.mxu1 }
 0x325   : > { %v4450_v31 = vpop.f32.mrf.mxu0  ;;  %4465 = vmatmul.mubr.msk.bf16.vlgmr.msra.gmra.mxu1 %vm701_vm1, %v3172_v41  ;;  %v2779_v49 = vadd.f32 %v6253_v42, %v2360_v17  ;;  %v2777_v13 = vadd.f32 %v6258_v16, %v2358_v5  ;;  %v2952_v4 = vadd.f32 %v2925_v48, %v2776_v3  ;;  %v4044_v3 = vld [vmem:[%s5511_s11 + $0x10] sm:$0xff]  }
 0x326   : > { %v3162_v11 = vmax.f32 %v3146_v55, 0.0  ;;  %v3144_v39 = vadd.f32 %v6275_v18, %v3121_v28  ;;  %v3126_v47 = vadd.f32 %v4450_v31, %v2950_v50 }
 0x327   : > { %v3085_v8 = vpop.f32.mrf.mxu0  ;;  %v2955_v20 = vadd.f32 %v4431_v59, %v2779_v49  ;;  %v2953_v21 = vadd.f32 %v2928_v58, %v2777_v13  ;;  %v4021_v49 = vunpack.c.l.bf16 %v4044_v3 }
 0x328   : > { %v3174_v27 = vpack.c.bf16 %v3162_v11, %v3161_v46  ;;  %v3160_v1 = vmax.f32 %v3144_v39, 0.0  ;;  %v3124_v33 = vadd.f32 %v3085_v8, %v2948_v0  ;;  %v3149_v25 = vadd.f32 %v6275_v18, %v3126_v47  ;;  %v4043_v46 = vld [vmem:[%s5511_s11 + $0x8] sm:$0xff]   ;;  %v6351_v11 = vld [vmem:[%s6679_s24] ss:$0 sm:$0xff]  ;;  %v4012_v39 = vld [vmem:[%s5511_s11] sm:$0xff]  }
 0x329   : > { %v4451_v41 = vpop.f32.mrf.mxu0  ;;  %v4017_v47 = vunpack.c.l.bf16 %v4043_v46  ;;  %v4013_v12 = vunpack.c.l.bf16 %v4012_v39  ;;  %v4018_v8 = vunpack.c.h.bf16 %v4043_v46  ;;  %v4014_v48 = vunpack.c.h.bf16 %v4012_v39 }
 0x32a   : > { %v3173_v2 = vpack.c.bf16 %v3160_v1, %v3159_v36  ;;  %v3127_v60 = vadd.f32 %v4451_v41, %v2951_v14  ;;  %v3147_v54 = vadd.f32 %v6275_v18, %v3124_v33  ;;  %v3165_v30 = vmax.f32 %v3149_v25, 0.0  ;;  %v4045_v14 = vld [vmem:[%s5511_s11 + $0x18] sm:$0xff]  }
 0x32b   : > { %v3088_v45 = vpop.f32.mrf.mxu0  ;;  %v4025_v17 = vunpack.c.l.bf16 %v4045_v14 }
 0x32c   : > { %v3150_v23 = vadd.f32 %v6275_v18, %v3127_v60  ;;  %v3125_v44 = vadd.f32 %v3088_v45, %v2949_v53  ;;  %4468 = vmatprep.mubr.msk.bf16.mxu1 %vm701_vm1, %v3173_v2  ;;  %v3163_v32 = vmax.f32 %v3147_v54, 0.0 }
 0x32d   : > { %v4454_v38 = vpop.f32.mrf.mxu0  ;;  %4469 = vmatmul.mubr.msk.bf16.gmra.mxu1 %vm701_vm1, %v3174_v27 }
 0x32e   : > { %v3166_v42 = vmax.f32 %v3150_v23, 0.0  ;;  %v3148_v40 = vadd.f32 %v6275_v18, %v3125_v44  ;;  %v3130_v34 = vadd.f32 %v4454_v38, %v2954_v37  ;;  %v4026_v44 = vunpack.c.h.bf16 %v4045_v14 }
 0x32f   : > { %v3101_v19 = vpop.f32.mrf.mxu0 }
 0x330   : > { %v3176_v61 = vpack.c.bf16 %v3166_v42, %v3165_v30  ;;  %v3164_v6 = vmax.f32 %v3148_v40, 0.0  ;;  %v3128_v51 = vadd.f32 %v3101_v19, %v2952_v4  ;;  %v3153_v16 = vadd.f32 %v6275_v18, %v3130_v34  ;;  %v4047_v4 = vld [vmem:[%s5511_s11 + $0x28] sm:$0xff]  }
 0x331   : > { %v4455_v26 = vpop.f32.mrf.mxu0  ;;  %v4022_v42 = vunpack.c.h.bf16 %v4044_v3 }
 0x332   : > { %v3175_v35 = vpack.c.bf16 %v3164_v6, %v3163_v32  ;;  %v3131_v56 = vadd.f32 %v4455_v26, %v2955_v20  ;;  %v3151_v28 = vadd.f32 %v6275_v18, %v3128_v51  ;;  %v3169_v57 = vmax.f32 %v3153_v16, 0.0  ;;  %v4046_v32 = vld [vmem:[%s5511_s11 + $0x20] sm:$0xff]  }
 0x333   : > { %v3104_v55 = vpop.f32.mrf.mxu0  ;;  %v4033_v6 = vunpack.c.l.bf16 %v4047_v4  ;;  %v4030_v46 = vunpack.c.h.bf16 %v4046_v32 }
 0x334   : > { %v3154_v50 = vadd.f32 %v6275_v18, %v3131_v56  ;;  %v3129_v7 = vadd.f32 %v3104_v55, %v2953_v21  ;;  %4472 = vmatprep.mubr.msk.bf16.mxu1 %vm701_vm1, %v3175_v35  ;;  %v3167_v22 = vmax.f32 %v3151_v28, 0.0  ;;  %v4029_v56 = vunpack.c.l.bf16 %v4046_v32 }
 0x335   : > { %4473 = vmatmul.mubr.msk.bf16.gmra.mxu1 %vm701_vm1, %v3176_v61 }
 0x336   : > { %v3170_v15 = vmax.f32 %v3154_v50, 0.0  ;;  %v3152_v24 = vadd.f32 %v6275_v18, %v3129_v7 }
 0x338   : > { %v3178_v10 = vpack.c.bf16 %v3170_v15, %v3169_v57  ;;  %v3168_v31 = vmax.f32 %v3152_v24, 0.0  ;;  %v4034_v57 = vunpack.c.h.bf16 %v4047_v4 }
 0x33a   : > { %v3177_v0 = vpack.c.bf16 %v3168_v31, %v3167_v22  ;;  %v4049_v31 = vld [vmem:[%s5511_s11 + $0x38] sm:$0xff]  }
 0x33c   : > { %4476 = vmatprep.mubr.msk.bf16.mxu1 %vm701_vm1, %v3177_v0 }
 0x33d   : > { %4477 = vmatmul.mubr.msk.bf16.gmra.mxu1 %vm701_vm1, %v3178_v10 }
 0x3e5   : > { %v4466_v62 = vpop.f32.mrf.mxu1 }
 0x3e6   : > { %v3285_v18 = vadd.f32 %v4466_v62, %v6351_v11 }
 0x3e7   : > { %v3276_v9 = vpop.f32.mrf.mxu1 }
 0x3e8   : > { %v3373_v29 = vadd.f32 %v4017_v47, %v3285_v18  ;;  %v3277_v52 = vadd.f32 %v6351_v11, %v3276_v9 }
 0x3e9   : > { %v4467_v36 = vpop.f32.mrf.mxu1 }
 0x3ea   : > { %v3389_v27 = vmax.f32 %v3373_v29, 0.0  ;;  %v3371_v1 = vadd.f32 %v4013_v12, %v3277_v52  ;;  %v3288_v33 = vadd.f32 %v4467_v36, %v6351_v11  ;;  %v4048_v12 = vld [vmem:[%s5511_s11 + $0x30] sm:$0xff]   ;;  %v4041_v29 = vunpack.c.l.bf16 %v4049_v31  ;;  %s3484_s11 = scalar_lea.sflag [#allocation5], %s5480_s22 }
 0x3eb   : > { %v3279_v63 = vpop.f32.mrf.mxu1 }
 0x3ec   : > { %v3996_v41 = vpack.c.bf16 %v3389_v27, %v3389_v27  ;;  %v3387_v2 = vmax.f32 %v3371_v1, 0.0  ;;  %v3374_v25 = vadd.f32 %v4018_v8, %v3288_v33  ;;  %v3280_v60 = vadd.f32 %v6351_v11, %v3279_v63 }
 0x3ed   : > { %v4470_v53 = vpop.f32.mrf.mxu1  ;;  %v4037_v1 = vunpack.c.l.bf16 %v4048_v12 }
 0x3ee   : > { %3469 = vst.msk [vmem:[%s6361_s12 + $0x8] sm:$0xf] %vm1040_vm9, %v3996_v41  ;;  %v3994_v43 = vpack.c.bf16 %v3387_v2, %v3387_v2  ;;  %v3390_v5 = vmax.f32 %v3374_v25, 0.0  ;;  %v3372_v45 = vadd.f32 %v4014_v48, %v3280_v60  ;;  %v3301_v54 = vadd.f32 %v4470_v53, %v6351_v11 }
 0x3ef   : > { %v3292_v23 = vpop.f32.mrf.mxu1  ;;  %v4042_v41 = vunpack.c.h.bf16 %v4049_v31 }
 0x3f0   : > { %3467 = vst.msk [vmem:[%s6361_s12] sm:$0xf] %vm1040_vm9, %v3994_v43  ;;  %v3997_v37 = vpack.c.bf16 %v3390_v5, %v3390_v5  ;;  %v3388_v59 = vmax.f32 %v3372_v45, 0.0  ;;  %v3377_v13 = vadd.f32 %v4025_v17, %v3301_v54  ;;  %v3293_v38 = vadd.f32 %v6351_v11, %v3292_v23 }
 0x3f1   : > { %v4471_v30 = vpop.f32.mrf.mxu1  ;;  %v4038_v43 = vunpack.c.h.bf16 %v4048_v12 }
 0x3f2   : > { %3470 = vst.msk [vmem:[%s6361_s12 + $0xc] sm:$0xf] %vm1040_vm9, %v3997_v37  ;;  %v3995_v40 = vpack.c.bf16 %v3388_v59, %v3388_v59  ;;  %v3393_v34 = vmax.f32 %v3377_v13, 0.0  ;;  %v3375_v19 = vadd.f32 %v4021_v49, %v3293_v38  ;;  %v3304_v20 = vadd.f32 %v4471_v30, %v6351_v11 }
 0x3f3   : > { %v3295_v61 = vpop.f32.mrf.mxu1 }
 0x3f4   : > { %3468 = vst.msk [vmem:[%s6361_s12 + $0x4] sm:$0xf] %vm1040_vm9, %v3995_v40  ;;  %v4000_v51 = vpack.c.bf16 %v3393_v34, %v3393_v34  ;;  %v3391_v58 = vmax.f32 %v3375_v19, 0.0  ;;  %v3378_v26 = vadd.f32 %v4026_v44, %v3304_v20  ;;  %v3296_v35 = vadd.f32 %v6351_v11, %v3295_v61 }
 0x3f5   : > { %v4474_v16 = vpop.f32.mrf.mxu1 }
 0x3f6   : > { %3473 = vst.msk [vmem:[%s6361_s12 + $0x18] sm:$0xf] %vm1040_vm9, %v4000_v51  ;;  %v3998_v21 = vpack.c.bf16 %v3391_v58, %v3391_v58  ;;  %v3394_v55 = vmax.f32 %v3378_v26, 0.0  ;;  %v3376_v28 = vadd.f32 %v4022_v42, %v3296_v35  ;;  %v3317_v50 = vadd.f32 %v4474_v16, %v6351_v11 }
 0x3f7   : > { %v3308_v7 = vpop.f32.mrf.mxu1 }
 0x3f8   : > { %3471 = vst.msk [vmem:[%s6361_s12 + $0x10] sm:$0xf] %vm1040_vm9, %v3998_v21  ;;  %v4001_v15 = vpack.c.bf16 %v3394_v55, %v3394_v55  ;;  %v3392_v24 = vmax.f32 %v3376_v28, 0.0  ;;  %v3381_v22 = vadd.f32 %v4033_v6, %v3317_v50  ;;  %v3309_v10 = vadd.f32 %v6351_v11, %v3308_v7 }
 0x3f9   : > { %v4475_v0 = vpop.f32.mrf.mxu1 }
 0x3fa   : > { %3474 = vst.msk [vmem:[%s6361_s12 + $0x1c] sm:$0xf] %vm1040_vm9, %v4001_v15  ;;  %v3999_v39 = vpack.c.bf16 %v3392_v24, %v3392_v24  ;;  %v3397_v47 = vmax.f32 %v3381_v22, 0.0  ;;  %v3379_v62 = vadd.f32 %v4029_v56, %v3309_v10  ;;  %v3320_v18 = vadd.f32 %v4475_v0, %v6351_v11 }
 0x3fb   : > { %v3311_v9 = vpop.f32.mrf.mxu1 }
 0x3fc   : > { %3472 = vst.msk [vmem:[%s6361_s12 + $0x14] sm:$0xf] %vm1040_vm9, %v3999_v39  ;;  %v4004_v52 = vpack.c.bf16 %v3397_v47, %v3397_v47  ;;  %v3395_v8 = vmax.f32 %v3379_v62, 0.0  ;;  %v3382_v14 = vadd.f32 %v4034_v57, %v3320_v18  ;;  %v3312_v36 = vadd.f32 %v6351_v11, %v3311_v9 }
 0x3fd   : > { %v4478_v27 = vpop.f32.mrf.mxu1 }
 0x3fe   : > { %3477 = vst.msk [vmem:[%s6361_s12 + $0x28] sm:$0xf] %vm1040_vm9, %v4004_v52  ;;  %v4002_v33 = vpack.c.bf16 %v3395_v8, %v3395_v8  ;;  %v3398_v48 = vmax.f32 %v3382_v14, 0.0  ;;  %v3380_v3 = vadd.f32 %v4030_v46, %v3312_v36  ;;  %v3333_v63 = vadd.f32 %v4478_v27, %v6351_v11 }
 0x3ff   : > { %v3324_v17 = vpop.f32.mrf.mxu1 }
 0x400   : > { %3475 = vst.msk [vmem:[%s6361_s12 + $0x20] sm:$0xf] %vm1040_vm9, %v4002_v33  ;;  %v4005_v2 = vpack.c.bf16 %v3398_v48, %v3398_v48  ;;  %v3396_v25 = vmax.f32 %v3380_v3, 0.0  ;;  %v3385_v60 = vadd.f32 %v4041_v29, %v3333_v63  ;;  %v3325_v53 = vadd.f32 %v6351_v11, %v3324_v17 }
 0x401   : > { %v4479_v49 = vpop.f32.mrf.mxu1 }
 0x402   : > { %3478 = vst.msk [vmem:[%s6361_s12 + $0x2c] sm:$0xf] %vm1040_vm9, %v4005_v2  ;;  %v4003_v5 = vpack.c.bf16 %v3396_v25, %v3396_v25  ;;  %v3401_v45 = vmax.f32 %v3385_v60, 0.0  ;;  %v3383_v54 = vadd.f32 %v4037_v1, %v3325_v53  ;;  %v3336_v23 = vadd.f32 %v4479_v49, %v6351_v11 }
 0x403   : > { %v3327_v44 = vpop.f32.mrf.mxu1 }
 0x404   : > { %3476 = vst.msk [vmem:[%s6361_s12 + $0x24] sm:$0xf] %vm1040_vm9, %v4003_v5  ;;  %v4008_v37 = vpack.c.bf16 %v3401_v45, %v3401_v45  ;;  %v3399_v59 = vmax.f32 %v3383_v54, 0.0  ;;  %v3386_v13 = vadd.f32 %v4042_v41, %v3336_v23  ;;  %v3328_v38 = vadd.f32 %v6351_v11, %v3327_v44 }
 0x406   : > { %3481 = vst.msk [vmem:[%s6361_s12 + $0x38] sm:$0xf] %vm1040_vm9, %v4008_v37  ;;  %v4006_v4 = vpack.c.bf16 %v3399_v59, %v3399_v59  ;;  %v3402_v30 = vmax.f32 %v3386_v13, 0.0  ;;  %v3384_v42 = vadd.f32 %v4038_v43, %v3328_v38 }
 0x408   : > { %3479 = vst.msk [vmem:[%s6361_s12 + $0x30] sm:$0xf] %vm1040_vm9, %v4006_v4  ;;  %v4009_v40 = vpack.c.bf16 %v3402_v30, %v3402_v30  ;;  %v3400_v34 = vmax.f32 %v3384_v42, 0.0 }
 0x40a   : > { %3482 = vst.msk [vmem:[%s6361_s12 + $0x3c] sm:$0xf] %vm1040_vm9, %v4009_v40  ;;  %v4007_v11 = vpack.c.bf16 %v3400_v34, %v3400_v34 }
 0x40c   : > { %3480 = vst.msk [vmem:[%s6361_s12 + $0x34] sm:$0xf] %vm1040_vm9, %v4007_v11 }
 0x40d   : > { %4918 = shalt.err (!%p4915_p1)
}
 0x40e   : > { %s4919_s1 = scalar_lea.hbm %s6417_s2, 1024  ;;  %s4923_s14 = scalar_lea.hbm %s6681_s3, 4096 }
 0x40f   : > { %p4920_p0 = scmp.ne.s32.totalorder %s6417_s2, %s4919_s1  ;;  %p4924_p2 = scmp.lt.s32.totalorder %s6417_s2, %s6681_s3 }
 0x410   : > { %p4925_p10 = scmp.lt.s32.totalorder %s4923_s14, %s4919_s1 }
 0x411   : > { %p4921_p6 = pnand %p4920_p0, %p6682_p3 }
 0x412   : > { %p4926_p12 = por %p4925_p10, %p4924_p2 }
 0x413   : > { %p4922_p5 = pneg %p4921_p6 }
 0x415   : > { %p4927_p7 = pnand %p4926_p12, %p4922_p5 }
 0x417   : > { %4930 = shalt.err (!%p4927_p7)
}
 0x418   : > { %s5083_s13 = smov 64   ;;  %s5084_s24 = smov 4  }
 0x419   : > { %4500 = dma.vmem_to_hbm [thread:$0]  (%p6682_p3), %s6410_s29, 1024, %s6417_s2, %s3484_s11, %s5083_s13, %s5083_s13, %s5084_s24  }
 0x41a PF: > { %p4536_p11 = scmp.ge.s32.totalorder %s5069_s26, 2  ;;  %s3515_s12 = sand.u32 1, %s5041_s19  }
 0x41b   : > { %p6683_p8 = scmp.ne.s32.totalorder %s6582_s17, 0  ;;  %s3516_s30 = scalar_lea.sflag [#allocation5], %s3515_s12 }
 0x41d   : > { %p4526_p9 = pnand %p4536_p11, %p6683_p8 }
 0x41f   : > { %p4527_p13 = pneg %p4526_p9 }
 0x421   : > { %5012 = dma.done.wait (%p4527_p13), %s3516_s30, 1024  }
 0x422   : > { %5014 = vsyncadd (%p4527_p13), %s3516_s30, 4294966272  ;;  %s33_s26 = sadd.s32 1, %s5069_s26   ;;  %s6685_s13 = sld [smem:[#allocation24_spill]] }
 0x423   : > { %p6449_p4 = scmp.ge.s32.totalorder %s33_s26, 6   ;;  %s6686_s14 = sld [smem:[#allocation25_spill]] }
 0x424   : > { %s6687_s16 = sld [smem:[#allocation26_spill]]  ;;  %s6696_s15 = smov %s6714_s4 }
 0x425   : > { %s6688_s17 = sld [smem:[#allocation27_spill]]  ;;  %s6697_s19 = smov %s5045_s20 }
 0x426   : > { %s6689_s18 = sld [smem:[#allocation39_spill]] }
 0x427   : > { %s6690_s7 = sld [smem:[#allocation28_spill]] }
 0x428   : > { %s6691_s21 = sld [smem:[#allocation40_spill]] }
 0x429   : > { %s6692_s22 = sld [smem:[#allocation31_spill]]  ;;  %32 = sbr.rel (!%p6449_p4) target bundleno = 27 (0x1b), region = 164 }
 0x42a   : > { %s6693_s23 = sld [smem:[#allocation32_spill]] }
 0x42b   : > { %s6694_s24 = sld [smem:[#allocation34_spill]] }
 0x42c   : > { %s6695_s25 = sld [smem:[#allocation35_spill]] }
 0x42d   : > { %s6698_s20 = smov %s6690_s7 }
 0x42e   :  { %3521 = vsyncpa [#allocation4], 1 }
 0x42f   :  { %3523 = vsyncpa [#allocation4 + $0x1], 1 }
 0x430   :  { %3524 = vsyncpa [#allocation7], 1 }
 0x431   :  { %3526 = vsyncpa [#allocation7 + $0x1], 1 }
 0x432   :  { %3527 = vsyncpa [#allocation10], 1 }
 0x433   :  { %3529 = vsyncpa [#allocation10 + $0x1], 1 }
 0x434   :  { %3530 = vsyncpa [#allocation13], 1 }
 0x435   :  { %3531 = vsyncpa [#allocation5], 1 }
 0x436   :  { %3533 = vsyncpa [#allocation5 + $0x1], 1 }

</bundles_post_ra>
